<compile_context>
chip_gen: v7x
topology: tpu7x:2x2x1
jax: 0.10.0
libtpu: 0.0.40
codegen_flags: <defaults>
</compile_context>

<pallas_src>
import functools

import jax
import jax.numpy as jnp
from jax import lax
from jax.experimental import pallas as pl
from jax.experimental.pallas import tpu as pltpu


def _vmem_limit_bytes():
    """Generation-aware VMEM scoped limit (v5e/v6e ~96 MiB, v7x ~48 MiB)."""
    try:
        cap = pltpu.get_tpu_info().vmem_capacity_bytes
    except Exception:
        cap = 128 * 1024 * 1024
    return int(min(cap * 3 // 4, 100 * 1024 * 1024))


def _gates_to_hc(gates, c):
    """LSTM gate nonlinearity; PyTorch gate order i, f, g, o. f32 state."""
    H = c.shape[-1]
    i = jax.nn.sigmoid(gates[:, 0 * H:1 * H])
    f = jax.nn.sigmoid(gates[:, 1 * H:2 * H])
    g = jnp.tanh(gates[:, 2 * H:3 * H])
    o = jax.nn.sigmoid(gates[:, 3 * H:4 * H])
    c_new = f * c + i * g
    h_new = o * jnp.tanh(c_new)
    return h_new, c_new


def seq2seq_kernel(
    src_emb_ref,                          # (S*B, E_src) f32  time-major, flattened
    wih_f_ref, whh_f_ref, b_f_ref,        # encoder forward  (bf16, bf16, f32)
    wih_b_ref, whh_b_ref, b_b_ref,        # encoder backward (bf16, bf16, f32)
    w_mid_ref, b_mid_ref,                 # fused block-diag bridge (bf16, f32)
    wih_d_ref, whh_d_ref, b_d_ref,        # decoder LSTM (bf16, bf16, f32)
    w_fc_ref, b_fc_ref,                   # vocab projection (H_d, Vp) bf16, (1, Vp) f32
    tgt_tab_ref,                          # (Vp, E_tgt) bf16   padded target emb table
    sos_emb_ref,                          # (B, E_tgt) f32
    logits_ref,                           # out (T, B, Vp) f32  (time-major)
    pred_ref,                             # out (T, B, 1) int32
    xg_f_scr, xg_b_scr,                   # scratch (S*B, 4*H_e) f32
):
    SB = src_emb_ref.shape[0]
    H_e = whh_f_ref.shape[0]
    H_d = whh_d_ref.shape[0]
    Vp = w_fc_ref.shape[1]
    T, B, _ = logits_ref.shape
    S = SB // B
    bf16 = jnp.bfloat16

    # Hoist recurrent / decode weights once (VMEM-value resident across loops).
    whh_f = whh_f_ref[...]
    whh_b = whh_b_ref[...]
    wih_d = wih_d_ref[...]
    whh_d = whh_d_ref[...]
    w_fc = w_fc_ref[...]
    tgt_tab = tgt_tab_ref[...]

    # Pre-broadcast decoder-loop constants once (JAX does not CSE broadcast_in_dim).
    b_d_b = jnp.broadcast_to(b_d_ref[...], (B, 4 * H_d))
    b_fc_b = jnp.broadcast_to(b_fc_ref[...], (B, Vp))
    lane = lax.broadcasted_iota(jnp.int32, (B, Vp), 1)

    # ---- encoder input projections for ALL timesteps: two big MXU matmuls,
    #      off the serial critical path; biases folded in here once. ----
    x_all = src_emb_ref[...].astype(bf16)                                 # (S*B, E_src)
    xg_f_scr[...] = (jnp.dot(x_all, wih_f_ref[...],
                             preferred_element_type=jnp.float32) + b_f_ref[...])
    xg_b_scr[...] = (jnp.dot(x_all, wih_b_ref[...],
                             preferred_element_type=jnp.float32) + b_b_ref[...])

    # ---- encoder recurrence: fwd & bwd interleaved; per-step critical path is
    #      just h @ W_hh + gate math (no lane concatenation). ----
    zero = jnp.zeros((B, H_e), jnp.float32)

    def enc_body(t, carry):
        h_f, c_f, h_b, c_b = carry
        off_f = pl.multiple_of(t * B, B)
        off_b = pl.multiple_of((S - 1 - t) * B, B)
        g_f = xg_f_scr[pl.ds(off_f, B), :] + jnp.dot(
            h_f.astype(bf16), whh_f, preferred_element_type=jnp.float32)
        g_b = xg_b_scr[pl.ds(off_b, B), :] + jnp.dot(
            h_b.astype(bf16), whh_b, preferred_element_type=jnp.float32)
        h_f, c_f = _gates_to_hc(g_f, c_f)
        h_b, c_b = _gates_to_hc(g_b, c_b)
        return (h_f, c_f, h_b, c_b)

    h_f, c_f, h_b, c_b = lax.fori_loop(0, S, enc_body,
                                       (zero, zero, zero, zero), unroll=True)

    # ---- bridge: single block-diagonal matmul -> [h_dec | c_dec] (pure Linear,
    #      matching the reference module: no tanh). ----
    hc = jnp.concatenate([h_f, h_b, c_f, c_b], axis=-1).astype(bf16)      # (B, 4*H_e)
    bridged = (jnp.dot(hc, w_mid_ref[...], preferred_element_type=jnp.float32)
               + b_mid_ref[...])                                          # (B, 2*H_d)
    h0 = bridged[:, :H_d]
    c0 = bridged[:, H_d:]

    # ---- greedy autoregressive decoder ----
    def dec_body(t, carry):
        x, h, c = carry
        gates = (jnp.dot(x.astype(bf16), wih_d, preferred_element_type=jnp.float32)
                 + jnp.dot(h.astype(bf16), whh_d, preferred_element_type=jnp.float32)
                 + b_d_b)
        h, c = _gates_to_hc(gates, c)
        logits_t = (jnp.dot(h.astype(bf16), w_fc,
                            preferred_element_type=jnp.float32) + b_fc_b)  # (B, Vp)
        logits_ref[t] = logits_t                    # lane-dense (Vp % 128 == 0) store

        # greedy argmax (first max index, torch.argmax tie-break); padded vocab
        # columns carry a -1e30 bias so they can never win.
        mx = jnp.max(logits_t, axis=-1, keepdims=True)
        pred = jnp.min(jnp.where(logits_t == mx, lane, Vp),
                       axis=-1, keepdims=True)                              # (B, 1) i32
        pred_ref[t] = pred

        # next input = embedding(pred) via one-hot @ table (bf16 MXU operands).
        # TODO(synk): replace with a scalar-indexed / DMA row gather and vocab-chunk
        #             streaming of w_fc/logits for large vocab (v7x 64 MiB VMEM).
        onehot = (lane == pred).astype(bf16)                                # (B, Vp)
        x_next = jnp.dot(onehot, tgt_tab, preferred_element_type=jnp.float32)
        return (x_next, h, c)

    lax.fori_loop(0, T, dec_body, (sos_emb_ref[...], h0, c0), unroll=True)


@functools.partial(jax.jit, static_argnums=(2,))
def seq2seq_forward(src_tokens, params, max_len):
    """Eval-mode forward. Returns (logits (B, max_len, V), predicted_tokens (B, max_len))."""
    B, S = src_tokens.shape
    B_pad = ((B + 15) // 16) * 16                      # bf16-tile-safe sublane padding
    V = params["w_fc"].shape[1]
    Vp = ((V + 127) // 128) * 128                      # lane-dense vocab padding
    E_src = params["src_emb"].shape[1]
    E_tgt = params["tgt_emb"].shape[1]
    H_e = params["whh_f"].shape[0]
    H_d = params["whh_d"].shape[0]
    bf16 = jnp.bfloat16

    # glue: embedding gather + time-major flatten (+ batch pad)
    src_emb = params["src_emb"][src_tokens].astype(jnp.float32)   # (B, S, E_src)
    src_emb_tm = jnp.transpose(src_emb, (1, 0, 2))                # (S, B, E_src)
    src_emb_tm = jnp.pad(src_emb_tm, ((0, 0), (0, B_pad - B), (0, 0)))
    src_emb_flat = src_emb_tm.reshape(S * B_pad, E_src)

    # fused bridge: block-diagonal weight so one matmul yields [h_dec | c_dec]
    w_mid = jnp.zeros((4 * H_e, 2 * H_d), jnp.float32)
    w_mid = w_mid.at[:2 * H_e, :H_d].set(params["w_mid_h"])
    w_mid = w_mid.at[2 * H_e:, H_d:].set(params["w_mid_c"])
    b_mid = jnp.concatenate([params["b_mid_h"], params["b_mid_c"]], axis=-1)

    # vocab padded to a multiple of 128; padded logits columns biased to -1e30
    w_fc = jnp.pad(params["w_fc"], ((0, 0), (0, Vp - V)))
    b_fc = jnp.pad(params["b_fc"], ((0, 0), (0, Vp - V)), constant_values=-1e30)
    tgt_tab = jnp.pad(params["tgt_emb"], ((0, Vp - V), (0, 0)))

    # decoder start token = SOS id 2, broadcast over batch
    sos_emb = jnp.broadcast_to(params["tgt_emb"][2][None, :], (B_pad, E_tgt))
    sos_emb = sos_emb.astype(jnp.float32)

    inputs = (
        src_emb_flat,
        params["wih_f"].astype(bf16), params["whh_f"].astype(bf16), params["b_f"],
        params["wih_b"].astype(bf16), params["whh_b"].astype(bf16), params["b_b"],
        w_mid.astype(bf16), b_mid,
        params["wih_d"].astype(bf16), params["whh_d"].astype(bf16), params["b_d"],
        w_fc.astype(bf16), b_fc,
        tgt_tab.astype(bf16),
        sos_emb,
    )
    vmem = pl.BlockSpec(memory_space=pltpu.MemorySpace.VMEM)
    logits_tm, pred_tm = pl.pallas_call(
        seq2seq_kernel,
        out_shape=(jax.ShapeDtypeStruct((max_len, B_pad, Vp), jnp.float32),
                   jax.ShapeDtypeStruct((max_len, B_pad, 1), jnp.int32)),
        in_specs=[vmem] * len(inputs),
        out_specs=(vmem, vmem),
        scratch_shapes=[pltpu.VMEM((S * B_pad, 4 * H_e), jnp.float32),
                        pltpu.VMEM((S * B_pad, 4 * H_e), jnp.float32)],
        compiler_params=pltpu.CompilerParams(vmem_limit_bytes=_vmem_limit_bytes()),
    )(*inputs)

    logits = jnp.transpose(logits_tm, (1, 0, 2))[:B, :, :V]       # (B, max_len, V)
    pred = jnp.transpose(pred_tm[:, :, 0], (1, 0))[:B]            # (B, max_len)
    return logits, pred


def make_params(key, src_vocab, tgt_vocab, src_emb_dim, tgt_emb_dim,
                enc_hidden, dec_hidden):
    ks = jax.random.split(key, 20)
    s = 0.1

    def w(k, shape):
        return jax.random.normal(k, shape, jnp.float32) * s

    return {
        "src_emb":  w(ks[0], (src_vocab, src_emb_dim)),
        "tgt_emb":  w(ks[1], (tgt_vocab, tgt_emb_dim)),
        # encoder forward / backward LSTM
        "wih_f":    w(ks[2], (src_emb_dim, 4 * enc_hidden)),
        "whh_f":    w(ks[3], (enc_hidden, 4 * enc_hidden)),
        "b_f":      w(ks[4], (1, 4 * enc_hidden)),
        "wih_b":    w(ks[5], (src_emb_dim, 4 * enc_hidden)),
        "whh_b":    w(ks[6], (enc_hidden, 4 * enc_hidden)),
        "b_b":      w(ks[7], (1, 4 * enc_hidden)),
        # bridge linears (2*enc_hidden -> dec_hidden)
        "w_mid_h":  w(ks[8], (2 * enc_hidden, dec_hidden)),
        "b_mid_h":  w(ks[9], (1, dec_hidden)),
        "w_mid_c":  w(ks[10], (2 * enc_hidden, dec_hidden)),
        "b_mid_c":  w(ks[11], (1, dec_hidden)),
        # decoder LSTM + output projection
        "wih_d":    w(ks[12], (tgt_emb_dim, 4 * dec_hidden)),
        "whh_d":    w(ks[13], (dec_hidden, 4 * dec_hidden)),
        "b_d":      w(ks[14], (1, 4 * dec_hidden)),
        "w_fc":     w(ks[15], (dec_hidden, tgt_vocab)),
        "b_fc":     w(ks[16], (1, tgt_vocab)),
    }


if __name__ == "__main__":
    # small, deterministic config
    B, S = 2, 8
    src_vocab, tgt_vocab = 32, 32
    src_emb_dim, tgt_emb_dim = 16, 16
    enc_hidden, dec_hidden = 32, 32
    max_len = 8

    key = jax.random.PRNGKey(0)
    k_param, k_src = jax.random.split(key)
    params = make_params(k_param, src_vocab, tgt_vocab, src_emb_dim,
                         tgt_emb_dim, enc_hidden, dec_hidden)
    src = jax.random.randint(k_src, (B, S), 0, src_vocab, dtype=jnp.int32)

    logits, pred_tokens = jax.block_until_ready(
        seq2seq_forward(src, params, max_len))

    assert logits.shape == (B, max_len, tgt_vocab)
    assert pred_tokens.shape == (B, max_len)
    assert jnp.all(jnp.isfinite(logits))
    assert jnp.all((pred_tokens >= 0) & (pred_tokens < tgt_vocab))
    print("KERNEL_OK")
</pallas_src>

<mosaic_0001>
module attributes {stable_mosaic.version = 11 : i64} {
  func.func @seq2seq_kernel(%arg0: memref<128x16xf32, #tpu.memory_space<vmem>>, %arg1: memref<16x128xbf16, #tpu.memory_space<vmem>>, %arg2: memref<32x128xbf16, #tpu.memory_space<vmem>>, %arg3: memref<1x128xf32, #tpu.memory_space<vmem>>, %arg4: memref<16x128xbf16, #tpu.memory_space<vmem>>, %arg5: memref<32x128xbf16, #tpu.memory_space<vmem>>, %arg6: memref<1x128xf32, #tpu.memory_space<vmem>>, %arg7: memref<128x64xbf16, #tpu.memory_space<vmem>>, %arg8: memref<1x64xf32, #tpu.memory_space<vmem>>, %arg9: memref<16x128xbf16, #tpu.memory_space<vmem>>, %arg10: memref<32x128xbf16, #tpu.memory_space<vmem>>, %arg11: memref<1x128xf32, #tpu.memory_space<vmem>>, %arg12: memref<32x128xbf16, #tpu.memory_space<vmem>>, %arg13: memref<1x128xf32, #tpu.memory_space<vmem>>, %arg14: memref<128x16xbf16, #tpu.memory_space<vmem>>, %arg15: memref<16x16xf32, #tpu.memory_space<vmem>>, %arg16: memref<8x16x128xf32, #tpu.memory_space<vmem>>, %arg17: memref<8x16x1xi32, #tpu.memory_space<vmem>>, %arg18: memref<128x128xf32, #tpu.memory_space<vmem>>, %arg19: memref<128x128xf32, #tpu.memory_space<vmem>>) attributes {dimension_semantics = [], scalar_prefetch = 0 : i64, scratch_operands = 2 : i64, tpu.core_type = #tpu.core_type<tc>} {
    %c0 = arith.constant 0 : index
    %c0_0 = arith.constant 0 : index
    %0 = vector.load %arg2[%c0, %c0_0] : memref<32x128xbf16, #tpu.memory_space<vmem>>, vector<32x128xbf16>
    %c0_1 = arith.constant 0 : index
    %c0_2 = arith.constant 0 : index
    %1 = vector.load %arg5[%c0_1, %c0_2] : memref<32x128xbf16, #tpu.memory_space<vmem>>, vector<32x128xbf16>
    %c0_3 = arith.constant 0 : index
    %c0_4 = arith.constant 0 : index
    %2 = vector.load %arg9[%c0_3, %c0_4] : memref<16x128xbf16, #tpu.memory_space<vmem>>, vector<16x128xbf16>
    %c0_5 = arith.constant 0 : index
    %c0_6 = arith.constant 0 : index
    %3 = vector.load %arg10[%c0_5, %c0_6] : memref<32x128xbf16, #tpu.memory_space<vmem>>, vector<32x128xbf16>
    %c0_7 = arith.constant 0 : index
    %c0_8 = arith.constant 0 : index
    %4 = vector.load %arg12[%c0_7, %c0_8] : memref<32x128xbf16, #tpu.memory_space<vmem>>, vector<32x128xbf16>
    %c0_9 = arith.constant 0 : index
    %c0_10 = arith.constant 0 : index
    %5 = vector.load %arg14[%c0_9, %c0_10] : memref<128x16xbf16, #tpu.memory_space<vmem>>, vector<128x16xbf16>
    %c0_11 = arith.constant 0 : index
    %c0_12 = arith.constant 0 : index
    %6 = vector.load %arg11[%c0_11, %c0_12] : memref<1x128xf32, #tpu.memory_space<vmem>>, vector<1x128xf32>
    %7 = vector.shape_cast %6 : vector<1x128xf32> to vector<1x128xf32>
    %8 = vector.broadcast %7 : vector<1x128xf32> to vector<16x128xf32>
    %c0_13 = arith.constant 0 : index
    %c0_14 = arith.constant 0 : index
    %9 = vector.load %arg13[%c0_13, %c0_14] : memref<1x128xf32, #tpu.memory_space<vmem>>, vector<1x128xf32>
    %10 = vector.shape_cast %9 : vector<1x128xf32> to vector<1x128xf32>
    %11 = vector.broadcast %10 : vector<1x128xf32> to vector<16x128xf32>
    %12 = tpu.iota {dimensions = array<i32: 1>} : vector<16x128xi32>
    %c0_15 = arith.constant 0 : index
    %c0_16 = arith.constant 0 : index
    %13 = vector.load %arg0[%c0_15, %c0_16] : memref<128x16xf32, #tpu.memory_space<vmem>>, vector<128x16xf32>
    %14 = arith.truncf %13 : vector<128x16xf32> to vector<128x16xbf16>
    %c0_17 = arith.constant 0 : index
    %c0_18 = arith.constant 0 : index
    %15 = vector.load %arg1[%c0_17, %c0_18] : memref<16x128xbf16, #tpu.memory_space<vmem>>, vector<16x128xbf16>
    %cst = arith.constant dense<0.000000e+00> : vector<128x128xf32>
    %16 = tpu.matmul %14, %15, %cst {dimension_numbers = #tpu.dot_dimension_numbers<[1], [0], [0], [1], [0, 0, 1, 1], [], []>} : vector<128x16xbf16>, vector<16x128xbf16>, vector<128x128xf32> -> vector<128x128xf32>
    %c0_19 = arith.constant 0 : index
    %c0_20 = arith.constant 0 : index
    %17 = vector.load %arg3[%c0_19, %c0_20] : memref<1x128xf32, #tpu.memory_space<vmem>>, vector<1x128xf32>
    %18 = vector.broadcast %17 : vector<1x128xf32> to vector<128x128xf32>
    %19 = arith.addf %16, %18 : vector<128x128xf32>
    %c0_21 = arith.constant 0 : index
    %c0_22 = arith.constant 0 : index
    %20 = vector.load %arg18[%c0_21, %c0_22] : memref<128x128xf32, #tpu.memory_space<vmem>>, vector<128x128xf32>
    tpu.vector_store %arg18[%c0_21, %c0_22], %19 {strides = array<i32>} : memref<128x128xf32, #tpu.memory_space<vmem>>, vector<128x128xf32>,
    %c0_23 = arith.constant 0 : index
    %c0_24 = arith.constant 0 : index
    %21 = vector.load %arg4[%c0_23, %c0_24] : memref<16x128xbf16, #tpu.memory_space<vmem>>, vector<16x128xbf16>
    %cst_25 = arith.constant dense<0.000000e+00> : vector<128x128xf32>
    %22 = tpu.matmul %14, %21, %cst_25 {dimension_numbers = #tpu.dot_dimension_numbers<[1], [0], [0], [1], [0, 0, 1, 1], [], []>} : vector<128x16xbf16>, vector<16x128xbf16>, vector<128x128xf32> -> vector<128x128xf32>
    %c0_26 = arith.constant 0 : index
    %c0_27 = arith.constant 0 : index
    %23 = vector.load %arg6[%c0_26, %c0_27] : memref<1x128xf32, #tpu.memory_space<vmem>>, vector<1x128xf32>
    %24 = vector.broadcast %23 : vector<1x128xf32> to vector<128x128xf32>
    %25 = arith.addf %22, %24 : vector<128x128xf32>
    %c0_28 = arith.constant 0 : index
    %c0_29 = arith.constant 0 : index
    %26 = vector.load %arg19[%c0_28, %c0_29] : memref<128x128xf32, #tpu.memory_space<vmem>>, vector<128x128xf32>
    tpu.vector_store %arg19[%c0_28, %c0_29], %25 {strides = array<i32>} : memref<128x128xf32, #tpu.memory_space<vmem>>, vector<128x128xf32>,
    %cst_30 = arith.constant 0.000000e+00 : f32
    %27 = vector.broadcast %cst_30 : f32 to vector<16x32xf32>
    %c0_i32 = arith.constant 0 : i32
    %c16_i32 = arith.constant 16 : i32
    %28 = arith.muli %c0_i32, %c16_i32 : i32
    %29 = tpu.assume_multiple %28, 16 : i32
    %c7_i32 = arith.constant 7 : i32
    %30 = arith.subi %c7_i32, %c0_i32 : i32
    %c16_i32_31 = arith.constant 16 : i32
    %31 = arith.muli %30, %c16_i32_31 : i32
    %32 = tpu.assume_multiple %31, 16 : i32
    %33 = arith.index_cast %29 : i32 to index
    %c0_32 = arith.constant 0 : index
    %34 = vector.load %arg18[%33, %c0_32] : memref<128x128xf32, #tpu.memory_space<vmem>>, vector<16x128xf32>
    %35 = arith.truncf %27 : vector<16x32xf32> to vector<16x32xbf16>
    %cst_33 = arith.constant dense<0.000000e+00> : vector<16x128xf32>
    %36 = tpu.matmul %35, %0, %cst_33 {dimension_numbers = #tpu.dot_dimension_numbers<[1], [0], [0], [1], [0, 0, 1, 1], [], []>} : vector<16x32xbf16>, vector<32x128xbf16>, vector<16x128xf32> -> vector<16x128xf32>
    %37 = arith.addf %34, %36 : vector<16x128xf32>
    %38 = arith.index_cast %32 : i32 to index
    %c0_34 = arith.constant 0 : index
    %39 = vector.load %arg19[%38, %c0_34] : memref<128x128xf32, #tpu.memory_space<vmem>>, vector<16x128xf32>
    %40 = arith.truncf %27 : vector<16x32xf32> to vector<16x32xbf16>
    %cst_35 = arith.constant dense<0.000000e+00> : vector<16x128xf32>
    %41 = tpu.matmul %40, %1, %cst_35 {dimension_numbers = #tpu.dot_dimension_numbers<[1], [0], [0], [1], [0, 0, 1, 1], [], []>} : vector<16x32xbf16>, vector<32x128xbf16>, vector<16x128xf32> -> vector<16x128xf32>
    %42 = arith.addf %39, %41 : vector<16x128xf32>
    %43 = vector.extract_strided_slice %37 {offsets = [0, 0], sizes = [16, 32], strides = [1, 1]} : vector<16x128xf32> to vector<16x32xf32>
    %44 = arith.negf %43 : vector<16x32xf32>
    %45 = math.exp %44 : vector<16x32xf32>
    %cst_36 = arith.constant 1.000000e+00 : f32
    %46 = vector.broadcast %cst_36 : f32 to vector<16x32xf32>
    %47 = arith.addf %46, %45 : vector<16x32xf32>
    %48 = arith.divf %46, %47 : vector<16x32xf32>
    %49 = vector.extract_strided_slice %37 {offsets = [0, 32], sizes = [16, 32], strides = [1, 1]} : vector<16x128xf32> to vector<16x32xf32>
    %50 = arith.negf %49 : vector<16x32xf32>
    %51 = math.exp %50 : vector<16x32xf32>
    %cst_37 = arith.constant 1.000000e+00 : f32
    %52 = vector.broadcast %cst_37 : f32 to vector<16x32xf32>
    %53 = arith.addf %52, %51 : vector<16x32xf32>
    %54 = arith.divf %52, %53 : vector<16x32xf32>
    %55 = vector.extract_strided_slice %37 {offsets = [0, 64], sizes = [16, 32], strides = [1, 1]} : vector<16x128xf32> to vector<16x32xf32>
    %56 = math.tanh %55 : vector<16x32xf32>
    %57 = vector.extract_strided_slice %37 {offsets = [0, 96], sizes = [16, 32], strides = [1, 1]} : vector<16x128xf32> to vector<16x32xf32>
    %58 = arith.negf %57 : vector<16x32xf32>
    %59 = math.exp %58 : vector<16x32xf32>
    %cst_38 = arith.constant 1.000000e+00 : f32
    %60 = vector.broadcast %cst_38 : f32 to vector<16x32xf32>
    %61 = arith.addf %60, %59 : vector<16x32xf32>
    %62 = arith.divf %60, %61 : vector<16x32xf32>
    %63 = arith.mulf %54, %27 : vector<16x32xf32>
    %64 = arith.mulf %48, %56 : vector<16x32xf32>
    %65 = arith.addf %63, %64 : vector<16x32xf32>
    %66 = math.tanh %65 : vector<16x32xf32>
    %67 = arith.mulf %62, %66 : vector<16x32xf32>
    %68 = vector.extract_strided_slice %42 {offsets = [0, 0], sizes = [16, 32], strides = [1, 1]} : vector<16x128xf32> to vector<16x32xf32>
    %69 = arith.negf %68 : vector<16x32xf32>
    %70 = math.exp %69 : vector<16x32xf32>
    %cst_39 = arith.constant 1.000000e+00 : f32
    %71 = vector.broadcast %cst_39 : f32 to vector<16x32xf32>
    %72 = arith.addf %71, %70 : vector<16x32xf32>
    %73 = arith.divf %71, %72 : vector<16x32xf32>
    %74 = vector.extract_strided_slice %42 {offsets = [0, 32], sizes = [16, 32], strides = [1, 1]} : vector<16x128xf32> to vector<16x32xf32>
    %75 = arith.negf %74 : vector<16x32xf32>
    %76 = math.exp %75 : vector<16x32xf32>
    %cst_40 = arith.constant 1.000000e+00 : f32
    %77 = vector.broadcast %cst_40 : f32 to vector<16x32xf32>
    %78 = arith.addf %77, %76 : vector<16x32xf32>
    %79 = arith.divf %77, %78 : vector<16x32xf32>
    %80 = vector.extract_strided_slice %42 {offsets = [0, 64], sizes = [16, 32], strides = [1, 1]} : vector<16x128xf32> to vector<16x32xf32>
    %81 = math.tanh %80 : vector<16x32xf32>
    %82 = vector.extract_strided_slice %42 {offsets = [0, 96], sizes = [16, 32], strides = [1, 1]} : vector<16x128xf32> to vector<16x32xf32>
    %83 = arith.negf %82 : vector<16x32xf32>
    %84 = math.exp %83 : vector<16x32xf32>
    %cst_41 = arith.constant 1.000000e+00 : f32
    %85 = vector.broadcast %cst_41 : f32 to vector<16x32xf32>
    %86 = arith.addf %85, %84 : vector<16x32xf32>
    %87 = arith.divf %85, %86 : vector<16x32xf32>
    %88 = arith.mulf %79, %27 : vector<16x32xf32>
    %89 = arith.mulf %73, %81 : vector<16x32xf32>
    %90 = arith.addf %88, %89 : vector<16x32xf32>
    %91 = math.tanh %90 : vector<16x32xf32>
    %92 = arith.mulf %87, %91 : vector<16x32xf32>
    %c1_i32 = arith.constant 1 : i32
    %c16_i32_42 = arith.constant 16 : i32
    %93 = arith.muli %c1_i32, %c16_i32_42 : i32
    %94 = tpu.assume_multiple %93, 16 : i32
    %c7_i32_43 = arith.constant 7 : i32
    %95 = arith.subi %c7_i32_43, %c1_i32 : i32
    %c16_i32_44 = arith.constant 16 : i32
    %96 = arith.muli %95, %c16_i32_44 : i32
    %97 = tpu.assume_multiple %96, 16 : i32
    %98 = arith.index_cast %94 : i32 to index
    %c0_45 = arith.constant 0 : index
    %99 = vector.load %arg18[%98, %c0_45] : memref<128x128xf32, #tpu.memory_space<vmem>>, vector<16x128xf32>
    %100 = arith.truncf %67 : vector<16x32xf32> to vector<16x32xbf16>
    %cst_46 = arith.constant dense<0.000000e+00> : vector<16x128xf32>
    %101 = tpu.matmul %100, %0, %cst_46 {dimension_numbers = #tpu.dot_dimension_numbers<[1], [0], [0], [1], [0, 0, 1, 1], [], []>} : vector<16x32xbf16>, vector<32x128xbf16>, vector<16x128xf32> -> vector<16x128xf32>
    %102 = arith.addf %99, %101 : vector<16x128xf32>
    %103 = arith.index_cast %97 : i32 to index
    %c0_47 = arith.constant 0 : index
    %104 = vector.load %arg19[%103, %c0_47] : memref<128x128xf32, #tpu.memory_space<vmem>>, vector<16x128xf32>
    %105 = arith.truncf %92 : vector<16x32xf32> to vector<16x32xbf16>
    %cst_48 = arith.constant dense<0.000000e+00> : vector<16x128xf32>
    %106 = tpu.matmul %105, %1, %cst_48 {dimension_numbers = #tpu.dot_dimension_numbers<[1], [0], [0], [1], [0, 0, 1, 1], [], []>} : vector<16x32xbf16>, vector<32x128xbf16>, vector<16x128xf32> -> vector<16x128xf32>
    %107 = arith.addf %104, %106 : vector<16x128xf32>
    %108 = vector.extract_strided_slice %102 {offsets = [0, 0], sizes = [16, 32], strides = [1, 1]} : vector<16x128xf32> to vector<16x32xf32>
    %109 = arith.negf %108 : vector<16x32xf32>
    %110 = math.exp %109 : vector<16x32xf32>
    %cst_49 = arith.constant 1.000000e+00 : f32
    %111 = vector.broadcast %cst_49 : f32 to vector<16x32xf32>
    %112 = arith.addf %111, %110 : vector<16x32xf32>
    %113 = arith.divf %111, %112 : vector<16x32xf32>
    %114 = vector.extract_strided_slice %102 {offsets = [0, 32], sizes = [16, 32], strides = [1, 1]} : vector<16x128xf32> to vector<16x32xf32>
    %115 = arith.negf %114 : vector<16x32xf32>
    %116 = math.exp %115 : vector<16x32xf32>
    %cst_50 = arith.constant 1.000000e+00 : f32
    %117 = vector.broadcast %cst_50 : f32 to vector<16x32xf32>
    %118 = arith.addf %117, %116 : vector<16x32xf32>
    %119 = arith.divf %117, %118 : vector<16x32xf32>
    %120 = vector.extract_strided_slice %102 {offsets = [0, 64], sizes = [16, 32], strides = [1, 1]} : vector<16x128xf32> to vector<16x32xf32>
    %121 = math.tanh %120 : vector<16x32xf32>
    %122 = vector.extract_strided_slice %102 {offsets = [0, 96], sizes = [16, 32], strides = [1, 1]} : vector<16x128xf32> to vector<16x32xf32>
    %123 = arith.negf %122 : vector<16x32xf32>
    %124 = math.exp %123 : vector<16x32xf32>
    %cst_51 = arith.constant 1.000000e+00 : f32
    %125 = vector.broadcast %cst_51 : f32 to vector<16x32xf32>
    %126 = arith.addf %125, %124 : vector<16x32xf32>
    %127 = arith.divf %125, %126 : vector<16x32xf32>
    %128 = arith.mulf %119, %65 : vector<16x32xf32>
    %129 = arith.mulf %113, %121 : vector<16x32xf32>
    %130 = arith.addf %128, %129 : vector<16x32xf32>
    %131 = math.tanh %130 : vector<16x32xf32>
    %132 = arith.mulf %127, %131 : vector<16x32xf32>
    %133 = vector.extract_strided_slice %107 {offsets = [0, 0], sizes = [16, 32], strides = [1, 1]} : vector<16x128xf32> to vector<16x32xf32>
    %134 = arith.negf %133 : vector<16x32xf32>
    %135 = math.exp %134 : vector<16x32xf32>
    %cst_52 = arith.constant 1.000000e+00 : f32
    %136 = vector.broadcast %cst_52 : f32 to vector<16x32xf32>
    %137 = arith.addf %136, %135 : vector<16x32xf32>
    %138 = arith.divf %136, %137 : vector<16x32xf32>
    %139 = vector.extract_strided_slice %107 {offsets = [0, 32], sizes = [16, 32], strides = [1, 1]} : vector<16x128xf32> to vector<16x32xf32>
    %140 = arith.negf %139 : vector<16x32xf32>
    %141 = math.exp %140 : vector<16x32xf32>
    %cst_53 = arith.constant 1.000000e+00 : f32
    %142 = vector.broadcast %cst_53 : f32 to vector<16x32xf32>
    %143 = arith.addf %142, %141 : vector<16x32xf32>
    %144 = arith.divf %142, %143 : vector<16x32xf32>
    %145 = vector.extract_strided_slice %107 {offsets = [0, 64], sizes = [16, 32], strides = [1, 1]} : vector<16x128xf32> to vector<16x32xf32>
    %146 = math.tanh %145 : vector<16x32xf32>
    %147 = vector.extract_strided_slice %107 {offsets = [0, 96], sizes = [16, 32], strides = [1, 1]} : vector<16x128xf32> to vector<16x32xf32>
    %148 = arith.negf %147 : vector<16x32xf32>
    %149 = math.exp %148 : vector<16x32xf32>
    %cst_54 = arith.constant 1.000000e+00 : f32
    %150 = vector.broadcast %cst_54 : f32 to vector<16x32xf32>
    %151 = arith.addf %150, %149 : vector<16x32xf32>
    %152 = arith.divf %150, %151 : vector<16x32xf32>
    %153 = arith.mulf %144, %90 : vector<16x32xf32>
    %154 = arith.mulf %138, %146 : vector<16x32xf32>
    %155 = arith.addf %153, %154 : vector<16x32xf32>
    %156 = math.tanh %155 : vector<16x32xf32>
    %157 = arith.mulf %152, %156 : vector<16x32xf32>
    %c2_i32 = arith.constant 2 : i32
    %c16_i32_55 = arith.constant 16 : i32
    %158 = arith.muli %c2_i32, %c16_i32_55 : i32
    %159 = tpu.assume_multiple %158, 16 : i32
    %c7_i32_56 = arith.constant 7 : i32
    %160 = arith.subi %c7_i32_56, %c2_i32 : i32
    %c16_i32_57 = arith.constant 16 : i32
    %161 = arith.muli %160, %c16_i32_57 : i32
    %162 = tpu.assume_multiple %161, 16 : i32
    %163 = arith.index_cast %159 : i32 to index
    %c0_58 = arith.constant 0 : index
    %164 = vector.load %arg18[%163, %c0_58] : memref<128x128xf32, #tpu.memory_space<vmem>>, vector<16x128xf32>
    %165 = arith.truncf %132 : vector<16x32xf32> to vector<16x32xbf16>
    %cst_59 = arith.constant dense<0.000000e+00> : vector<16x128xf32>
    %166 = tpu.matmul %165, %0, %cst_59 {dimension_numbers = #tpu.dot_dimension_numbers<[1], [0], [0], [1], [0, 0, 1, 1], [], []>} : vector<16x32xbf16>, vector<32x128xbf16>, vector<16x128xf32> -> vector<16x128xf32>
    %167 = arith.addf %164, %166 : vector<16x128xf32>
    %168 = arith.index_cast %162 : i32 to index
    %c0_60 = arith.constant 0 : index
    %169 = vector.load %arg19[%168, %c0_60] : memref<128x128xf32, #tpu.memory_space<vmem>>, vector<16x128xf32>
    %170 = arith.truncf %157 : vector<16x32xf32> to vector<16x32xbf16>
    %cst_61 = arith.constant dense<0.000000e+00> : vector<16x128xf32>
    %171 = tpu.matmul %170, %1, %cst_61 {dimension_numbers = #tpu.dot_dimension_numbers<[1], [0], [0], [1], [0, 0, 1, 1], [], []>} : vector<16x32xbf16>, vector<32x128xbf16>, vector<16x128xf32> -> vector<16x128xf32>
    %172 = arith.addf %169, %171 : vector<16x128xf32>
    %173 = vector.extract_strided_slice %167 {offsets = [0, 0], sizes = [16, 32], strides = [1, 1]} : vector<16x128xf32> to vector<16x32xf32>
    %174 = arith.negf %173 : vector<16x32xf32>
    %175 = math.exp %174 : vector<16x32xf32>
    %cst_62 = arith.constant 1.000000e+00 : f32
    %176 = vector.broadcast %cst_62 : f32 to vector<16x32xf32>
    %177 = arith.addf %176, %175 : vector<16x32xf32>
    %178 = arith.divf %176, %177 : vector<16x32xf32>
    %179 = vector.extract_strided_slice %167 {offsets = [0, 32], sizes = [16, 32], strides = [1, 1]} : vector<16x128xf32> to vector<16x32xf32>
    %180 = arith.negf %179 : vector<16x32xf32>
    %181 = math.exp %180 : vector<16x32xf32>
    %cst_63 = arith.constant 1.000000e+00 : f32
    %182 = vector.broadcast %cst_63 : f32 to vector<16x32xf32>
    %183 = arith.addf %182, %181 : vector<16x32xf32>
    %184 = arith.divf %182, %183 : vector<16x32xf32>
    %185 = vector.extract_strided_slice %167 {offsets = [0, 64], sizes = [16, 32], strides = [1, 1]} : vector<16x128xf32> to vector<16x32xf32>
    %186 = math.tanh %185 : vector<16x32xf32>
    %187 = vector.extract_strided_slice %167 {offsets = [0, 96], sizes = [16, 32], strides = [1, 1]} : vector<16x128xf32> to vector<16x32xf32>
    %188 = arith.negf %187 : vector<16x32xf32>
    %189 = math.exp %188 : vector<16x32xf32>
    %cst_64 = arith.constant 1.000000e+00 : f32
    %190 = vector.broadcast %cst_64 : f32 to vector<16x32xf32>
    %191 = arith.addf %190, %189 : vector<16x32xf32>
    %192 = arith.divf %190, %191 : vector<16x32xf32>
    %193 = arith.mulf %184, %130 : vector<16x32xf32>
    %194 = arith.mulf %178, %186 : vector<16x32xf32>
    %195 = arith.addf %193, %194 : vector<16x32xf32>
    %196 = math.tanh %195 : vector<16x32xf32>
    %197 = arith.mulf %192, %196 : vector<16x32xf32>
    %198 = vector.extract_strided_slice %172 {offsets = [0, 0], sizes = [16, 32], strides = [1, 1]} : vector<16x128xf32> to vector<16x32xf32>
    %199 = arith.negf %198 : vector<16x32xf32>
    %200 = math.exp %199 : vector<16x32xf32>
    %cst_65 = arith.constant 1.000000e+00 : f32
    %201 = vector.broadcast %cst_65 : f32 to vector<16x32xf32>
    %202 = arith.addf %201, %200 : vector<16x32xf32>
    %203 = arith.divf %201, %202 : vector<16x32xf32>
    %204 = vector.extract_strided_slice %172 {offsets = [0, 32], sizes = [16, 32], strides = [1, 1]} : vector<16x128xf32> to vector<16x32xf32>
    %205 = arith.negf %204 : vector<16x32xf32>
    %206 = math.exp %205 : vector<16x32xf32>
    %cst_66 = arith.constant 1.000000e+00 : f32
    %207 = vector.broadcast %cst_66 : f32 to vector<16x32xf32>
    %208 = arith.addf %207, %206 : vector<16x32xf32>
    %209 = arith.divf %207, %208 : vector<16x32xf32>
    %210 = vector.extract_strided_slice %172 {offsets = [0, 64], sizes = [16, 32], strides = [1, 1]} : vector<16x128xf32> to vector<16x32xf32>
    %211 = math.tanh %210 : vector<16x32xf32>
    %212 = vector.extract_strided_slice %172 {offsets = [0, 96], sizes = [16, 32], strides = [1, 1]} : vector<16x128xf32> to vector<16x32xf32>
    %213 = arith.negf %212 : vector<16x32xf32>
    %214 = math.exp %213 : vector<16x32xf32>
    %cst_67 = arith.constant 1.000000e+00 : f32
    %215 = vector.broadcast %cst_67 : f32 to vector<16x32xf32>
    %216 = arith.addf %215, %214 : vector<16x32xf32>
    %217 = arith.divf %215, %216 : vector<16x32xf32>
    %218 = arith.mulf %209, %155 : vector<16x32xf32>
    %219 = arith.mulf %203, %211 : vector<16x32xf32>
    %220 = arith.addf %218, %219 : vector<16x32xf32>
    %221 = math.tanh %220 : vector<16x32xf32>
    %222 = arith.mulf %217, %221 : vector<16x32xf32>
    %c3_i32 = arith.constant 3 : i32
    %c16_i32_68 = arith.constant 16 : i32
    %223 = arith.muli %c3_i32, %c16_i32_68 : i32
    %224 = tpu.assume_multiple %223, 16 : i32
    %c7_i32_69 = arith.constant 7 : i32
    %225 = arith.subi %c7_i32_69, %c3_i32 : i32
    %c16_i32_70 = arith.constant 16 : i32
    %226 = arith.muli %225, %c16_i32_70 : i32
    %227 = tpu.assume_multiple %226, 16 : i32
    %228 = arith.index_cast %224 : i32 to index
    %c0_71 = arith.constant 0 : index
    %229 = vector.load %arg18[%228, %c0_71] : memref<128x128xf32, #tpu.memory_space<vmem>>, vector<16x128xf32>
    %230 = arith.truncf %197 : vector<16x32xf32> to vector<16x32xbf16>
    %cst_72 = arith.constant dense<0.000000e+00> : vector<16x128xf32>
    %231 = tpu.matmul %230, %0, %cst_72 {dimension_numbers = #tpu.dot_dimension_numbers<[1], [0], [0], [1], [0, 0, 1, 1], [], []>} : vector<16x32xbf16>, vector<32x128xbf16>, vector<16x128xf32> -> vector<16x128xf32>
    %232 = arith.addf %229, %231 : vector<16x128xf32>
    %233 = arith.index_cast %227 : i32 to index
    %c0_73 = arith.constant 0 : index
    %234 = vector.load %arg19[%233, %c0_73] : memref<128x128xf32, #tpu.memory_space<vmem>>, vector<16x128xf32>
    %235 = arith.truncf %222 : vector<16x32xf32> to vector<16x32xbf16>
    %cst_74 = arith.constant dense<0.000000e+00> : vector<16x128xf32>
    %236 = tpu.matmul %235, %1, %cst_74 {dimension_numbers = #tpu.dot_dimension_numbers<[1], [0], [0], [1], [0, 0, 1, 1], [], []>} : vector<16x32xbf16>, vector<32x128xbf16>, vector<16x128xf32> -> vector<16x128xf32>
    %237 = arith.addf %234, %236 : vector<16x128xf32>
    %238 = vector.extract_strided_slice %232 {offsets = [0, 0], sizes = [16, 32], strides = [1, 1]} : vector<16x128xf32> to vector<16x32xf32>
    %239 = arith.negf %238 : vector<16x32xf32>
    %240 = math.exp %239 : vector<16x32xf32>
    %cst_75 = arith.constant 1.000000e+00 : f32
    %241 = vector.broadcast %cst_75 : f32 to vector<16x32xf32>
    %242 = arith.addf %241, %240 : vector<16x32xf32>
    %243 = arith.divf %241, %242 : vector<16x32xf32>
    %244 = vector.extract_strided_slice %232 {offsets = [0, 32], sizes = [16, 32], strides = [1, 1]} : vector<16x128xf32> to vector<16x32xf32>
    %245 = arith.negf %244 : vector<16x32xf32>
    %246 = math.exp %245 : vector<16x32xf32>
    %cst_76 = arith.constant 1.000000e+00 : f32
    %247 = vector.broadcast %cst_76 : f32 to vector<16x32xf32>
    %248 = arith.addf %247, %246 : vector<16x32xf32>
    %249 = arith.divf %247, %248 : vector<16x32xf32>
    %250 = vector.extract_strided_slice %232 {offsets = [0, 64], sizes = [16, 32], strides = [1, 1]} : vector<16x128xf32> to vector<16x32xf32>
    %251 = math.tanh %250 : vector<16x32xf32>
    %252 = vector.extract_strided_slice %232 {offsets = [0, 96], sizes = [16, 32], strides = [1, 1]} : vector<16x128xf32> to vector<16x32xf32>
    %253 = arith.negf %252 : vector<16x32xf32>
    %254 = math.exp %253 : vector<16x32xf32>
    %cst_77 = arith.constant 1.000000e+00 : f32
    %255 = vector.broadcast %cst_77 : f32 to vector<16x32xf32>
    %256 = arith.addf %255, %254 : vector<16x32xf32>
    %257 = arith.divf %255, %256 : vector<16x32xf32>
    %258 = arith.mulf %249, %195 : vector<16x32xf32>
    %259 = arith.mulf %243, %251 : vector<16x32xf32>
    %260 = arith.addf %258, %259 : vector<16x32xf32>
    %261 = math.tanh %260 : vector<16x32xf32>
    %262 = arith.mulf %257, %261 : vector<16x32xf32>
    %263 = vector.extract_strided_slice %237 {offsets = [0, 0], sizes = [16, 32], strides = [1, 1]} : vector<16x128xf32> to vector<16x32xf32>
    %264 = arith.negf %263 : vector<16x32xf32>
    %265 = math.exp %264 : vector<16x32xf32>
    %cst_78 = arith.constant 1.000000e+00 : f32
    %266 = vector.broadcast %cst_78 : f32 to vector<16x32xf32>
    %267 = arith.addf %266, %265 : vector<16x32xf32>
    %268 = arith.divf %266, %267 : vector<16x32xf32>
    %269 = vector.extract_strided_slice %237 {offsets = [0, 32], sizes = [16, 32], strides = [1, 1]} : vector<16x128xf32> to vector<16x32xf32>
    %270 = arith.negf %269 : vector<16x32xf32>
    %271 = math.exp %270 : vector<16x32xf32>
    %cst_79 = arith.constant 1.000000e+00 : f32
    %272 = vector.broadcast %cst_79 : f32 to vector<16x32xf32>
    %273 = arith.addf %272, %271 : vector<16x32xf32>
    %274 = arith.divf %272, %273 : vector<16x32xf32>
    %275 = vector.extract_strided_slice %237 {offsets = [0, 64], sizes = [16, 32], strides = [1, 1]} : vector<16x128xf32> to vector<16x32xf32>
    %276 = math.tanh %275 : vector<16x32xf32>
    %277 = vector.extract_strided_slice %237 {offsets = [0, 96], sizes = [16, 32], strides = [1, 1]} : vector<16x128xf32> to vector<16x32xf32>
    %278 = arith.negf %277 : vector<16x32xf32>
    %279 = math.exp %278 : vector<16x32xf32>
    %cst_80 = arith.constant 1.000000e+00 : f32
    %280 = vector.broadcast %cst_80 : f32 to vector<16x32xf32>
    %281 = arith.addf %280, %279 : vector<16x32xf32>
    %282 = arith.divf %280, %281 : vector<16x32xf32>
    %283 = arith.mulf %274, %220 : vector<16x32xf32>
    %284 = arith.mulf %268, %276 : vector<16x32xf32>
    %285 = arith.addf %283, %284 : vector<16x32xf32>
    %286 = math.tanh %285 : vector<16x32xf32>
    %287 = arith.mulf %282, %286 : vector<16x32xf32>
    %c4_i32 = arith.constant 4 : i32
    %c16_i32_81 = arith.constant 16 : i32
    %288 = arith.muli %c4_i32, %c16_i32_81 : i32
    %289 = tpu.assume_multiple %288, 16 : i32
    %c7_i32_82 = arith.constant 7 : i32
    %290 = arith.subi %c7_i32_82, %c4_i32 : i32
    %c16_i32_83 = arith.constant 16 : i32
    %291 = arith.muli %290, %c16_i32_83 : i32
    %292 = tpu.assume_multiple %291, 16 : i32
    %293 = arith.index_cast %289 : i32 to index
    %c0_84 = arith.constant 0 : index
    %294 = vector.load %arg18[%293, %c0_84] : memref<128x128xf32, #tpu.memory_space<vmem>>, vector<16x128xf32>
    %295 = arith.truncf %262 : vector<16x32xf32> to vector<16x32xbf16>
    %cst_85 = arith.constant dense<0.000000e+00> : vector<16x128xf32>
    %296 = tpu.matmul %295, %0, %cst_85 {dimension_numbers = #tpu.dot_dimension_numbers<[1], [0], [0], [1], [0, 0, 1, 1], [], []>} : vector<16x32xbf16>, vector<32x128xbf16>, vector<16x128xf32> -> vector<16x128xf32>
    %297 = arith.addf %294, %296 : vector<16x128xf32>
    %298 = arith.index_cast %292 : i32 to index
    %c0_86 = arith.constant 0 : index
    %299 = vector.load %arg19[%298, %c0_86] : memref<128x128xf32, #tpu.memory_space<vmem>>, vector<16x128xf32>
    %300 = arith.truncf %287 : vector<16x32xf32> to vector<16x32xbf16>
    %cst_87 = arith.constant dense<0.000000e+00> : vector<16x128xf32>
    %301 = tpu.matmul %300, %1, %cst_87 {dimension_numbers = #tpu.dot_dimension_numbers<[1], [0], [0], [1], [0, 0, 1, 1], [], []>} : vector<16x32xbf16>, vector<32x128xbf16>, vector<16x128xf32> -> vector<16x128xf32>
    %302 = arith.addf %299, %301 : vector<16x128xf32>
    %303 = vector.extract_strided_slice %297 {offsets = [0, 0], sizes = [16, 32], strides = [1, 1]} : vector<16x128xf32> to vector<16x32xf32>
    %304 = arith.negf %303 : vector<16x32xf32>
    %305 = math.exp %304 : vector<16x32xf32>
    %cst_88 = arith.constant 1.000000e+00 : f32
    %306 = vector.broadcast %cst_88 : f32 to vector<16x32xf32>
    %307 = arith.addf %306, %305 : vector<16x32xf32>
    %308 = arith.divf %306, %307 : vector<16x32xf32>
    %309 = vector.extract_strided_slice %297 {offsets = [0, 32], sizes = [16, 32], strides = [1, 1]} : vector<16x128xf32> to vector<16x32xf32>
    %310 = arith.negf %309 : vector<16x32xf32>
    %311 = math.exp %310 : vector<16x32xf32>
    %cst_89 = arith.constant 1.000000e+00 : f32
    %312 = vector.broadcast %cst_89 : f32 to vector<16x32xf32>
    %313 = arith.addf %312, %311 : vector<16x32xf32>
    %314 = arith.divf %312, %313 : vector<16x32xf32>
    %315 = vector.extract_strided_slice %297 {offsets = [0, 64], sizes = [16, 32], strides = [1, 1]} : vector<16x128xf32> to vector<16x32xf32>
    %316 = math.tanh %315 : vector<16x32xf32>
    %317 = vector.extract_strided_slice %297 {offsets = [0, 96], sizes = [16, 32], strides = [1, 1]} : vector<16x128xf32> to vector<16x32xf32>
    %318 = arith.negf %317 : vector<16x32xf32>
    %319 = math.exp %318 : vector<16x32xf32>
    %cst_90 = arith.constant 1.000000e+00 : f32
    %320 = vector.broadcast %cst_90 : f32 to vector<16x32xf32>
    %321 = arith.addf %320, %319 : vector<16x32xf32>
    %322 = arith.divf %320, %321 : vector<16x32xf32>
    %323 = arith.mulf %314, %260 : vector<16x32xf32>
    %324 = arith.mulf %308, %316 : vector<16x32xf32>
    %325 = arith.addf %323, %324 : vector<16x32xf32>
    %326 = math.tanh %325 : vector<16x32xf32>
    %327 = arith.mulf %322, %326 : vector<16x32xf32>
    %328 = vector.extract_strided_slice %302 {offsets = [0, 0], sizes = [16, 32], strides = [1, 1]} : vector<16x128xf32> to vector<16x32xf32>
    %329 = arith.negf %328 : vector<16x32xf32>
    %330 = math.exp %329 : vector<16x32xf32>
    %cst_91 = arith.constant 1.000000e+00 : f32
    %331 = vector.broadcast %cst_91 : f32 to vector<16x32xf32>
    %332 = arith.addf %331, %330 : vector<16x32xf32>
    %333 = arith.divf %331, %332 : vector<16x32xf32>
    %334 = vector.extract_strided_slice %302 {offsets = [0, 32], sizes = [16, 32], strides = [1, 1]} : vector<16x128xf32> to vector<16x32xf32>
    %335 = arith.negf %334 : vector<16x32xf32>
    %336 = math.exp %335 : vector<16x32xf32>
    %cst_92 = arith.constant 1.000000e+00 : f32
    %337 = vector.broadcast %cst_92 : f32 to vector<16x32xf32>
    %338 = arith.addf %337, %336 : vector<16x32xf32>
    %339 = arith.divf %337, %338 : vector<16x32xf32>
    %340 = vector.extract_strided_slice %302 {offsets = [0, 64], sizes = [16, 32], strides = [1, 1]} : vector<16x128xf32> to vector<16x32xf32>
    %341 = math.tanh %340 : vector<16x32xf32>
    %342 = vector.extract_strided_slice %302 {offsets = [0, 96], sizes = [16, 32], strides = [1, 1]} : vector<16x128xf32> to vector<16x32xf32>
    %343 = arith.negf %342 : vector<16x32xf32>
    %344 = math.exp %343 : vector<16x32xf32>
    %cst_93 = arith.constant 1.000000e+00 : f32
    %345 = vector.broadcast %cst_93 : f32 to vector<16x32xf32>
    %346 = arith.addf %345, %344 : vector<16x32xf32>
    %347 = arith.divf %345, %346 : vector<16x32xf32>
    %348 = arith.mulf %339, %285 : vector<16x32xf32>
    %349 = arith.mulf %333, %341 : vector<16x32xf32>
    %350 = arith.addf %348, %349 : vector<16x32xf32>
    %351 = math.tanh %350 : vector<16x32xf32>
    %352 = arith.mulf %347, %351 : vector<16x32xf32>
    %c5_i32 = arith.constant 5 : i32
    %c16_i32_94 = arith.constant 16 : i32
    %353 = arith.muli %c5_i32, %c16_i32_94 : i32
    %354 = tpu.assume_multiple %353, 16 : i32
    %c7_i32_95 = arith.constant 7 : i32
    %355 = arith.subi %c7_i32_95, %c5_i32 : i32
    %c16_i32_96 = arith.constant 16 : i32
    %356 = arith.muli %355, %c16_i32_96 : i32
    %357 = tpu.assume_multiple %356, 16 : i32
    %358 = arith.index_cast %354 : i32 to index
    %c0_97 = arith.constant 0 : index
    %359 = vector.load %arg18[%358, %c0_97] : memref<128x128xf32, #tpu.memory_space<vmem>>, vector<16x128xf32>
    %360 = arith.truncf %327 : vector<16x32xf32> to vector<16x32xbf16>
    %cst_98 = arith.constant dense<0.000000e+00> : vector<16x128xf32>
    %361 = tpu.matmul %360, %0, %cst_98 {dimension_numbers = #tpu.dot_dimension_numbers<[1], [0], [0], [1], [0, 0, 1, 1], [], []>} : vector<16x32xbf16>, vector<32x128xbf16>, vector<16x128xf32> -> vector<16x128xf32>
    %362 = arith.addf %359, %361 : vector<16x128xf32>
    %363 = arith.index_cast %357 : i32 to index
    %c0_99 = arith.constant 0 : index
    %364 = vector.load %arg19[%363, %c0_99] : memref<128x128xf32, #tpu.memory_space<vmem>>, vector<16x128xf32>
    %365 = arith.truncf %352 : vector<16x32xf32> to vector<16x32xbf16>
    %cst_100 = arith.constant dense<0.000000e+00> : vector<16x128xf32>
    %366 = tpu.matmul %365, %1, %cst_100 {dimension_numbers = #tpu.dot_dimension_numbers<[1], [0], [0], [1], [0, 0, 1, 1], [], []>} : vector<16x32xbf16>, vector<32x128xbf16>, vector<16x128xf32> -> vector<16x128xf32>
    %367 = arith.addf %364, %366 : vector<16x128xf32>
    %368 = vector.extract_strided_slice %362 {offsets = [0, 0], sizes = [16, 32], strides = [1, 1]} : vector<16x128xf32> to vector<16x32xf32>
    %369 = arith.negf %368 : vector<16x32xf32>
    %370 = math.exp %369 : vector<16x32xf32>
    %cst_101 = arith.constant 1.000000e+00 : f32
    %371 = vector.broadcast %cst_101 : f32 to vector<16x32xf32>
    %372 = arith.addf %371, %370 : vector<16x32xf32>
    %373 = arith.divf %371, %372 : vector<16x32xf32>
    %374 = vector.extract_strided_slice %362 {offsets = [0, 32], sizes = [16, 32], strides = [1, 1]} : vector<16x128xf32> to vector<16x32xf32>
    %375 = arith.negf %374 : vector<16x32xf32>
    %376 = math.exp %375 : vector<16x32xf32>
    %cst_102 = arith.constant 1.000000e+00 : f32
    %377 = vector.broadcast %cst_102 : f32 to vector<16x32xf32>
    %378 = arith.addf %377, %376 : vector<16x32xf32>
    %379 = arith.divf %377, %378 : vector<16x32xf32>
    %380 = vector.extract_strided_slice %362 {offsets = [0, 64], sizes = [16, 32], strides = [1, 1]} : vector<16x128xf32> to vector<16x32xf32>
    %381 = math.tanh %380 : vector<16x32xf32>
    %382 = vector.extract_strided_slice %362 {offsets = [0, 96], sizes = [16, 32], strides = [1, 1]} : vector<16x128xf32> to vector<16x32xf32>
    %383 = arith.negf %382 : vector<16x32xf32>
    %384 = math.exp %383 : vector<16x32xf32>
    %cst_103 = arith.constant 1.000000e+00 : f32
    %385 = vector.broadcast %cst_103 : f32 to vector<16x32xf32>
    %386 = arith.addf %385, %384 : vector<16x32xf32>
    %387 = arith.divf %385, %386 : vector<16x32xf32>
    %388 = arith.mulf %379, %325 : vector<16x32xf32>
    %389 = arith.mulf %373, %381 : vector<16x32xf32>
    %390 = arith.addf %388, %389 : vector<16x32xf32>
    %391 = math.tanh %390 : vector<16x32xf32>
    %392 = arith.mulf %387, %391 : vector<16x32xf32>
    %393 = vector.extract_strided_slice %367 {offsets = [0, 0], sizes = [16, 32], strides = [1, 1]} : vector<16x128xf32> to vector<16x32xf32>
    %394 = arith.negf %393 : vector<16x32xf32>
    %395 = math.exp %394 : vector<16x32xf32>
    %cst_104 = arith.constant 1.000000e+00 : f32
    %396 = vector.broadcast %cst_104 : f32 to vector<16x32xf32>
    %397 = arith.addf %396, %395 : vector<16x32xf32>
    %398 = arith.divf %396, %397 : vector<16x32xf32>
    %399 = vector.extract_strided_slice %367 {offsets = [0, 32], sizes = [16, 32], strides = [1, 1]} : vector<16x128xf32> to vector<16x32xf32>
    %400 = arith.negf %399 : vector<16x32xf32>
    %401 = math.exp %400 : vector<16x32xf32>
    %cst_105 = arith.constant 1.000000e+00 : f32
    %402 = vector.broadcast %cst_105 : f32 to vector<16x32xf32>
    %403 = arith.addf %402, %401 : vector<16x32xf32>
    %404 = arith.divf %402, %403 : vector<16x32xf32>
    %405 = vector.extract_strided_slice %367 {offsets = [0, 64], sizes = [16, 32], strides = [1, 1]} : vector<16x128xf32> to vector<16x32xf32>
    %406 = math.tanh %405 : vector<16x32xf32>
    %407 = vector.extract_strided_slice %367 {offsets = [0, 96], sizes = [16, 32], strides = [1, 1]} : vector<16x128xf32> to vector<16x32xf32>
    %408 = arith.negf %407 : vector<16x32xf32>
    %409 = math.exp %408 : vector<16x32xf32>
    %cst_106 = arith.constant 1.000000e+00 : f32
    %410 = vector.broadcast %cst_106 : f32 to vector<16x32xf32>
    %411 = arith.addf %410, %409 : vector<16x32xf32>
    %412 = arith.divf %410, %411 : vector<16x32xf32>
    %413 = arith.mulf %404, %350 : vector<16x32xf32>
    %414 = arith.mulf %398, %406 : vector<16x32xf32>
    %415 = arith.addf %413, %414 : vector<16x32xf32>
    %416 = math.tanh %415 : vector<16x32xf32>
    %417 = arith.mulf %412, %416 : vector<16x32xf32>
    %c6_i32 = arith.constant 6 : i32
    %c16_i32_107 = arith.constant 16 : i32
    %418 = arith.muli %c6_i32, %c16_i32_107 : i32
    %419 = tpu.assume_multiple %418, 16 : i32
    %c7_i32_108 = arith.constant 7 : i32
    %420 = arith.subi %c7_i32_108, %c6_i32 : i32
    %c16_i32_109 = arith.constant 16 : i32
    %421 = arith.muli %420, %c16_i32_109 : i32
    %422 = tpu.assume_multiple %421, 16 : i32
    %423 = arith.index_cast %419 : i32 to index
    %c0_110 = arith.constant 0 : index
    %424 = vector.load %arg18[%423, %c0_110] : memref<128x128xf32, #tpu.memory_space<vmem>>, vector<16x128xf32>
    %425 = arith.truncf %392 : vector<16x32xf32> to vector<16x32xbf16>
    %cst_111 = arith.constant dense<0.000000e+00> : vector<16x128xf32>
    %426 = tpu.matmul %425, %0, %cst_111 {dimension_numbers = #tpu.dot_dimension_numbers<[1], [0], [0], [1], [0, 0, 1, 1], [], []>} : vector<16x32xbf16>, vector<32x128xbf16>, vector<16x128xf32> -> vector<16x128xf32>
    %427 = arith.addf %424, %426 : vector<16x128xf32>
    %428 = arith.index_cast %422 : i32 to index
    %c0_112 = arith.constant 0 : index
    %429 = vector.load %arg19[%428, %c0_112] : memref<128x128xf32, #tpu.memory_space<vmem>>, vector<16x128xf32>
    %430 = arith.truncf %417 : vector<16x32xf32> to vector<16x32xbf16>
    %cst_113 = arith.constant dense<0.000000e+00> : vector<16x128xf32>
    %431 = tpu.matmul %430, %1, %cst_113 {dimension_numbers = #tpu.dot_dimension_numbers<[1], [0], [0], [1], [0, 0, 1, 1], [], []>} : vector<16x32xbf16>, vector<32x128xbf16>, vector<16x128xf32> -> vector<16x128xf32>
    %432 = arith.addf %429, %431 : vector<16x128xf32>
    %433 = vector.extract_strided_slice %427 {offsets = [0, 0], sizes = [16, 32], strides = [1, 1]} : vector<16x128xf32> to vector<16x32xf32>
    %434 = arith.negf %433 : vector<16x32xf32>
    %435 = math.exp %434 : vector<16x32xf32>
    %cst_114 = arith.constant 1.000000e+00 : f32
    %436 = vector.broadcast %cst_114 : f32 to vector<16x32xf32>
    %437 = arith.addf %436, %435 : vector<16x32xf32>
    %438 = arith.divf %436, %437 : vector<16x32xf32>
    %439 = vector.extract_strided_slice %427 {offsets = [0, 32], sizes = [16, 32], strides = [1, 1]} : vector<16x128xf32> to vector<16x32xf32>
    %440 = arith.negf %439 : vector<16x32xf32>
    %441 = math.exp %440 : vector<16x32xf32>
    %cst_115 = arith.constant 1.000000e+00 : f32
    %442 = vector.broadcast %cst_115 : f32 to vector<16x32xf32>
    %443 = arith.addf %442, %441 : vector<16x32xf32>
    %444 = arith.divf %442, %443 : vector<16x32xf32>
    %445 = vector.extract_strided_slice %427 {offsets = [0, 64], sizes = [16, 32], strides = [1, 1]} : vector<16x128xf32> to vector<16x32xf32>
    %446 = math.tanh %445 : vector<16x32xf32>
    %447 = vector.extract_strided_slice %427 {offsets = [0, 96], sizes = [16, 32], strides = [1, 1]} : vector<16x128xf32> to vector<16x32xf32>
    %448 = arith.negf %447 : vector<16x32xf32>
    %449 = math.exp %448 : vector<16x32xf32>
    %cst_116 = arith.constant 1.000000e+00 : f32
    %450 = vector.broadcast %cst_116 : f32 to vector<16x32xf32>
    %451 = arith.addf %450, %449 : vector<16x32xf32>
    %452 = arith.divf %450, %451 : vector<16x32xf32>
    %453 = arith.mulf %444, %390 : vector<16x32xf32>
    %454 = arith.mulf %438, %446 : vector<16x32xf32>
    %455 = arith.addf %453, %454 : vector<16x32xf32>
    %456 = math.tanh %455 : vector<16x32xf32>
    %457 = arith.mulf %452, %456 : vector<16x32xf32>
    %458 = vector.extract_strided_slice %432 {offsets = [0, 0], sizes = [16, 32], strides = [1, 1]} : vector<16x128xf32> to vector<16x32xf32>
    %459 = arith.negf %458 : vector<16x32xf32>
    %460 = math.exp %459 : vector<16x32xf32>
    %cst_117 = arith.constant 1.000000e+00 : f32
    %461 = vector.broadcast %cst_117 : f32 to vector<16x32xf32>
    %462 = arith.addf %461, %460 : vector<16x32xf32>
    %463 = arith.divf %461, %462 : vector<16x32xf32>
    %464 = vector.extract_strided_slice %432 {offsets = [0, 32], sizes = [16, 32], strides = [1, 1]} : vector<16x128xf32> to vector<16x32xf32>
    %465 = arith.negf %464 : vector<16x32xf32>
    %466 = math.exp %465 : vector<16x32xf32>
    %cst_118 = arith.constant 1.000000e+00 : f32
    %467 = vector.broadcast %cst_118 : f32 to vector<16x32xf32>
    %468 = arith.addf %467, %466 : vector<16x32xf32>
    %469 = arith.divf %467, %468 : vector<16x32xf32>
    %470 = vector.extract_strided_slice %432 {offsets = [0, 64], sizes = [16, 32], strides = [1, 1]} : vector<16x128xf32> to vector<16x32xf32>
    %471 = math.tanh %470 : vector<16x32xf32>
    %472 = vector.extract_strided_slice %432 {offsets = [0, 96], sizes = [16, 32], strides = [1, 1]} : vector<16x128xf32> to vector<16x32xf32>
    %473 = arith.negf %472 : vector<16x32xf32>
    %474 = math.exp %473 : vector<16x32xf32>
    %cst_119 = arith.constant 1.000000e+00 : f32
    %475 = vector.broadcast %cst_119 : f32 to vector<16x32xf32>
    %476 = arith.addf %475, %474 : vector<16x32xf32>
    %477 = arith.divf %475, %476 : vector<16x32xf32>
    %478 = arith.mulf %469, %415 : vector<16x32xf32>
    %479 = arith.mulf %463, %471 : vector<16x32xf32>
    %480 = arith.addf %478, %479 : vector<16x32xf32>
    %481 = math.tanh %480 : vector<16x32xf32>
    %482 = arith.mulf %477, %481 : vector<16x32xf32>
    %c7_i32_120 = arith.constant 7 : i32
    %c16_i32_121 = arith.constant 16 : i32
    %483 = arith.muli %c7_i32_120, %c16_i32_121 : i32
    %484 = tpu.assume_multiple %483, 16 : i32
    %c7_i32_122 = arith.constant 7 : i32
    %485 = arith.subi %c7_i32_122, %c7_i32_120 : i32
    %c16_i32_123 = arith.constant 16 : i32
    %486 = arith.muli %485, %c16_i32_123 : i32
    %487 = tpu.assume_multiple %486, 16 : i32
    %488 = arith.index_cast %484 : i32 to index
    %c0_124 = arith.constant 0 : index
    %489 = vector.load %arg18[%488, %c0_124] : memref<128x128xf32, #tpu.memory_space<vmem>>, vector<16x128xf32>
    %490 = arith.truncf %457 : vector<16x32xf32> to vector<16x32xbf16>
    %cst_125 = arith.constant dense<0.000000e+00> : vector<16x128xf32>
    %491 = tpu.matmul %490, %0, %cst_125 {dimension_numbers = #tpu.dot_dimension_numbers<[1], [0], [0], [1], [0, 0, 1, 1], [], []>} : vector<16x32xbf16>, vector<32x128xbf16>, vector<16x128xf32> -> vector<16x128xf32>
    %492 = arith.addf %489, %491 : vector<16x128xf32>
    %493 = arith.index_cast %487 : i32 to index
    %c0_126 = arith.constant 0 : index
    %494 = vector.load %arg19[%493, %c0_126] : memref<128x128xf32, #tpu.memory_space<vmem>>, vector<16x128xf32>
    %495 = arith.truncf %482 : vector<16x32xf32> to vector<16x32xbf16>
    %cst_127 = arith.constant dense<0.000000e+00> : vector<16x128xf32>
    %496 = tpu.matmul %495, %1, %cst_127 {dimension_numbers = #tpu.dot_dimension_numbers<[1], [0], [0], [1], [0, 0, 1, 1], [], []>} : vector<16x32xbf16>, vector<32x128xbf16>, vector<16x128xf32> -> vector<16x128xf32>
    %497 = arith.addf %494, %496 : vector<16x128xf32>
    %498 = vector.extract_strided_slice %492 {offsets = [0, 0], sizes = [16, 32], strides = [1, 1]} : vector<16x128xf32> to vector<16x32xf32>
    %499 = arith.negf %498 : vector<16x32xf32>
    %500 = math.exp %499 : vector<16x32xf32>
    %cst_128 = arith.constant 1.000000e+00 : f32
    %501 = vector.broadcast %cst_128 : f32 to vector<16x32xf32>
    %502 = arith.addf %501, %500 : vector<16x32xf32>
    %503 = arith.divf %501, %502 : vector<16x32xf32>
    %504 = vector.extract_strided_slice %492 {offsets = [0, 32], sizes = [16, 32], strides = [1, 1]} : vector<16x128xf32> to vector<16x32xf32>
    %505 = arith.negf %504 : vector<16x32xf32>
    %506 = math.exp %505 : vector<16x32xf32>
    %cst_129 = arith.constant 1.000000e+00 : f32
    %507 = vector.broadcast %cst_129 : f32 to vector<16x32xf32>
    %508 = arith.addf %507, %506 : vector<16x32xf32>
    %509 = arith.divf %507, %508 : vector<16x32xf32>
    %510 = vector.extract_strided_slice %492 {offsets = [0, 64], sizes = [16, 32], strides = [1, 1]} : vector<16x128xf32> to vector<16x32xf32>
    %511 = math.tanh %510 : vector<16x32xf32>
    %512 = vector.extract_strided_slice %492 {offsets = [0, 96], sizes = [16, 32], strides = [1, 1]} : vector<16x128xf32> to vector<16x32xf32>
    %513 = arith.negf %512 : vector<16x32xf32>
    %514 = math.exp %513 : vector<16x32xf32>
    %cst_130 = arith.constant 1.000000e+00 : f32
    %515 = vector.broadcast %cst_130 : f32 to vector<16x32xf32>
    %516 = arith.addf %515, %514 : vector<16x32xf32>
    %517 = arith.divf %515, %516 : vector<16x32xf32>
    %518 = arith.mulf %509, %455 : vector<16x32xf32>
    %519 = arith.mulf %503, %511 : vector<16x32xf32>
    %520 = arith.addf %518, %519 : vector<16x32xf32>
    %521 = math.tanh %520 : vector<16x32xf32>
    %522 = arith.mulf %517, %521 : vector<16x32xf32>
    %523 = vector.extract_strided_slice %497 {offsets = [0, 0], sizes = [16, 32], strides = [1, 1]} : vector<16x128xf32> to vector<16x32xf32>
    %524 = arith.negf %523 : vector<16x32xf32>
    %525 = math.exp %524 : vector<16x32xf32>
    %cst_131 = arith.constant 1.000000e+00 : f32
    %526 = vector.broadcast %cst_131 : f32 to vector<16x32xf32>
    %527 = arith.addf %526, %525 : vector<16x32xf32>
    %528 = arith.divf %526, %527 : vector<16x32xf32>
    %529 = vector.extract_strided_slice %497 {offsets = [0, 32], sizes = [16, 32], strides = [1, 1]} : vector<16x128xf32> to vector<16x32xf32>
    %530 = arith.negf %529 : vector<16x32xf32>
    %531 = math.exp %530 : vector<16x32xf32>
    %cst_132 = arith.constant 1.000000e+00 : f32
    %532 = vector.broadcast %cst_132 : f32 to vector<16x32xf32>
    %533 = arith.addf %532, %531 : vector<16x32xf32>
    %534 = arith.divf %532, %533 : vector<16x32xf32>
    %535 = vector.extract_strided_slice %497 {offsets = [0, 64], sizes = [16, 32], strides = [1, 1]} : vector<16x128xf32> to vector<16x32xf32>
    %536 = math.tanh %535 : vector<16x32xf32>
    %537 = vector.extract_strided_slice %497 {offsets = [0, 96], sizes = [16, 32], strides = [1, 1]} : vector<16x128xf32> to vector<16x32xf32>
    %538 = arith.negf %537 : vector<16x32xf32>
    %539 = math.exp %538 : vector<16x32xf32>
    %cst_133 = arith.constant 1.000000e+00 : f32
    %540 = vector.broadcast %cst_133 : f32 to vector<16x32xf32>
    %541 = arith.addf %540, %539 : vector<16x32xf32>
    %542 = arith.divf %540, %541 : vector<16x32xf32>
    %543 = arith.mulf %534, %480 : vector<16x32xf32>
    %544 = arith.mulf %528, %536 : vector<16x32xf32>
    %545 = arith.addf %543, %544 : vector<16x32xf32>
    %546 = math.tanh %545 : vector<16x32xf32>
    %547 = arith.mulf %542, %546 : vector<16x32xf32>
    %c8_i32 = arith.constant 8 : i32
    %548 = tpu.concatenate %522, %547, %520, %545 in 1 : vector<16x32xf32>, vector<16x32xf32>, vector<16x32xf32>, vector<16x32xf32> -> vector<16x128xf32>
    %549 = arith.truncf %548 : vector<16x128xf32> to vector<16x128xbf16>
    %c0_134 = arith.constant 0 : index
    %c0_135 = arith.constant 0 : index
    %550 = vector.load %arg7[%c0_134, %c0_135] : memref<128x64xbf16, #tpu.memory_space<vmem>>, vector<128x64xbf16>
    %cst_136 = arith.constant dense<0.000000e+00> : vector<16x64xf32>
    %551 = tpu.matmul %549, %550, %cst_136 {dimension_numbers = #tpu.dot_dimension_numbers<[1], [0], [0], [1], [0, 0, 1, 1], [], []>} : vector<16x128xbf16>, vector<128x64xbf16>, vector<16x64xf32> -> vector<16x64xf32>
    %c0_137 = arith.constant 0 : index
    %c0_138 = arith.constant 0 : index
    %552 = vector.load %arg8[%c0_137, %c0_138] : memref<1x64xf32, #tpu.memory_space<vmem>>, vector<1x64xf32>
    %553 = vector.broadcast %552 : vector<1x64xf32> to vector<16x64xf32>
    %554 = arith.addf %551, %553 : vector<16x64xf32>
    %555 = vector.extract_strided_slice %554 {offsets = [0, 0], sizes = [16, 32], strides = [1, 1]} : vector<16x64xf32> to vector<16x32xf32>
    %556 = vector.extract_strided_slice %554 {offsets = [0, 32], sizes = [16, 32], strides = [1, 1]} : vector<16x64xf32> to vector<16x32xf32>
    %c0_139 = arith.constant 0 : index
    %c0_140 = arith.constant 0 : index
    %557 = vector.load %arg15[%c0_139, %c0_140] : memref<16x16xf32, #tpu.memory_space<vmem>>, vector<16x16xf32>
    %c0_i32_141 = arith.constant 0 : i32
    %558 = arith.truncf %557 : vector<16x16xf32> to vector<16x16xbf16>
    %cst_142 = arith.constant dense<0.000000e+00> : vector<16x128xf32>
    %559 = tpu.matmul %558, %2, %cst_142 {dimension_numbers = #tpu.dot_dimension_numbers<[1], [0], [0], [1], [0, 0, 1, 1], [], []>} : vector<16x16xbf16>, vector<16x128xbf16>, vector<16x128xf32> -> vector<16x128xf32>
    %560 = arith.truncf %555 : vector<16x32xf32> to vector<16x32xbf16>
    %cst_143 = arith.constant dense<0.000000e+00> : vector<16x128xf32>
    %561 = tpu.matmul %560, %3, %cst_143 {dimension_numbers = #tpu.dot_dimension_numbers<[1], [0], [0], [1], [0, 0, 1, 1], [], []>} : vector<16x32xbf16>, vector<32x128xbf16>, vector<16x128xf32> -> vector<16x128xf32>
    %562 = arith.addf %559, %561 : vector<16x128xf32>
    %563 = arith.addf %562, %8 : vector<16x128xf32>
    %564 = vector.extract_strided_slice %563 {offsets = [0, 0], sizes = [16, 32], strides = [1, 1]} : vector<16x128xf32> to vector<16x32xf32>
    %565 = arith.negf %564 : vector<16x32xf32>
    %566 = math.exp %565 : vector<16x32xf32>
    %cst_144 = arith.constant 1.000000e+00 : f32
    %567 = vector.broadcast %cst_144 : f32 to vector<16x32xf32>
    %568 = arith.addf %567, %566 : vector<16x32xf32>
    %569 = arith.divf %567, %568 : vector<16x32xf32>
    %570 = vector.extract_strided_slice %563 {offsets = [0, 32], sizes = [16, 32], strides = [1, 1]} : vector<16x128xf32> to vector<16x32xf32>
    %571 = arith.negf %570 : vector<16x32xf32>
    %572 = math.exp %571 : vector<16x32xf32>
    %cst_145 = arith.constant 1.000000e+00 : f32
    %573 = vector.broadcast %cst_145 : f32 to vector<16x32xf32>
    %574 = arith.addf %573, %572 : vector<16x32xf32>
    %575 = arith.divf %573, %574 : vector<16x32xf32>
    %576 = vector.extract_strided_slice %563 {offsets = [0, 64], sizes = [16, 32], strides = [1, 1]} : vector<16x128xf32> to vector<16x32xf32>
    %577 = math.tanh %576 : vector<16x32xf32>
    %578 = vector.extract_strided_slice %563 {offsets = [0, 96], sizes = [16, 32], strides = [1, 1]} : vector<16x128xf32> to vector<16x32xf32>
    %579 = arith.negf %578 : vector<16x32xf32>
    %580 = math.exp %579 : vector<16x32xf32>
    %cst_146 = arith.constant 1.000000e+00 : f32
    %581 = vector.broadcast %cst_146 : f32 to vector<16x32xf32>
    %582 = arith.addf %581, %580 : vector<16x32xf32>
    %583 = arith.divf %581, %582 : vector<16x32xf32>
    %584 = arith.mulf %575, %556 : vector<16x32xf32>
    %585 = arith.mulf %569, %577 : vector<16x32xf32>
    %586 = arith.addf %584, %585 : vector<16x32xf32>
    %587 = math.tanh %586 : vector<16x32xf32>
    %588 = arith.mulf %583, %587 : vector<16x32xf32>
    %589 = arith.truncf %588 : vector<16x32xf32> to vector<16x32xbf16>
    %cst_147 = arith.constant dense<0.000000e+00> : vector<16x128xf32>
    %590 = tpu.matmul %589, %4, %cst_147 {dimension_numbers = #tpu.dot_dimension_numbers<[1], [0], [0], [1], [0, 0, 1, 1], [], []>} : vector<16x32xbf16>, vector<32x128xbf16>, vector<16x128xf32> -> vector<16x128xf32>
    %591 = arith.addf %590, %11 : vector<16x128xf32>
    %592 = arith.index_cast %c0_i32_141 : i32 to index
    %c0_148 = arith.constant 0 : index
    %c0_149 = arith.constant 0 : index
    %593 = vector.load %arg16[%592, %c0_148, %c0_149] : memref<8x16x128xf32, #tpu.memory_space<vmem>>, vector<1x16x128xf32>
    %594 = vector.shape_cast %593 : vector<1x16x128xf32> to vector<16x128xf32>
    %595 = vector.shape_cast %591 : vector<16x128xf32> to vector<1x16x128xf32>
    tpu.vector_store %arg16[%592, %c0_148, %c0_149], %595 {strides = array<i32>} : memref<8x16x128xf32, #tpu.memory_space<vmem>>, vector<1x16x128xf32>,
    %cst_150 = arith.constant dense<0xFF800000> : vector<16xf32>
    %596 = vector.multi_reduction <maximumf>, %591, %cst_150 [1] : vector<16x128xf32> to vector<16xf32>
    %597 = vector.shape_cast %596 : vector<16xf32> to vector<16x1xf32>
    %598 = vector.broadcast %597 : vector<16x1xf32> to vector<16x128xf32>
    %599 = arith.cmpf oeq, %591, %598 : vector<16x128xf32>
    %c128_i32 = arith.constant 128 : i32
    %600 = vector.broadcast %c128_i32 : i32 to vector<16x128xi32>
    %601 = arith.select %599, %12, %600 : vector<16x128xi1>, vector<16x128xi32>
    %cst_151 = arith.constant dense<2147483647> : vector<16xi32>
    %602 = vector.multi_reduction <minsi>, %601, %cst_151 [1] : vector<16x128xi32> to vector<16xi32>
    %603 = vector.shape_cast %602 : vector<16xi32> to vector<16x1xi32>
    %604 = arith.index_cast %c0_i32_141 : i32 to index
    %c0_152 = arith.constant 0 : index
    %c0_153 = arith.constant 0 : index
    %605 = vector.load %arg17[%604, %c0_152, %c0_153] : memref<8x16x1xi32, #tpu.memory_space<vmem>>, vector<1x16x1xi32>
    %606 = vector.shape_cast %605 : vector<1x16x1xi32> to vector<16x1xi32>
    %607 = vector.shape_cast %603 : vector<16x1xi32> to vector<1x16x1xi32>
    tpu.vector_store %arg17[%604, %c0_152, %c0_153], %607 {strides = array<i32>} : memref<8x16x1xi32, #tpu.memory_space<vmem>>, vector<1x16x1xi32>,
    %608 = vector.broadcast %603 : vector<16x1xi32> to vector<16x128xi32>
    %609 = arith.cmpi eq, %12, %608 : vector<16x128xi32>
    %610 = arith.extui %609 : vector<16x128xi1> to vector<16x128xi32>
    %611 = arith.sitofp %610 : vector<16x128xi32> to vector<16x128xf32>
    %612 = arith.truncf %611 : vector<16x128xf32> to vector<16x128xbf16>
    %cst_154 = arith.constant dense<0.000000e+00> : vector<16x16xf32>
    %613 = tpu.matmul %612, %5, %cst_154 {dimension_numbers = #tpu.dot_dimension_numbers<[1], [0], [0], [1], [0, 0, 1, 1], [], []>} : vector<16x128xbf16>, vector<128x16xbf16>, vector<16x16xf32> -> vector<16x16xf32>
    %c1_i32_155 = arith.constant 1 : i32
    %614 = arith.truncf %613 : vector<16x16xf32> to vector<16x16xbf16>
    %cst_156 = arith.constant dense<0.000000e+00> : vector<16x128xf32>
    %615 = tpu.matmul %614, %2, %cst_156 {dimension_numbers = #tpu.dot_dimension_numbers<[1], [0], [0], [1], [0, 0, 1, 1], [], []>} : vector<16x16xbf16>, vector<16x128xbf16>, vector<16x128xf32> -> vector<16x128xf32>
    %616 = arith.truncf %588 : vector<16x32xf32> to vector<16x32xbf16>
    %cst_157 = arith.constant dense<0.000000e+00> : vector<16x128xf32>
    %617 = tpu.matmul %616, %3, %cst_157 {dimension_numbers = #tpu.dot_dimension_numbers<[1], [0], [0], [1], [0, 0, 1, 1], [], []>} : vector<16x32xbf16>, vector<32x128xbf16>, vector<16x128xf32> -> vector<16x128xf32>
    %618 = arith.addf %615, %617 : vector<16x128xf32>
    %619 = arith.addf %618, %8 : vector<16x128xf32>
    %620 = vector.extract_strided_slice %619 {offsets = [0, 0], sizes = [16, 32], strides = [1, 1]} : vector<16x128xf32> to vector<16x32xf32>
    %621 = arith.negf %620 : vector<16x32xf32>
    %622 = math.exp %621 : vector<16x32xf32>
    %cst_158 = arith.constant 1.000000e+00 : f32
    %623 = vector.broadcast %cst_158 : f32 to vector<16x32xf32>
    %624 = arith.addf %623, %622 : vector<16x32xf32>
    %625 = arith.divf %623, %624 : vector<16x32xf32>
    %626 = vector.extract_strided_slice %619 {offsets = [0, 32], sizes = [16, 32], strides = [1, 1]} : vector<16x128xf32> to vector<16x32xf32>
    %627 = arith.negf %626 : vector<16x32xf32>
    %628 = math.exp %627 : vector<16x32xf32>
    %cst_159 = arith.constant 1.000000e+00 : f32
    %629 = vector.broadcast %cst_159 : f32 to vector<16x32xf32>
    %630 = arith.addf %629, %628 : vector<16x32xf32>
    %631 = arith.divf %629, %630 : vector<16x32xf32>
    %632 = vector.extract_strided_slice %619 {offsets = [0, 64], sizes = [16, 32], strides = [1, 1]} : vector<16x128xf32> to vector<16x32xf32>
    %633 = math.tanh %632 : vector<16x32xf32>
    %634 = vector.extract_strided_slice %619 {offsets = [0, 96], sizes = [16, 32], strides = [1, 1]} : vector<16x128xf32> to vector<16x32xf32>
    %635 = arith.negf %634 : vector<16x32xf32>
    %636 = math.exp %635 : vector<16x32xf32>
    %cst_160 = arith.constant 1.000000e+00 : f32
    %637 = vector.broadcast %cst_160 : f32 to vector<16x32xf32>
    %638 = arith.addf %637, %636 : vector<16x32xf32>
    %639 = arith.divf %637, %638 : vector<16x32xf32>
    %640 = arith.mulf %631, %586 : vector<16x32xf32>
    %641 = arith.mulf %625, %633 : vector<16x32xf32>
    %642 = arith.addf %640, %641 : vector<16x32xf32>
    %643 = math.tanh %642 : vector<16x32xf32>
    %644 = arith.mulf %639, %643 : vector<16x32xf32>
    %645 = arith.truncf %644 : vector<16x32xf32> to vector<16x32xbf16>
    %cst_161 = arith.constant dense<0.000000e+00> : vector<16x128xf32>
    %646 = tpu.matmul %645, %4, %cst_161 {dimension_numbers = #tpu.dot_dimension_numbers<[1], [0], [0], [1], [0, 0, 1, 1], [], []>} : vector<16x32xbf16>, vector<32x128xbf16>, vector<16x128xf32> -> vector<16x128xf32>
    %647 = arith.addf %646, %11 : vector<16x128xf32>
    %648 = arith.index_cast %c1_i32_155 : i32 to index
    %c0_162 = arith.constant 0 : index
    %c0_163 = arith.constant 0 : index
    %649 = vector.load %arg16[%648, %c0_162, %c0_163] : memref<8x16x128xf32, #tpu.memory_space<vmem>>, vector<1x16x128xf32>
    %650 = vector.shape_cast %649 : vector<1x16x128xf32> to vector<16x128xf32>
    %651 = vector.shape_cast %647 : vector<16x128xf32> to vector<1x16x128xf32>
    tpu.vector_store %arg16[%648, %c0_162, %c0_163], %651 {strides = array<i32>} : memref<8x16x128xf32, #tpu.memory_space<vmem>>, vector<1x16x128xf32>,
    %cst_164 = arith.constant dense<0xFF800000> : vector<16xf32>
    %652 = vector.multi_reduction <maximumf>, %647, %cst_164 [1] : vector<16x128xf32> to vector<16xf32>
    %653 = vector.shape_cast %652 : vector<16xf32> to vector<16x1xf32>
    %654 = vector.broadcast %653 : vector<16x1xf32> to vector<16x128xf32>
    %655 = arith.cmpf oeq, %647, %654 : vector<16x128xf32>
    %c128_i32_165 = arith.constant 128 : i32
    %656 = vector.broadcast %c128_i32_165 : i32 to vector<16x128xi32>
    %657 = arith.select %655, %12, %656 : vector<16x128xi1>, vector<16x128xi32>
    %cst_166 = arith.constant dense<2147483647> : vector<16xi32>
    %658 = vector.multi_reduction <minsi>, %657, %cst_166 [1] : vector<16x128xi32> to vector<16xi32>
    %659 = vector.shape_cast %658 : vector<16xi32> to vector<16x1xi32>
    %660 = arith.index_cast %c1_i32_155 : i32 to index
    %c0_167 = arith.constant 0 : index
    %c0_168 = arith.constant 0 : index
    %661 = vector.load %arg17[%660, %c0_167, %c0_168] : memref<8x16x1xi32, #tpu.memory_space<vmem>>, vector<1x16x1xi32>
    %662 = vector.shape_cast %661 : vector<1x16x1xi32> to vector<16x1xi32>
    %663 = vector.shape_cast %659 : vector<16x1xi32> to vector<1x16x1xi32>
    tpu.vector_store %arg17[%660, %c0_167, %c0_168], %663 {strides = array<i32>} : memref<8x16x1xi32, #tpu.memory_space<vmem>>, vector<1x16x1xi32>,
    %664 = vector.broadcast %659 : vector<16x1xi32> to vector<16x128xi32>
    %665 = arith.cmpi eq, %12, %664 : vector<16x128xi32>
    %666 = arith.extui %665 : vector<16x128xi1> to vector<16x128xi32>
    %667 = arith.sitofp %666 : vector<16x128xi32> to vector<16x128xf32>
    %668 = arith.truncf %667 : vector<16x128xf32> to vector<16x128xbf16>
    %cst_169 = arith.constant dense<0.000000e+00> : vector<16x16xf32>
    %669 = tpu.matmul %668, %5, %cst_169 {dimension_numbers = #tpu.dot_dimension_numbers<[1], [0], [0], [1], [0, 0, 1, 1], [], []>} : vector<16x128xbf16>, vector<128x16xbf16>, vector<16x16xf32> -> vector<16x16xf32>
    %c2_i32_170 = arith.constant 2 : i32
    %670 = arith.truncf %669 : vector<16x16xf32> to vector<16x16xbf16>
    %cst_171 = arith.constant dense<0.000000e+00> : vector<16x128xf32>
    %671 = tpu.matmul %670, %2, %cst_171 {dimension_numbers = #tpu.dot_dimension_numbers<[1], [0], [0], [1], [0, 0, 1, 1], [], []>} : vector<16x16xbf16>, vector<16x128xbf16>, vector<16x128xf32> -> vector<16x128xf32>
    %672 = arith.truncf %644 : vector<16x32xf32> to vector<16x32xbf16>
    %cst_172 = arith.constant dense<0.000000e+00> : vector<16x128xf32>
    %673 = tpu.matmul %672, %3, %cst_172 {dimension_numbers = #tpu.dot_dimension_numbers<[1], [0], [0], [1], [0, 0, 1, 1], [], []>} : vector<16x32xbf16>, vector<32x128xbf16>, vector<16x128xf32> -> vector<16x128xf32>
    %674 = arith.addf %671, %673 : vector<16x128xf32>
    %675 = arith.addf %674, %8 : vector<16x128xf32>
    %676 = vector.extract_strided_slice %675 {offsets = [0, 0], sizes = [16, 32], strides = [1, 1]} : vector<16x128xf32> to vector<16x32xf32>
    %677 = arith.negf %676 : vector<16x32xf32>
    %678 = math.exp %677 : vector<16x32xf32>
    %cst_173 = arith.constant 1.000000e+00 : f32
    %679 = vector.broadcast %cst_173 : f32 to vector<16x32xf32>
    %680 = arith.addf %679, %678 : vector<16x32xf32>
    %681 = arith.divf %679, %680 : vector<16x32xf32>
    %682 = vector.extract_strided_slice %675 {offsets = [0, 32], sizes = [16, 32], strides = [1, 1]} : vector<16x128xf32> to vector<16x32xf32>
    %683 = arith.negf %682 : vector<16x32xf32>
    %684 = math.exp %683 : vector<16x32xf32>
    %cst_174 = arith.constant 1.000000e+00 : f32
    %685 = vector.broadcast %cst_174 : f32 to vector<16x32xf32>
    %686 = arith.addf %685, %684 : vector<16x32xf32>
    %687 = arith.divf %685, %686 : vector<16x32xf32>
    %688 = vector.extract_strided_slice %675 {offsets = [0, 64], sizes = [16, 32], strides = [1, 1]} : vector<16x128xf32> to vector<16x32xf32>
    %689 = math.tanh %688 : vector<16x32xf32>
    %690 = vector.extract_strided_slice %675 {offsets = [0, 96], sizes = [16, 32], strides = [1, 1]} : vector<16x128xf32> to vector<16x32xf32>
    %691 = arith.negf %690 : vector<16x32xf32>
    %692 = math.exp %691 : vector<16x32xf32>
    %cst_175 = arith.constant 1.000000e+00 : f32
    %693 = vector.broadcast %cst_175 : f32 to vector<16x32xf32>
    %694 = arith.addf %693, %692 : vector<16x32xf32>
    %695 = arith.divf %693, %694 : vector<16x32xf32>
    %696 = arith.mulf %687, %642 : vector<16x32xf32>
    %697 = arith.mulf %681, %689 : vector<16x32xf32>
    %698 = arith.addf %696, %697 : vector<16x32xf32>
    %699 = math.tanh %698 : vector<16x32xf32>
    %700 = arith.mulf %695, %699 : vector<16x32xf32>
    %701 = arith.truncf %700 : vector<16x32xf32> to vector<16x32xbf16>
    %cst_176 = arith.constant dense<0.000000e+00> : vector<16x128xf32>
    %702 = tpu.matmul %701, %4, %cst_176 {dimension_numbers = #tpu.dot_dimension_numbers<[1], [0], [0], [1], [0, 0, 1, 1], [], []>} : vector<16x32xbf16>, vector<32x128xbf16>, vector<16x128xf32> -> vector<16x128xf32>
    %703 = arith.addf %702, %11 : vector<16x128xf32>
    %704 = arith.index_cast %c2_i32_170 : i32 to index
    %c0_177 = arith.constant 0 : index
    %c0_178 = arith.constant 0 : index
    %705 = vector.load %arg16[%704, %c0_177, %c0_178] : memref<8x16x128xf32, #tpu.memory_space<vmem>>, vector<1x16x128xf32>
    %706 = vector.shape_cast %705 : vector<1x16x128xf32> to vector<16x128xf32>
    %707 = vector.shape_cast %703 : vector<16x128xf32> to vector<1x16x128xf32>
    tpu.vector_store %arg16[%704, %c0_177, %c0_178], %707 {strides = array<i32>} : memref<8x16x128xf32, #tpu.memory_space<vmem>>, vector<1x16x128xf32>,
    %cst_179 = arith.constant dense<0xFF800000> : vector<16xf32>
    %708 = vector.multi_reduction <maximumf>, %703, %cst_179 [1] : vector<16x128xf32> to vector<16xf32>
    %709 = vector.shape_cast %708 : vector<16xf32> to vector<16x1xf32>
    %710 = vector.broadcast %709 : vector<16x1xf32> to vector<16x128xf32>
    %711 = arith.cmpf oeq, %703, %710 : vector<16x128xf32>
    %c128_i32_180 = arith.constant 128 : i32
    %712 = vector.broadcast %c128_i32_180 : i32 to vector<16x128xi32>
    %713 = arith.select %711, %12, %712 : vector<16x128xi1>, vector<16x128xi32>
    %cst_181 = arith.constant dense<2147483647> : vector<16xi32>
    %714 = vector.multi_reduction <minsi>, %713, %cst_181 [1] : vector<16x128xi32> to vector<16xi32>
    %715 = vector.shape_cast %714 : vector<16xi32> to vector<16x1xi32>
    %716 = arith.index_cast %c2_i32_170 : i32 to index
    %c0_182 = arith.constant 0 : index
    %c0_183 = arith.constant 0 : index
    %717 = vector.load %arg17[%716, %c0_182, %c0_183] : memref<8x16x1xi32, #tpu.memory_space<vmem>>, vector<1x16x1xi32>
    %718 = vector.shape_cast %717 : vector<1x16x1xi32> to vector<16x1xi32>
    %719 = vector.shape_cast %715 : vector<16x1xi32> to vector<1x16x1xi32>
    tpu.vector_store %arg17[%716, %c0_182, %c0_183], %719 {strides = array<i32>} : memref<8x16x1xi32, #tpu.memory_space<vmem>>, vector<1x16x1xi32>,
    %720 = vector.broadcast %715 : vector<16x1xi32> to vector<16x128xi32>
    %721 = arith.cmpi eq, %12, %720 : vector<16x128xi32>
    %722 = arith.extui %721 : vector<16x128xi1> to vector<16x128xi32>
    %723 = arith.sitofp %722 : vector<16x128xi32> to vector<16x128xf32>
    %724 = arith.truncf %723 : vector<16x128xf32> to vector<16x128xbf16>
    %cst_184 = arith.constant dense<0.000000e+00> : vector<16x16xf32>
    %725 = tpu.matmul %724, %5, %cst_184 {dimension_numbers = #tpu.dot_dimension_numbers<[1], [0], [0], [1], [0, 0, 1, 1], [], []>} : vector<16x128xbf16>, vector<128x16xbf16>, vector<16x16xf32> -> vector<16x16xf32>
    %c3_i32_185 = arith.constant 3 : i32
    %726 = arith.truncf %725 : vector<16x16xf32> to vector<16x16xbf16>
    %cst_186 = arith.constant dense<0.000000e+00> : vector<16x128xf32>
    %727 = tpu.matmul %726, %2, %cst_186 {dimension_numbers = #tpu.dot_dimension_numbers<[1], [0], [0], [1], [0, 0, 1, 1], [], []>} : vector<16x16xbf16>, vector<16x128xbf16>, vector<16x128xf32> -> vector<16x128xf32>
    %728 = arith.truncf %700 : vector<16x32xf32> to vector<16x32xbf16>
    %cst_187 = arith.constant dense<0.000000e+00> : vector<16x128xf32>
    %729 = tpu.matmul %728, %3, %cst_187 {dimension_numbers = #tpu.dot_dimension_numbers<[1], [0], [0], [1], [0, 0, 1, 1], [], []>} : vector<16x32xbf16>, vector<32x128xbf16>, vector<16x128xf32> -> vector<16x128xf32>
    %730 = arith.addf %727, %729 : vector<16x128xf32>
    %731 = arith.addf %730, %8 : vector<16x128xf32>
    %732 = vector.extract_strided_slice %731 {offsets = [0, 0], sizes = [16, 32], strides = [1, 1]} : vector<16x128xf32> to vector<16x32xf32>
    %733 = arith.negf %732 : vector<16x32xf32>
    %734 = math.exp %733 : vector<16x32xf32>
    %cst_188 = arith.constant 1.000000e+00 : f32
    %735 = vector.broadcast %cst_188 : f32 to vector<16x32xf32>
    %736 = arith.addf %735, %734 : vector<16x32xf32>
    %737 = arith.divf %735, %736 : vector<16x32xf32>
    %738 = vector.extract_strided_slice %731 {offsets = [0, 32], sizes = [16, 32], strides = [1, 1]} : vector<16x128xf32> to vector<16x32xf32>
    %739 = arith.negf %738 : vector<16x32xf32>
    %740 = math.exp %739 : vector<16x32xf32>
    %cst_189 = arith.constant 1.000000e+00 : f32
    %741 = vector.broadcast %cst_189 : f32 to vector<16x32xf32>
    %742 = arith.addf %741, %740 : vector<16x32xf32>
    %743 = arith.divf %741, %742 : vector<16x32xf32>
    %744 = vector.extract_strided_slice %731 {offsets = [0, 64], sizes = [16, 32], strides = [1, 1]} : vector<16x128xf32> to vector<16x32xf32>
    %745 = math.tanh %744 : vector<16x32xf32>
    %746 = vector.extract_strided_slice %731 {offsets = [0, 96], sizes = [16, 32], strides = [1, 1]} : vector<16x128xf32> to vector<16x32xf32>
    %747 = arith.negf %746 : vector<16x32xf32>
    %748 = math.exp %747 : vector<16x32xf32>
    %cst_190 = arith.constant 1.000000e+00 : f32
    %749 = vector.broadcast %cst_190 : f32 to vector<16x32xf32>
    %750 = arith.addf %749, %748 : vector<16x32xf32>
    %751 = arith.divf %749, %750 : vector<16x32xf32>
    %752 = arith.mulf %743, %698 : vector<16x32xf32>
    %753 = arith.mulf %737, %745 : vector<16x32xf32>
    %754 = arith.addf %752, %753 : vector<16x32xf32>
    %755 = math.tanh %754 : vector<16x32xf32>
    %756 = arith.mulf %751, %755 : vector<16x32xf32>
    %757 = arith.truncf %756 : vector<16x32xf32> to vector<16x32xbf16>
    %cst_191 = arith.constant dense<0.000000e+00> : vector<16x128xf32>
    %758 = tpu.matmul %757, %4, %cst_191 {dimension_numbers = #tpu.dot_dimension_numbers<[1], [0], [0], [1], [0, 0, 1, 1], [], []>} : vector<16x32xbf16>, vector<32x128xbf16>, vector<16x128xf32> -> vector<16x128xf32>
    %759 = arith.addf %758, %11 : vector<16x128xf32>
    %760 = arith.index_cast %c3_i32_185 : i32 to index
    %c0_192 = arith.constant 0 : index
    %c0_193 = arith.constant 0 : index
    %761 = vector.load %arg16[%760, %c0_192, %c0_193] : memref<8x16x128xf32, #tpu.memory_space<vmem>>, vector<1x16x128xf32>
    %762 = vector.shape_cast %761 : vector<1x16x128xf32> to vector<16x128xf32>
    %763 = vector.shape_cast %759 : vector<16x128xf32> to vector<1x16x128xf32>
    tpu.vector_store %arg16[%760, %c0_192, %c0_193], %763 {strides = array<i32>} : memref<8x16x128xf32, #tpu.memory_space<vmem>>, vector<1x16x128xf32>,
    %cst_194 = arith.constant dense<0xFF800000> : vector<16xf32>
    %764 = vector.multi_reduction <maximumf>, %759, %cst_194 [1] : vector<16x128xf32> to vector<16xf32>
    %765 = vector.shape_cast %764 : vector<16xf32> to vector<16x1xf32>
    %766 = vector.broadcast %765 : vector<16x1xf32> to vector<16x128xf32>
    %767 = arith.cmpf oeq, %759, %766 : vector<16x128xf32>
    %c128_i32_195 = arith.constant 128 : i32
    %768 = vector.broadcast %c128_i32_195 : i32 to vector<16x128xi32>
    %769 = arith.select %767, %12, %768 : vector<16x128xi1>, vector<16x128xi32>
    %cst_196 = arith.constant dense<2147483647> : vector<16xi32>
    %770 = vector.multi_reduction <minsi>, %769, %cst_196 [1] : vector<16x128xi32> to vector<16xi32>
    %771 = vector.shape_cast %770 : vector<16xi32> to vector<16x1xi32>
    %772 = arith.index_cast %c3_i32_185 : i32 to index
    %c0_197 = arith.constant 0 : index
    %c0_198 = arith.constant 0 : index
    %773 = vector.load %arg17[%772, %c0_197, %c0_198] : memref<8x16x1xi32, #tpu.memory_space<vmem>>, vector<1x16x1xi32>
    %774 = vector.shape_cast %773 : vector<1x16x1xi32> to vector<16x1xi32>
    %775 = vector.shape_cast %771 : vector<16x1xi32> to vector<1x16x1xi32>
    tpu.vector_store %arg17[%772, %c0_197, %c0_198], %775 {strides = array<i32>} : memref<8x16x1xi32, #tpu.memory_space<vmem>>, vector<1x16x1xi32>,
    %776 = vector.broadcast %771 : vector<16x1xi32> to vector<16x128xi32>
    %777 = arith.cmpi eq, %12, %776 : vector<16x128xi32>
    %778 = arith.extui %777 : vector<16x128xi1> to vector<16x128xi32>
    %779 = arith.sitofp %778 : vector<16x128xi32> to vector<16x128xf32>
    %780 = arith.truncf %779 : vector<16x128xf32> to vector<16x128xbf16>
    %cst_199 = arith.constant dense<0.000000e+00> : vector<16x16xf32>
    %781 = tpu.matmul %780, %5, %cst_199 {dimension_numbers = #tpu.dot_dimension_numbers<[1], [0], [0], [1], [0, 0, 1, 1], [], []>} : vector<16x128xbf16>, vector<128x16xbf16>, vector<16x16xf32> -> vector<16x16xf32>
    %c4_i32_200 = arith.constant 4 : i32
    %782 = arith.truncf %781 : vector<16x16xf32> to vector<16x16xbf16>
    %cst_201 = arith.constant dense<0.000000e+00> : vector<16x128xf32>
    %783 = tpu.matmul %782, %2, %cst_201 {dimension_numbers = #tpu.dot_dimension_numbers<[1], [0], [0], [1], [0, 0, 1, 1], [], []>} : vector<16x16xbf16>, vector<16x128xbf16>, vector<16x128xf32> -> vector<16x128xf32>
    %784 = arith.truncf %756 : vector<16x32xf32> to vector<16x32xbf16>
    %cst_202 = arith.constant dense<0.000000e+00> : vector<16x128xf32>
    %785 = tpu.matmul %784, %3, %cst_202 {dimension_numbers = #tpu.dot_dimension_numbers<[1], [0], [0], [1], [0, 0, 1, 1], [], []>} : vector<16x32xbf16>, vector<32x128xbf16>, vector<16x128xf32> -> vector<16x128xf32>
    %786 = arith.addf %783, %785 : vector<16x128xf32>
    %787 = arith.addf %786, %8 : vector<16x128xf32>
    %788 = vector.extract_strided_slice %787 {offsets = [0, 0], sizes = [16, 32], strides = [1, 1]} : vector<16x128xf32> to vector<16x32xf32>
    %789 = arith.negf %788 : vector<16x32xf32>
    %790 = math.exp %789 : vector<16x32xf32>
    %cst_203 = arith.constant 1.000000e+00 : f32
    %791 = vector.broadcast %cst_203 : f32 to vector<16x32xf32>
    %792 = arith.addf %791, %790 : vector<16x32xf32>
    %793 = arith.divf %791, %792 : vector<16x32xf32>
    %794 = vector.extract_strided_slice %787 {offsets = [0, 32], sizes = [16, 32], strides = [1, 1]} : vector<16x128xf32> to vector<16x32xf32>
    %795 = arith.negf %794 : vector<16x32xf32>
    %796 = math.exp %795 : vector<16x32xf32>
    %cst_204 = arith.constant 1.000000e+00 : f32
    %797 = vector.broadcast %cst_204 : f32 to vector<16x32xf32>
    %798 = arith.addf %797, %796 : vector<16x32xf32>
    %799 = arith.divf %797, %798 : vector<16x32xf32>
    %800 = vector.extract_strided_slice %787 {offsets = [0, 64], sizes = [16, 32], strides = [1, 1]} : vector<16x128xf32> to vector<16x32xf32>
    %801 = math.tanh %800 : vector<16x32xf32>
    %802 = vector.extract_strided_slice %787 {offsets = [0, 96], sizes = [16, 32], strides = [1, 1]} : vector<16x128xf32> to vector<16x32xf32>
    %803 = arith.negf %802 : vector<16x32xf32>
    %804 = math.exp %803 : vector<16x32xf32>
    %cst_205 = arith.constant 1.000000e+00 : f32
    %805 = vector.broadcast %cst_205 : f32 to vector<16x32xf32>
    %806 = arith.addf %805, %804 : vector<16x32xf32>
    %807 = arith.divf %805, %806 : vector<16x32xf32>
    %808 = arith.mulf %799, %754 : vector<16x32xf32>
    %809 = arith.mulf %793, %801 : vector<16x32xf32>
    %810 = arith.addf %808, %809 : vector<16x32xf32>
    %811 = math.tanh %810 : vector<16x32xf32>
    %812 = arith.mulf %807, %811 : vector<16x32xf32>
    %813 = arith.truncf %812 : vector<16x32xf32> to vector<16x32xbf16>
    %cst_206 = arith.constant dense<0.000000e+00> : vector<16x128xf32>
    %814 = tpu.matmul %813, %4, %cst_206 {dimension_numbers = #tpu.dot_dimension_numbers<[1], [0], [0], [1], [0, 0, 1, 1], [], []>} : vector<16x32xbf16>, vector<32x128xbf16>, vector<16x128xf32> -> vector<16x128xf32>
    %815 = arith.addf %814, %11 : vector<16x128xf32>
    %816 = arith.index_cast %c4_i32_200 : i32 to index
    %c0_207 = arith.constant 0 : index
    %c0_208 = arith.constant 0 : index
    %817 = vector.load %arg16[%816, %c0_207, %c0_208] : memref<8x16x128xf32, #tpu.memory_space<vmem>>, vector<1x16x128xf32>
    %818 = vector.shape_cast %817 : vector<1x16x128xf32> to vector<16x128xf32>
    %819 = vector.shape_cast %815 : vector<16x128xf32> to vector<1x16x128xf32>
    tpu.vector_store %arg16[%816, %c0_207, %c0_208], %819 {strides = array<i32>} : memref<8x16x128xf32, #tpu.memory_space<vmem>>, vector<1x16x128xf32>,
    %cst_209 = arith.constant dense<0xFF800000> : vector<16xf32>
    %820 = vector.multi_reduction <maximumf>, %815, %cst_209 [1] : vector<16x128xf32> to vector<16xf32>
    %821 = vector.shape_cast %820 : vector<16xf32> to vector<16x1xf32>
    %822 = vector.broadcast %821 : vector<16x1xf32> to vector<16x128xf32>
    %823 = arith.cmpf oeq, %815, %822 : vector<16x128xf32>
    %c128_i32_210 = arith.constant 128 : i32
    %824 = vector.broadcast %c128_i32_210 : i32 to vector<16x128xi32>
    %825 = arith.select %823, %12, %824 : vector<16x128xi1>, vector<16x128xi32>
    %cst_211 = arith.constant dense<2147483647> : vector<16xi32>
    %826 = vector.multi_reduction <minsi>, %825, %cst_211 [1] : vector<16x128xi32> to vector<16xi32>
    %827 = vector.shape_cast %826 : vector<16xi32> to vector<16x1xi32>
    %828 = arith.index_cast %c4_i32_200 : i32 to index
    %c0_212 = arith.constant 0 : index
    %c0_213 = arith.constant 0 : index
    %829 = vector.load %arg17[%828, %c0_212, %c0_213] : memref<8x16x1xi32, #tpu.memory_space<vmem>>, vector<1x16x1xi32>
    %830 = vector.shape_cast %829 : vector<1x16x1xi32> to vector<16x1xi32>
    %831 = vector.shape_cast %827 : vector<16x1xi32> to vector<1x16x1xi32>
    tpu.vector_store %arg17[%828, %c0_212, %c0_213], %831 {strides = array<i32>} : memref<8x16x1xi32, #tpu.memory_space<vmem>>, vector<1x16x1xi32>,
    %832 = vector.broadcast %827 : vector<16x1xi32> to vector<16x128xi32>
    %833 = arith.cmpi eq, %12, %832 : vector<16x128xi32>
    %834 = arith.extui %833 : vector<16x128xi1> to vector<16x128xi32>
    %835 = arith.sitofp %834 : vector<16x128xi32> to vector<16x128xf32>
    %836 = arith.truncf %835 : vector<16x128xf32> to vector<16x128xbf16>
    %cst_214 = arith.constant dense<0.000000e+00> : vector<16x16xf32>
    %837 = tpu.matmul %836, %5, %cst_214 {dimension_numbers = #tpu.dot_dimension_numbers<[1], [0], [0], [1], [0, 0, 1, 1], [], []>} : vector<16x128xbf16>, vector<128x16xbf16>, vector<16x16xf32> -> vector<16x16xf32>
    %c5_i32_215 = arith.constant 5 : i32
    %838 = arith.truncf %837 : vector<16x16xf32> to vector<16x16xbf16>
    %cst_216 = arith.constant dense<0.000000e+00> : vector<16x128xf32>
    %839 = tpu.matmul %838, %2, %cst_216 {dimension_numbers = #tpu.dot_dimension_numbers<[1], [0], [0], [1], [0, 0, 1, 1], [], []>} : vector<16x16xbf16>, vector<16x128xbf16>, vector<16x128xf32> -> vector<16x128xf32>
    %840 = arith.truncf %812 : vector<16x32xf32> to vector<16x32xbf16>
    %cst_217 = arith.constant dense<0.000000e+00> : vector<16x128xf32>
    %841 = tpu.matmul %840, %3, %cst_217 {dimension_numbers = #tpu.dot_dimension_numbers<[1], [0], [0], [1], [0, 0, 1, 1], [], []>} : vector<16x32xbf16>, vector<32x128xbf16>, vector<16x128xf32> -> vector<16x128xf32>
    %842 = arith.addf %839, %841 : vector<16x128xf32>
    %843 = arith.addf %842, %8 : vector<16x128xf32>
    %844 = vector.extract_strided_slice %843 {offsets = [0, 0], sizes = [16, 32], strides = [1, 1]} : vector<16x128xf32> to vector<16x32xf32>
    %845 = arith.negf %844 : vector<16x32xf32>
    %846 = math.exp %845 : vector<16x32xf32>
    %cst_218 = arith.constant 1.000000e+00 : f32
    %847 = vector.broadcast %cst_218 : f32 to vector<16x32xf32>
    %848 = arith.addf %847, %846 : vector<16x32xf32>
    %849 = arith.divf %847, %848 : vector<16x32xf32>
    %850 = vector.extract_strided_slice %843 {offsets = [0, 32], sizes = [16, 32], strides = [1, 1]} : vector<16x128xf32> to vector<16x32xf32>
    %851 = arith.negf %850 : vector<16x32xf32>
    %852 = math.exp %851 : vector<16x32xf32>
    %cst_219 = arith.constant 1.000000e+00 : f32
    %853 = vector.broadcast %cst_219 : f32 to vector<16x32xf32>
    %854 = arith.addf %853, %852 : vector<16x32xf32>
    %855 = arith.divf %853, %854 : vector<16x32xf32>
    %856 = vector.extract_strided_slice %843 {offsets = [0, 64], sizes = [16, 32], strides = [1, 1]} : vector<16x128xf32> to vector<16x32xf32>
    %857 = math.tanh %856 : vector<16x32xf32>
    %858 = vector.extract_strided_slice %843 {offsets = [0, 96], sizes = [16, 32], strides = [1, 1]} : vector<16x128xf32> to vector<16x32xf32>
    %859 = arith.negf %858 : vector<16x32xf32>
    %860 = math.exp %859 : vector<16x32xf32>
    %cst_220 = arith.constant 1.000000e+00 : f32
    %861 = vector.broadcast %cst_220 : f32 to vector<16x32xf32>
    %862 = arith.addf %861, %860 : vector<16x32xf32>
    %863 = arith.divf %861, %862 : vector<16x32xf32>
    %864 = arith.mulf %855, %810 : vector<16x32xf32>
    %865 = arith.mulf %849, %857 : vector<16x32xf32>
    %866 = arith.addf %864, %865 : vector<16x32xf32>
    %867 = math.tanh %866 : vector<16x32xf32>
    %868 = arith.mulf %863, %867 : vector<16x32xf32>
    %869 = arith.truncf %868 : vector<16x32xf32> to vector<16x32xbf16>
    %cst_221 = arith.constant dense<0.000000e+00> : vector<16x128xf32>
    %870 = tpu.matmul %869, %4, %cst_221 {dimension_numbers = #tpu.dot_dimension_numbers<[1], [0], [0], [1], [0, 0, 1, 1], [], []>} : vector<16x32xbf16>, vector<32x128xbf16>, vector<16x128xf32> -> vector<16x128xf32>
    %871 = arith.addf %870, %11 : vector<16x128xf32>
    %872 = arith.index_cast %c5_i32_215 : i32 to index
    %c0_222 = arith.constant 0 : index
    %c0_223 = arith.constant 0 : index
    %873 = vector.load %arg16[%872, %c0_222, %c0_223] : memref<8x16x128xf32, #tpu.memory_space<vmem>>, vector<1x16x128xf32>
    %874 = vector.shape_cast %873 : vector<1x16x128xf32> to vector<16x128xf32>
    %875 = vector.shape_cast %871 : vector<16x128xf32> to vector<1x16x128xf32>
    tpu.vector_store %arg16[%872, %c0_222, %c0_223], %875 {strides = array<i32>} : memref<8x16x128xf32, #tpu.memory_space<vmem>>, vector<1x16x128xf32>,
    %cst_224 = arith.constant dense<0xFF800000> : vector<16xf32>
    %876 = vector.multi_reduction <maximumf>, %871, %cst_224 [1] : vector<16x128xf32> to vector<16xf32>
    %877 = vector.shape_cast %876 : vector<16xf32> to vector<16x1xf32>
    %878 = vector.broadcast %877 : vector<16x1xf32> to vector<16x128xf32>
    %879 = arith.cmpf oeq, %871, %878 : vector<16x128xf32>
    %c128_i32_225 = arith.constant 128 : i32
    %880 = vector.broadcast %c128_i32_225 : i32 to vector<16x128xi32>
    %881 = arith.select %879, %12, %880 : vector<16x128xi1>, vector<16x128xi32>
    %cst_226 = arith.constant dense<2147483647> : vector<16xi32>
    %882 = vector.multi_reduction <minsi>, %881, %cst_226 [1] : vector<16x128xi32> to vector<16xi32>
    %883 = vector.shape_cast %882 : vector<16xi32> to vector<16x1xi32>
    %884 = arith.index_cast %c5_i32_215 : i32 to index
    %c0_227 = arith.constant 0 : index
    %c0_228 = arith.constant 0 : index
    %885 = vector.load %arg17[%884, %c0_227, %c0_228] : memref<8x16x1xi32, #tpu.memory_space<vmem>>, vector<1x16x1xi32>
    %886 = vector.shape_cast %885 : vector<1x16x1xi32> to vector<16x1xi32>
    %887 = vector.shape_cast %883 : vector<16x1xi32> to vector<1x16x1xi32>
    tpu.vector_store %arg17[%884, %c0_227, %c0_228], %887 {strides = array<i32>} : memref<8x16x1xi32, #tpu.memory_space<vmem>>, vector<1x16x1xi32>,
    %888 = vector.broadcast %883 : vector<16x1xi32> to vector<16x128xi32>
    %889 = arith.cmpi eq, %12, %888 : vector<16x128xi32>
    %890 = arith.extui %889 : vector<16x128xi1> to vector<16x128xi32>
    %891 = arith.sitofp %890 : vector<16x128xi32> to vector<16x128xf32>
    %892 = arith.truncf %891 : vector<16x128xf32> to vector<16x128xbf16>
    %cst_229 = arith.constant dense<0.000000e+00> : vector<16x16xf32>
    %893 = tpu.matmul %892, %5, %cst_229 {dimension_numbers = #tpu.dot_dimension_numbers<[1], [0], [0], [1], [0, 0, 1, 1], [], []>} : vector<16x128xbf16>, vector<128x16xbf16>, vector<16x16xf32> -> vector<16x16xf32>
    %c6_i32_230 = arith.constant 6 : i32
    %894 = arith.truncf %893 : vector<16x16xf32> to vector<16x16xbf16>
    %cst_231 = arith.constant dense<0.000000e+00> : vector<16x128xf32>
    %895 = tpu.matmul %894, %2, %cst_231 {dimension_numbers = #tpu.dot_dimension_numbers<[1], [0], [0], [1], [0, 0, 1, 1], [], []>} : vector<16x16xbf16>, vector<16x128xbf16>, vector<16x128xf32> -> vector<16x128xf32>
    %896 = arith.truncf %868 : vector<16x32xf32> to vector<16x32xbf16>
    %cst_232 = arith.constant dense<0.000000e+00> : vector<16x128xf32>
    %897 = tpu.matmul %896, %3, %cst_232 {dimension_numbers = #tpu.dot_dimension_numbers<[1], [0], [0], [1], [0, 0, 1, 1], [], []>} : vector<16x32xbf16>, vector<32x128xbf16>, vector<16x128xf32> -> vector<16x128xf32>
    %898 = arith.addf %895, %897 : vector<16x128xf32>
    %899 = arith.addf %898, %8 : vector<16x128xf32>
    %900 = vector.extract_strided_slice %899 {offsets = [0, 0], sizes = [16, 32], strides = [1, 1]} : vector<16x128xf32> to vector<16x32xf32>
    %901 = arith.negf %900 : vector<16x32xf32>
    %902 = math.exp %901 : vector<16x32xf32>
    %cst_233 = arith.constant 1.000000e+00 : f32
    %903 = vector.broadcast %cst_233 : f32 to vector<16x32xf32>
    %904 = arith.addf %903, %902 : vector<16x32xf32>
    %905 = arith.divf %903, %904 : vector<16x32xf32>
    %906 = vector.extract_strided_slice %899 {offsets = [0, 32], sizes = [16, 32], strides = [1, 1]} : vector<16x128xf32> to vector<16x32xf32>
    %907 = arith.negf %906 : vector<16x32xf32>
    %908 = math.exp %907 : vector<16x32xf32>
    %cst_234 = arith.constant 1.000000e+00 : f32
    %909 = vector.broadcast %cst_234 : f32 to vector<16x32xf32>
    %910 = arith.addf %909, %908 : vector<16x32xf32>
    %911 = arith.divf %909, %910 : vector<16x32xf32>
    %912 = vector.extract_strided_slice %899 {offsets = [0, 64], sizes = [16, 32], strides = [1, 1]} : vector<16x128xf32> to vector<16x32xf32>
    %913 = math.tanh %912 : vector<16x32xf32>
    %914 = vector.extract_strided_slice %899 {offsets = [0, 96], sizes = [16, 32], strides = [1, 1]} : vector<16x128xf32> to vector<16x32xf32>
    %915 = arith.negf %914 : vector<16x32xf32>
    %916 = math.exp %915 : vector<16x32xf32>
    %cst_235 = arith.constant 1.000000e+00 : f32
    %917 = vector.broadcast %cst_235 : f32 to vector<16x32xf32>
    %918 = arith.addf %917, %916 : vector<16x32xf32>
    %919 = arith.divf %917, %918 : vector<16x32xf32>
    %920 = arith.mulf %911, %866 : vector<16x32xf32>
    %921 = arith.mulf %905, %913 : vector<16x32xf32>
    %922 = arith.addf %920, %921 : vector<16x32xf32>
    %923 = math.tanh %922 : vector<16x32xf32>
    %924 = arith.mulf %919, %923 : vector<16x32xf32>
    %925 = arith.truncf %924 : vector<16x32xf32> to vector<16x32xbf16>
    %cst_236 = arith.constant dense<0.000000e+00> : vector<16x128xf32>
    %926 = tpu.matmul %925, %4, %cst_236 {dimension_numbers = #tpu.dot_dimension_numbers<[1], [0], [0], [1], [0, 0, 1, 1], [], []>} : vector<16x32xbf16>, vector<32x128xbf16>, vector<16x128xf32> -> vector<16x128xf32>
    %927 = arith.addf %926, %11 : vector<16x128xf32>
    %928 = arith.index_cast %c6_i32_230 : i32 to index
    %c0_237 = arith.constant 0 : index
    %c0_238 = arith.constant 0 : index
    %929 = vector.load %arg16[%928, %c0_237, %c0_238] : memref<8x16x128xf32, #tpu.memory_space<vmem>>, vector<1x16x128xf32>
    %930 = vector.shape_cast %929 : vector<1x16x128xf32> to vector<16x128xf32>
    %931 = vector.shape_cast %927 : vector<16x128xf32> to vector<1x16x128xf32>
    tpu.vector_store %arg16[%928, %c0_237, %c0_238], %931 {strides = array<i32>} : memref<8x16x128xf32, #tpu.memory_space<vmem>>, vector<1x16x128xf32>,
    %cst_239 = arith.constant dense<0xFF800000> : vector<16xf32>
    %932 = vector.multi_reduction <maximumf>, %927, %cst_239 [1] : vector<16x128xf32> to vector<16xf32>
    %933 = vector.shape_cast %932 : vector<16xf32> to vector<16x1xf32>
    %934 = vector.broadcast %933 : vector<16x1xf32> to vector<16x128xf32>
    %935 = arith.cmpf oeq, %927, %934 : vector<16x128xf32>
    %c128_i32_240 = arith.constant 128 : i32
    %936 = vector.broadcast %c128_i32_240 : i32 to vector<16x128xi32>
    %937 = arith.select %935, %12, %936 : vector<16x128xi1>, vector<16x128xi32>
    %cst_241 = arith.constant dense<2147483647> : vector<16xi32>
    %938 = vector.multi_reduction <minsi>, %937, %cst_241 [1] : vector<16x128xi32> to vector<16xi32>
    %939 = vector.shape_cast %938 : vector<16xi32> to vector<16x1xi32>
    %940 = arith.index_cast %c6_i32_230 : i32 to index
    %c0_242 = arith.constant 0 : index
    %c0_243 = arith.constant 0 : index
    %941 = vector.load %arg17[%940, %c0_242, %c0_243] : memref<8x16x1xi32, #tpu.memory_space<vmem>>, vector<1x16x1xi32>
    %942 = vector.shape_cast %941 : vector<1x16x1xi32> to vector<16x1xi32>
    %943 = vector.shape_cast %939 : vector<16x1xi32> to vector<1x16x1xi32>
    tpu.vector_store %arg17[%940, %c0_242, %c0_243], %943 {strides = array<i32>} : memref<8x16x1xi32, #tpu.memory_space<vmem>>, vector<1x16x1xi32>,
    %944 = vector.broadcast %939 : vector<16x1xi32> to vector<16x128xi32>
    %945 = arith.cmpi eq, %12, %944 : vector<16x128xi32>
    %946 = arith.extui %945 : vector<16x128xi1> to vector<16x128xi32>
    %947 = arith.sitofp %946 : vector<16x128xi32> to vector<16x128xf32>
    %948 = arith.truncf %947 : vector<16x128xf32> to vector<16x128xbf16>
    %cst_244 = arith.constant dense<0.000000e+00> : vector<16x16xf32>
    %949 = tpu.matmul %948, %5, %cst_244 {dimension_numbers = #tpu.dot_dimension_numbers<[1], [0], [0], [1], [0, 0, 1, 1], [], []>} : vector<16x128xbf16>, vector<128x16xbf16>, vector<16x16xf32> -> vector<16x16xf32>
    %c7_i32_245 = arith.constant 7 : i32
    %950 = arith.truncf %949 : vector<16x16xf32> to vector<16x16xbf16>
    %cst_246 = arith.constant dense<0.000000e+00> : vector<16x128xf32>
    %951 = tpu.matmul %950, %2, %cst_246 {dimension_numbers = #tpu.dot_dimension_numbers<[1], [0], [0], [1], [0, 0, 1, 1], [], []>} : vector<16x16xbf16>, vector<16x128xbf16>, vector<16x128xf32> -> vector<16x128xf32>
    %952 = arith.truncf %924 : vector<16x32xf32> to vector<16x32xbf16>
    %cst_247 = arith.constant dense<0.000000e+00> : vector<16x128xf32>
    %953 = tpu.matmul %952, %3, %cst_247 {dimension_numbers = #tpu.dot_dimension_numbers<[1], [0], [0], [1], [0, 0, 1, 1], [], []>} : vector<16x32xbf16>, vector<32x128xbf16>, vector<16x128xf32> -> vector<16x128xf32>
    %954 = arith.addf %951, %953 : vector<16x128xf32>
    %955 = arith.addf %954, %8 : vector<16x128xf32>
    %956 = vector.extract_strided_slice %955 {offsets = [0, 0], sizes = [16, 32], strides = [1, 1]} : vector<16x128xf32> to vector<16x32xf32>
    %957 = arith.negf %956 : vector<16x32xf32>
    %958 = math.exp %957 : vector<16x32xf32>
    %cst_248 = arith.constant 1.000000e+00 : f32
    %959 = vector.broadcast %cst_248 : f32 to vector<16x32xf32>
    %960 = arith.addf %959, %958 : vector<16x32xf32>
    %961 = arith.divf %959, %960 : vector<16x32xf32>
    %962 = vector.extract_strided_slice %955 {offsets = [0, 32], sizes = [16, 32], strides = [1, 1]} : vector<16x128xf32> to vector<16x32xf32>
    %963 = arith.negf %962 : vector<16x32xf32>
    %964 = math.exp %963 : vector<16x32xf32>
    %cst_249 = arith.constant 1.000000e+00 : f32
    %965 = vector.broadcast %cst_249 : f32 to vector<16x32xf32>
    %966 = arith.addf %965, %964 : vector<16x32xf32>
    %967 = arith.divf %965, %966 : vector<16x32xf32>
    %968 = vector.extract_strided_slice %955 {offsets = [0, 64], sizes = [16, 32], strides = [1, 1]} : vector<16x128xf32> to vector<16x32xf32>
    %969 = math.tanh %968 : vector<16x32xf32>
    %970 = vector.extract_strided_slice %955 {offsets = [0, 96], sizes = [16, 32], strides = [1, 1]} : vector<16x128xf32> to vector<16x32xf32>
    %971 = arith.negf %970 : vector<16x32xf32>
    %972 = math.exp %971 : vector<16x32xf32>
    %cst_250 = arith.constant 1.000000e+00 : f32
    %973 = vector.broadcast %cst_250 : f32 to vector<16x32xf32>
    %974 = arith.addf %973, %972 : vector<16x32xf32>
    %975 = arith.divf %973, %974 : vector<16x32xf32>
    %976 = arith.mulf %967, %922 : vector<16x32xf32>
    %977 = arith.mulf %961, %969 : vector<16x32xf32>
    %978 = arith.addf %976, %977 : vector<16x32xf32>
    %979 = math.tanh %978 : vector<16x32xf32>
    %980 = arith.mulf %975, %979 : vector<16x32xf32>
    %981 = arith.truncf %980 : vector<16x32xf32> to vector<16x32xbf16>
    %cst_251 = arith.constant dense<0.000000e+00> : vector<16x128xf32>
    %982 = tpu.matmul %981, %4, %cst_251 {dimension_numbers = #tpu.dot_dimension_numbers<[1], [0], [0], [1], [0, 0, 1, 1], [], []>} : vector<16x32xbf16>, vector<32x128xbf16>, vector<16x128xf32> -> vector<16x128xf32>
    %983 = arith.addf %982, %11 : vector<16x128xf32>
    %984 = arith.index_cast %c7_i32_245 : i32 to index
    %c0_252 = arith.constant 0 : index
    %c0_253 = arith.constant 0 : index
    %985 = vector.load %arg16[%984, %c0_252, %c0_253] : memref<8x16x128xf32, #tpu.memory_space<vmem>>, vector<1x16x128xf32>
    %986 = vector.shape_cast %985 : vector<1x16x128xf32> to vector<16x128xf32>
    %987 = vector.shape_cast %983 : vector<16x128xf32> to vector<1x16x128xf32>
    tpu.vector_store %arg16[%984, %c0_252, %c0_253], %987 {strides = array<i32>} : memref<8x16x128xf32, #tpu.memory_space<vmem>>, vector<1x16x128xf32>,
    %cst_254 = arith.constant dense<0xFF800000> : vector<16xf32>
    %988 = vector.multi_reduction <maximumf>, %983, %cst_254 [1] : vector<16x128xf32> to vector<16xf32>
    %989 = vector.shape_cast %988 : vector<16xf32> to vector<16x1xf32>
    %990 = vector.broadcast %989 : vector<16x1xf32> to vector<16x128xf32>
    %991 = arith.cmpf oeq, %983, %990 : vector<16x128xf32>
    %c128_i32_255 = arith.constant 128 : i32
    %992 = vector.broadcast %c128_i32_255 : i32 to vector<16x128xi32>
    %993 = arith.select %991, %12, %992 : vector<16x128xi1>, vector<16x128xi32>
    %cst_256 = arith.constant dense<2147483647> : vector<16xi32>
    %994 = vector.multi_reduction <minsi>, %993, %cst_256 [1] : vector<16x128xi32> to vector<16xi32>
    %995 = vector.shape_cast %994 : vector<16xi32> to vector<16x1xi32>
    %996 = arith.index_cast %c7_i32_245 : i32 to index
    %c0_257 = arith.constant 0 : index
    %c0_258 = arith.constant 0 : index
    %997 = vector.load %arg17[%996, %c0_257, %c0_258] : memref<8x16x1xi32, #tpu.memory_space<vmem>>, vector<1x16x1xi32>
    %998 = vector.shape_cast %997 : vector<1x16x1xi32> to vector<16x1xi32>
    %999 = vector.shape_cast %995 : vector<16x1xi32> to vector<1x16x1xi32>
    tpu.vector_store %arg17[%996, %c0_257, %c0_258], %999 {strides = array<i32>} : memref<8x16x1xi32, #tpu.memory_space<vmem>>, vector<1x16x1xi32>,
    %1000 = vector.broadcast %995 : vector<16x1xi32> to vector<16x128xi32>
    %1001 = arith.cmpi eq, %12, %1000 : vector<16x128xi32>
    %1002 = arith.extui %1001 : vector<16x128xi1> to vector<16x128xi32>
    %1003 = arith.sitofp %1002 : vector<16x128xi32> to vector<16x128xf32>
    %1004 = arith.truncf %1003 : vector<16x128xf32> to vector<16x128xbf16>
    %cst_259 = arith.constant dense<0.000000e+00> : vector<16x16xf32>
    %1005 = tpu.matmul %1004, %5, %cst_259 {dimension_numbers = #tpu.dot_dimension_numbers<[1], [0], [0], [1], [0, 0, 1, 1], [], []>} : vector<16x128xbf16>, vector<128x16xbf16>, vector<16x16xf32> -> vector<16x16xf32>
    %c8_i32_260 = arith.constant 8 : i32
    return
  }
}

</mosaic_0001>

<bundles_post_ra>
// kernel: seq2seq_forward.1
= control target key start
LH: loop header
LB: loop body
LE: loop exit
PB: predicated region body
PF: predicated region fallthrough
CT: control target
= control target key end

     0   :  { %s7920_s0 = inlined_call_operand.hbm [shape: f32[128,16], index: 0, kind: input, shape index: {}]   ;;  %s7921_s1 = inlined_call_operand.hbm [shape: bf16[16,128], index: 1, kind: input, shape index: {}]   ;;  %s7922_s2 = inlined_call_operand.hbm [shape: bf16[32,128], index: 2, kind: input, shape index: {}]   ;;  %s7923_s3 = inlined_call_operand.hbm [shape: f32[1,128], index: 3, kind: input, shape index: {}]   ;;  %s7924_s4 = inlined_call_operand.hbm [shape: bf16[16,128], index: 4, kind: input, shape index: {}]   ;;  %s7925_s5 = inlined_call_operand.hbm [shape: bf16[32,128], index: 5, kind: input, shape index: {}]   ;;  %s7926_s6 = inlined_call_operand.hbm [shape: f32[1,128], index: 6, kind: input, shape index: {}]   ;;  %s7927_s7 = inlined_call_operand.hbm [shape: bf16[128,64], index: 7, kind: input, shape index: {}]   ;;  %s7928_s8 = inlined_call_operand.hbm [shape: f32[1,64], index: 8, kind: input, shape index: {}]   ;;  %s7929_s9 = inlined_call_operand.hbm [shape: bf16[16,128], index: 9, kind: input, shape index: {}]   ;;  %s7930_s10 = inlined_call_operand.hbm [shape: bf16[32,128], index: 10, kind: input, shape index: {}]   ;;  %s7931_s11 = inlined_call_operand.hbm [shape: f32[1,128], index: 11, kind: input, shape index: {}]   ;;  %s7932_s12 = inlined_call_operand.hbm [shape: bf16[32,128], index: 12, kind: input, shape index: {}]   ;;  %s7933_s13 = inlined_call_operand.hbm [shape: f32[1,128], index: 13, kind: input, shape index: {}]   ;;  %s7934_s14 = inlined_call_operand.hbm [shape: bf16[128,16], index: 14, kind: input, shape index: {}]   ;;  %s7935_s15 = inlined_call_operand.hbm [shape: f32[16,16], index: 15, kind: input, shape index: {}]   ;;  %s7936_s16 = inlined_call_operand.hbm [shape: f32[8,16,128], index: 16, kind: output, shape index: {0}]   ;;  %s7937_s17 = inlined_call_operand.hbm [shape: s32[8,16,1], index: 17, kind: output, shape index: {1}]  }
   0x1   :  { %7942 = sst [smem:[#allocation44_spill]] %s7920_s0 }
   0x2   :  { %7943 = sst [smem:[#allocation45_spill]] %s7921_s1 }
   0x3   :  { %7944 = sst [smem:[#allocation46_spill]] %s7936_s16 }
   0x4   :  { %7945 = sst [smem:[#allocation47_spill]] %s7937_s17 }
   0x5   :  { %23 = vsyncpa [#allocation5], 0 }
   0x6   :  { %24 = vsyncpa [#allocation8], 0 }
   0x7   :  { %25 = vsyncpa [#allocation11], 0 }
   0x8   :  { %26 = vsyncpa [#allocation14], 0 }
   0x9   :  { %27 = vsyncpa [#allocation17], 0 }
   0xa   :  { %28 = vsyncpa [#allocation20], 0 }
   0xb   :  { %29 = vsyncpa [#allocation23], 0 }
   0xc   :  { %30 = vsyncpa [#allocation26], 0 }
   0xd   :  { %31 = vsyncpa [#allocation29], 0 }
   0xe   :  { %32 = vsyncpa [#allocation6], 0 }
   0xf   :  { %33 = vsyncpa [#allocation32], 0  ;;  %s6428_s24 = smov [#allocation7]   ;;  %s7946_s28 = sld [smem:[#allocation45_spill]] }
  0x10   :  { %s51_s25 = sshll.u32 %s6428_s24, 4  ;;  %s52_s25 = int_to_ptr.vmem [resolvable:$true] %s51_s25 }
  0x15   :  { %s6010_s29 = scalar_lea.hbm %s7946_s28, 128 }
  0x16   :  { %p6011_p0 = scmp.ne.s32.totalorder %s7946_s28, %s6010_s29  ;;  %p6014_p1 = scmp.lt.u32.totalorder %s6010_s29, %s7946_s28 }
  0x18   :  { %p6016_p2 = pnand %p6014_p1, %p6011_p0 }
  0x1a   :  { %6019 = shalt.err (!%p6016_p2)
}
  0x1b   :  { %s6020_s1 = scalar_lea.vmem %s52_s25, 128  ;;  %p6025_p4 = scmp.lt.s32.totalorder %s52_s25, %s52_s25 }
  0x1c   :  { %p6021_p3 = scmp.ne.s32.totalorder %s52_s25, %s6020_s1  ;;  %p6026_p5 = scmp.lt.s32.totalorder %s6020_s1, %s6020_s1 }
  0x1e   :  { %p6027_p6 = por %p6026_p5, %p6025_p4 }
  0x20   :  { %p6028_p7 = pnand %p6027_p6, %p6021_p3 }
  0x22   :  { %6031 = shalt.err (!%p6028_p7)
}
  0x23   :  { %s6429_s20 = smov 64   ;;  %s6430_s21 = smov 4  }
  0x24   :  { %57 = dma.hbm_to_vmem [thread:$0]  %s7946_s28, 128, %s52_s25, [#allocation8], %s6429_s20, %s6429_s20, %s6430_s21  }
  0x25   :  { %s6431_s24 = smov [#allocation10]   ;;  %s6432_s27 = smov [#allocation13]  }
  0x26   :  { %s76_s26 = sshll.u32 %s6431_s24, 4  ;;  %s97_s29 = sshll.u32 %s6432_s27, 4  ;;  %s77_s26 = int_to_ptr.vmem [resolvable:$true] %s76_s26  ;;  %s98_s29 = int_to_ptr.vmem [resolvable:$true] %s97_s29 }
  0x27   :  { %s6032_s18 = scalar_lea.hbm %s7923_s3, 16 }
  0x28   :  { %p6033_p8 = scmp.ne.s32.totalorder %s7923_s3, %s6032_s18  ;;  %p6036_p9 = scmp.lt.u32.totalorder %s6032_s18, %s7923_s3 }
  0x2a   :  { %p6038_p10 = pnand %p6036_p9, %p6033_p8 }
  0x2c   :  { %6041 = shalt.err (!%p6038_p10)
}
  0x2d   :  { %s6042_s25 = scalar_lea.vmem %s77_s26, 16  ;;  %s6046_s28 = scalar_lea.vmem %s77_s26, 32 }
  0x2e   :  { %p6043_p11 = scmp.ne.s32.totalorder %s77_s26, %s6042_s25  ;;  %p6047_p12 = scmp.lt.s32.totalorder %s77_s26, %s77_s26 }
  0x2f   :  { %p6048_p13 = scmp.lt.s32.totalorder %s6046_s28, %s6042_s25 }
  0x31   :  { %p6049_p0 = por %p6048_p13, %p6047_p12 }
  0x33   :  { %p6050_p1 = pnand %p6049_p0, %p6043_p11 }
  0x35   :  { %6053 = shalt.err (!%p6050_p1)
}
  0x36   :  { %79 = dma.hbm_to_vmem [thread:$0]  %s7923_s3, 16, %s77_s26, [#allocation11]  }
  0x37   :  { %s6054_s16 = scalar_lea.hbm %s7925_s5, 256 }
  0x38   :  { %p6055_p2 = scmp.ne.s32.totalorder %s7925_s5, %s6054_s16  ;;  %p6058_p3 = scmp.lt.u32.totalorder %s6054_s16, %s7925_s5 }
  0x3a   :  { %p6060_p4 = pnand %p6058_p3, %p6055_p2 }
  0x3c   :  { %6063 = shalt.err (!%p6060_p4)
}
  0x3d   :  { %s6064_s19 = scalar_lea.vmem %s98_s29, 256  ;;  %p6069_p6 = scmp.lt.s32.totalorder %s98_s29, %s98_s29 }
  0x3e   :  { %p6065_p5 = scmp.ne.s32.totalorder %s98_s29, %s6064_s19  ;;  %p6070_p7 = scmp.lt.s32.totalorder %s6064_s19, %s6064_s19 }
  0x40   :  { %p6071_p8 = por %p6070_p7, %p6069_p6 }
  0x42   :  { %p6072_p9 = pnand %p6071_p8, %p6065_p5 }
  0x44   :  { %6075 = shalt.err (!%p6072_p9)
}
  0x45   :  { %103 = dma.hbm_to_vmem [thread:$0]  %s7925_s5, 256, %s98_s29, [#allocation14], %s6429_s20, %s6429_s20, %s6430_s21  }
  0x46   :  { %s6433_s1 = smov [#allocation16]   ;;  %s6434_s28 = smov [#allocation19]  }
  0x47   :  { %s119_s25 = sshll.u32 %s6433_s1, 4  ;;  %s141_s22 = sshll.u32 %s6434_s28, 4  ;;  %s120_s25 = int_to_ptr.vmem [resolvable:$true] %s119_s25  ;;  %s142_s22 = int_to_ptr.vmem [resolvable:$true] %s141_s22 }
  0x48   :  { %s6076_s27 = scalar_lea.hbm %s7927_s7, 1024 }
  0x49   :  { %p6077_p10 = scmp.ne.s32.totalorder %s7927_s7, %s6076_s27  ;;  %p6080_p11 = scmp.lt.u32.totalorder %s6076_s27, %s7927_s7 }
  0x4b   :  { %p6082_p12 = pnand %p6080_p11, %p6077_p10 }
  0x4d   :  { %6085 = shalt.err (!%p6082_p12)
}
  0x4e   :  { %s6086_s5 = scalar_lea.vmem %s120_s25, 1024  ;;  %p6091_p0 = scmp.lt.s32.totalorder %s120_s25, %s120_s25 }
  0x4f   :  { %p6087_p13 = scmp.ne.s32.totalorder %s120_s25, %s6086_s5  ;;  %p6092_p1 = scmp.lt.s32.totalorder %s6086_s5, %s6086_s5 }
  0x51   :  { %p6093_p2 = por %p6092_p1, %p6091_p0 }
  0x53   :  { %p6094_p3 = pnand %p6093_p2, %p6087_p13 }
  0x55   :  { %6097 = shalt.err (!%p6094_p3)
}
  0x56   :  { %125 = dma.hbm_to_vmem [thread:$0]  %s7927_s7, 1024, %s120_s25, [#allocation17], %s6429_s20, %s6429_s20, %s6430_s21  }
  0x57   :  { %s6098_s26 = scalar_lea.hbm %s7929_s9, 128 }
  0x58   :  { %p6099_p4 = scmp.ne.s32.totalorder %s7929_s9, %s6098_s26  ;;  %p6102_p5 = scmp.lt.u32.totalorder %s6098_s26, %s7929_s9 }
  0x5a   :  { %p6104_p6 = pnand %p6102_p5, %p6099_p4 }
  0x5c   :  { %6107 = shalt.err (!%p6104_p6)
}
  0x5d   :  { %s6108_s27 = scalar_lea.vmem %s142_s22, 128  ;;  %p6113_p8 = scmp.lt.s32.totalorder %s142_s22, %s142_s22 }
  0x5e   :  { %p6109_p7 = scmp.ne.s32.totalorder %s142_s22, %s6108_s27  ;;  %p6114_p9 = scmp.lt.s32.totalorder %s6108_s27, %s6108_s27 }
  0x60   :  { %p6115_p10 = por %p6114_p9, %p6113_p8 }
  0x62   :  { %p6116_p11 = pnand %p6115_p10, %p6109_p7 }
  0x64   :  { %6119 = shalt.err (!%p6116_p11)
}
  0x65   :  { %147 = dma.hbm_to_vmem [thread:$0]  %s7929_s9, 128, %s142_s22, [#allocation20], %s6429_s20, %s6429_s20, %s6430_s21  }
  0x66   :  { %s6435_s16 = smov [#allocation22]   ;;  %s6436_s0 = smov [#allocation25]  }
  0x67   :  { %s166_s17 = sshll.u32 %s6435_s16, 4  ;;  %s188_s30 = sshll.u32 %s6436_s0, 4  ;;  %s167_s17 = int_to_ptr.vmem [resolvable:$true] %s166_s17  ;;  %s189_s30 = int_to_ptr.vmem [resolvable:$true] %s188_s30 }
  0x68   :  { %s6120_s18 = scalar_lea.hbm %s7931_s11, 16 }
  0x69   :  { %p6121_p12 = scmp.ne.s32.totalorder %s7931_s11, %s6120_s18  ;;  %p6124_p13 = scmp.lt.u32.totalorder %s6120_s18, %s7931_s11 }
  0x6b   :  { %p6126_p0 = pnand %p6124_p13, %p6121_p12 }
  0x6d   :  { %6129 = shalt.err (!%p6126_p0)
}
  0x6e   :  { %s6130_s9 = scalar_lea.vmem %s167_s17, 16  ;;  %s6134_s22 = scalar_lea.vmem %s167_s17, 32 }
  0x6f   :  { %p6131_p1 = scmp.ne.s32.totalorder %s167_s17, %s6130_s9  ;;  %p6135_p2 = scmp.lt.s32.totalorder %s167_s17, %s167_s17 }
  0x70   :  { %p6136_p3 = scmp.lt.s32.totalorder %s6134_s22, %s6130_s9 }
  0x72   :  { %p6137_p4 = por %p6136_p3, %p6135_p2 }
  0x74   :  { %p6138_p5 = pnand %p6137_p4, %p6131_p1 }
  0x76   :  { %6141 = shalt.err (!%p6138_p5)
}
  0x77   :  { %169 = dma.hbm_to_vmem [thread:$0]  %s7931_s11, 16, %s167_s17, [#allocation23]  }
  0x78   :  { %s6142_s7 = scalar_lea.hbm %s7933_s13, 16 }
  0x79   :  { %p6143_p6 = scmp.ne.s32.totalorder %s7933_s13, %s6142_s7  ;;  %p6146_p7 = scmp.lt.u32.totalorder %s6142_s7, %s7933_s13 }
  0x7b   :  { %p6148_p8 = pnand %p6146_p7, %p6143_p6 }
  0x7d   :  { %6151 = shalt.err (!%p6148_p8)
}
  0x7e   :  { %s6152_s29 = scalar_lea.vmem %s189_s30, 16  ;;  %s6156_s18 = scalar_lea.vmem %s189_s30, 32 }
  0x7f   :  { %p6153_p9 = scmp.ne.s32.totalorder %s189_s30, %s6152_s29  ;;  %p6157_p10 = scmp.lt.s32.totalorder %s189_s30, %s189_s30 }
  0x80   :  { %p6158_p11 = scmp.lt.s32.totalorder %s6156_s18, %s6152_s29 }
  0x82   :  { %p6159_p12 = por %p6158_p11, %p6157_p10 }
  0x84   :  { %p6160_p13 = pnand %p6159_p12, %p6153_p9 }
  0x86   :  { %6163 = shalt.err (!%p6160_p13)
}
  0x87   :  { %191 = dma.hbm_to_vmem [thread:$0]  %s7933_s13, 16, %s189_s30, [#allocation26]  }
  0x88   :  { %s6437_s19 = smov [#allocation4]   ;;  %s7947_s9 = sld [smem:[#allocation44_spill]] }
  0x89   :  { %s39_s3 = sshll.u32 %s6437_s19, 4  ;;  %s40_s3 = int_to_ptr.vmem [resolvable:$true] %s39_s3 }
  0x8e   :  { %s6164_s22 = scalar_lea.hbm %s7947_s9, 2048 }
  0x8f   :  { %p6165_p0 = scmp.ne.s32.totalorder %s7947_s9, %s6164_s22  ;;  %p6168_p1 = scmp.lt.u32.totalorder %s6164_s22, %s7947_s9 }
  0x91   :  { %p6170_p2 = pnand %p6168_p1, %p6165_p0 }
  0x93   :  { %6173 = shalt.err (!%p6170_p2)
}
  0x94   :  { %s6174_s7 = scalar_lea.vmem %s40_s3, 2048  ;;  %p6179_p4 = scmp.lt.s32.totalorder %s40_s3, %s40_s3 }
  0x95   :  { %p6175_p3 = scmp.ne.s32.totalorder %s40_s3, %s6174_s7  ;;  %p6180_p5 = scmp.lt.s32.totalorder %s6174_s7, %s6174_s7 }
  0x97   :  { %p6181_p6 = por %p6180_p5, %p6179_p4 }
  0x99   :  { %p6182_p7 = pnand %p6181_p6, %p6175_p3 }
  0x9b   :  { %6185 = shalt.err (!%p6182_p7)
}
  0x9c   :  { %s6438_s13 = smov 128   ;;  %s6439_s30 = smov 8  }
  0x9d   :  { %45 = dma.hbm_to_vmem [thread:$0]  %s7947_s9, 2048, %s40_s3, [#allocation5], %s6438_s13, %s6438_s13, %s6439_s30  }
  0x9e   :  { %s6440_s0 = smov [#allocation9]   ;;  %s6441_s29 = smov [#allocation12]  }
  0x9f   :  { %s63_s5 = sshll.u32 %s6440_s0, 4  ;;  %s85_s18 = sshll.u32 %s6441_s29, 4  ;;  %s64_s5 = int_to_ptr.vmem [resolvable:$true] %s63_s5  ;;  %s6656_s18 = int_to_ptr.vmem [resolvable:$true] %s85_s18 }
  0xa0   :  { %s6186_s19 = scalar_lea.hbm %s7922_s2, 256 }
  0xa1   :  { %p6187_p8 = scmp.ne.s32.totalorder %s7922_s2, %s6186_s19  ;;  %p6190_p9 = scmp.lt.u32.totalorder %s6186_s19, %s7922_s2 }
  0xa3   :  { %p6192_p10 = pnand %p6190_p9, %p6187_p8 }
  0xa5   :  { %6195 = shalt.err (!%p6192_p10)
}
  0xa6   :  { %s6196_s3 = scalar_lea.vmem %s64_s5, 256  ;;  %p6201_p12 = scmp.lt.s32.totalorder %s64_s5, %s64_s5 }
  0xa7   :  { %p6197_p11 = scmp.ne.s32.totalorder %s64_s5, %s6196_s3  ;;  %p6202_p13 = scmp.lt.s32.totalorder %s6196_s3, %s6196_s3 }
  0xa9   :  { %p6203_p0 = por %p6202_p13, %p6201_p12 }
  0xab   :  { %p6204_p1 = pnand %p6203_p0, %p6197_p11 }
  0xad   :  { %6207 = shalt.err (!%p6204_p1)
}
  0xae   :  { %69 = dma.hbm_to_vmem [thread:$0]  %s7922_s2, 256, %s64_s5, [#allocation8], %s6429_s20, %s6429_s20, %s6430_s21  }
  0xaf   :  { %s6208_s7 = scalar_lea.hbm %s7924_s4, 128 }
  0xb0   :  { %p6209_p2 = scmp.ne.s32.totalorder %s7924_s4, %s6208_s7  ;;  %p6212_p3 = scmp.lt.u32.totalorder %s6208_s7, %s7924_s4 }
  0xb2   :  { %p6214_p4 = pnand %p6212_p3, %p6209_p2 }
  0xb4   :  { %6217 = shalt.err (!%p6214_p4)
}
  0xb5   :  { %s6218_s11 = scalar_lea.vmem %s6656_s18, 128  ;;  %p6223_p6 = scmp.lt.s32.totalorder %s6656_s18, %s6656_s18 }
  0xb6   :  { %p6219_p5 = scmp.ne.s32.totalorder %s6656_s18, %s6218_s11  ;;  %p6224_p7 = scmp.lt.s32.totalorder %s6218_s11, %s6218_s11 }
  0xb8   :  { %p6225_p8 = por %p6224_p7, %p6223_p6 }
  0xba   :  { %p6226_p9 = pnand %p6225_p8, %p6219_p5 }
  0xbc   :  { %6229 = shalt.err (!%p6226_p9)
}
  0xbd   :  { %91 = dma.hbm_to_vmem [thread:$0]  %s7924_s4, 128, %s6656_s18, [#allocation11], %s6429_s20, %s6429_s20, %s6430_s21  }
  0xbe   :  { %s6442_s17 = smov [#allocation15]   ;;  %s6443_s26 = smov [#allocation18]  }
  0xbf   :  { %s110_s19 = sshll.u32 %s6442_s17, 4  ;;  %s132_s1 = sshll.u32 %s6443_s26, 4  ;;  %s111_s19 = int_to_ptr.vmem [resolvable:$true] %s110_s19  ;;  %s133_s1 = int_to_ptr.vmem [resolvable:$true] %s132_s1 }
  0xc0   :  { %s6230_s3 = scalar_lea.hbm %s7926_s6, 16 }
  0xc1   :  { %p6231_p10 = scmp.ne.s32.totalorder %s7926_s6, %s6230_s3  ;;  %p6234_p11 = scmp.lt.u32.totalorder %s6230_s3, %s7926_s6 }
  0xc3   :  { %p6236_p12 = pnand %p6234_p11, %p6231_p10 }
  0xc5   :  { %6239 = shalt.err (!%p6236_p12)
}
  0xc6   :  { %s6240_s4 = scalar_lea.vmem %s111_s19, 16  ;;  %s6244_s18 = scalar_lea.vmem %s111_s19, 32 }
  0xc7   :  { %p6241_p13 = scmp.ne.s32.totalorder %s111_s19, %s6240_s4  ;;  %p6245_p0 = scmp.lt.s32.totalorder %s111_s19, %s111_s19 }
  0xc8   :  { %p6246_p1 = scmp.lt.s32.totalorder %s6244_s18, %s6240_s4 }
  0xca   :  { %p6247_p2 = por %p6246_p1, %p6245_p0 }
  0xcc   :  { %p6248_p3 = pnand %p6247_p2, %p6241_p13 }
  0xce   :  { %6251 = shalt.err (!%p6248_p3)
}
  0xcf   :  { %113 = dma.hbm_to_vmem [thread:$0]  %s7926_s6, 16, %s111_s19, [#allocation14]  }
  0xd0   :  { %s6252_s29 = scalar_lea.hbm %s7928_s8, 16 }
  0xd1   :  { %p6253_p4 = scmp.ne.s32.totalorder %s7928_s8, %s6252_s29  ;;  %p6256_p5 = scmp.lt.u32.totalorder %s6252_s29, %s7928_s8 }
  0xd3   :  { %p6258_p6 = pnand %p6256_p5, %p6253_p4 }
  0xd5   :  { %6261 = shalt.err (!%p6258_p6)
}
  0xd6   :  { %s6262_s26 = scalar_lea.vmem %s133_s1, 16  ;;  %s6266_s22 = scalar_lea.vmem %s133_s1, 32 }
  0xd7   :  { %p6263_p7 = scmp.ne.s32.totalorder %s133_s1, %s6262_s26  ;;  %p6267_p8 = scmp.lt.s32.totalorder %s133_s1, %s133_s1 }
  0xd8   :  { %p6268_p9 = scmp.lt.s32.totalorder %s6266_s22, %s6262_s26 }
  0xda   :  { %p6269_p10 = por %p6268_p9, %p6267_p8 }
  0xdc   :  { %p6270_p11 = pnand %p6269_p10, %p6263_p7 }
  0xde   :  { %6273 = shalt.err (!%p6270_p11)
}
  0xdf   :  { %135 = dma.hbm_to_vmem [thread:$0]  %s7928_s8, 16, %s133_s1, [#allocation17]  }
  0xe0   :  { %s6444_s28 = smov [#allocation21]   ;;  %s6445_s9 = smov [#allocation24]  }
  0xe1   :  { %s153_s3 = sshll.u32 %s6444_s28, 4  ;;  %s175_s23 = sshll.u32 %s6445_s9, 4  ;;  %s154_s3 = int_to_ptr.vmem [resolvable:$true] %s153_s3  ;;  %s6717_s23 = int_to_ptr.vmem [resolvable:$true] %s175_s23 }
  0xe2   :  { %s6274_s4 = scalar_lea.hbm %s7930_s10, 256 }
  0xe3   :  { %p6275_p12 = scmp.ne.s32.totalorder %s7930_s10, %s6274_s4  ;;  %p6278_p13 = scmp.lt.u32.totalorder %s6274_s4, %s7930_s10 }
  0xe5   :  { %p6280_p0 = pnand %p6278_p13, %p6275_p12 }
  0xe7   :  { %6283 = shalt.err (!%p6280_p0)
}
  0xe8   :  { %s6284_s8 = scalar_lea.vmem %s154_s3, 256  ;;  %p6289_p2 = scmp.lt.s32.totalorder %s154_s3, %s154_s3 }
  0xe9   :  { %p6285_p1 = scmp.ne.s32.totalorder %s154_s3, %s6284_s8  ;;  %p6290_p3 = scmp.lt.s32.totalorder %s6284_s8, %s6284_s8 }
  0xeb   :  { %p6291_p4 = por %p6290_p3, %p6289_p2 }
  0xed   :  { %p6292_p5 = pnand %p6291_p4, %p6285_p1 }
  0xef   :  { %6295 = shalt.err (!%p6292_p5)
}
  0xf0   :  { %159 = dma.hbm_to_vmem [thread:$0]  %s7930_s10, 256, %s154_s3, [#allocation20], %s6429_s20, %s6429_s20, %s6430_s21  }
  0xf1   :  { %s6296_s2 = scalar_lea.hbm %s7932_s12, 256 }
  0xf2   :  { %p6297_p6 = scmp.ne.s32.totalorder %s7932_s12, %s6296_s2  ;;  %p6300_p7 = scmp.lt.u32.totalorder %s6296_s2, %s7932_s12 }
  0xf4   :  { %p6302_p8 = pnand %p6300_p7, %p6297_p6 }
  0xf6   :  { %6305 = shalt.err (!%p6302_p8)
}
  0xf7   :  { %s6306_s6 = scalar_lea.vmem %s6717_s23, 256  ;;  %p6311_p10 = scmp.lt.s32.totalorder %s6717_s23, %s6717_s23 }
  0xf8   :  { %p6307_p9 = scmp.ne.s32.totalorder %s6717_s23, %s6306_s6  ;;  %p6312_p11 = scmp.lt.s32.totalorder %s6306_s6, %s6306_s6 }
  0xfa   :  { %p6313_p12 = por %p6312_p11, %p6311_p10 }
  0xfc   :  { %p6314_p13 = pnand %p6313_p12, %p6307_p9 }
  0xfe   :  { %6317 = shalt.err (!%p6314_p13)
}
  0xff   :  { %181 = dma.hbm_to_vmem [thread:$0]  %s7932_s12, 256, %s6717_s23, [#allocation23], %s6429_s20, %s6429_s20, %s6430_s21  }
 0x100   :  { %s6446_s28 = smov [#allocation27]   ;;  %s6447_s9 = smov [#allocation28]  }
 0x101   :  { %s197_s3 = sshll.u32 %s6446_s28, 4  ;;  %s209_s24 = sshll.u32 %s6447_s9, 4  ;;  %s198_s3 = int_to_ptr.vmem [resolvable:$true] %s197_s3  ;;  %s6754_s24 = int_to_ptr.vmem [resolvable:$true] %s209_s24 }
 0x102   :  { %s6318_s18 = scalar_lea.hbm %s7934_s14, 1024 }
 0x103   :  { %p6319_p0 = scmp.ne.s32.totalorder %s7934_s14, %s6318_s18  ;;  %p6322_p1 = scmp.lt.u32.totalorder %s6318_s18, %s7934_s14 }
 0x105   :  { %p6324_p2 = pnand %p6322_p1, %p6319_p0 }
 0x107   :  { %6327 = shalt.err (!%p6324_p2)
}
 0x108   :  { %s6328_s12 = scalar_lea.vmem %s198_s3, 1024  ;;  %p6333_p4 = scmp.lt.s32.totalorder %s198_s3, %s198_s3 }
 0x109   :  { %p6329_p3 = scmp.ne.s32.totalorder %s198_s3, %s6328_s12  ;;  %p6334_p5 = scmp.lt.s32.totalorder %s6328_s12, %s6328_s12 }
 0x10b   :  { %p6335_p6 = por %p6334_p5, %p6333_p4 }
 0x10d   :  { %p6336_p7 = pnand %p6335_p6, %p6329_p3 }
 0x10f   :  { %6339 = shalt.err (!%p6336_p7)
}
 0x110   :  { %203 = dma.hbm_to_vmem [thread:$0]  %s7934_s14, 1024, %s198_s3, [#allocation26], %s6429_s20, %s6429_s20, %s6430_s21  }
 0x111   :  { %s6340_s11 = scalar_lea.hbm %s7935_s15, 256 }
 0x112   :  { %p6341_p8 = scmp.ne.s32.totalorder %s7935_s15, %s6340_s11  ;;  %p6344_p9 = scmp.lt.u32.totalorder %s6340_s11, %s7935_s15 }
 0x114   :  { %p6346_p10 = pnand %p6344_p9, %p6341_p8 }
 0x116   :  { %6349 = shalt.err (!%p6346_p10)
}
 0x117   :  { %s6350_s22 = scalar_lea.vmem %s6754_s24, 256  ;;  %p6355_p12 = scmp.lt.s32.totalorder %s6754_s24, %s6754_s24 }
 0x118   :  { %p6351_p11 = scmp.ne.s32.totalorder %s6754_s24, %s6350_s22  ;;  %p6356_p13 = scmp.lt.s32.totalorder %s6350_s22, %s6350_s22 }
 0x11a   :  { %p6357_p0 = por %p6356_p13, %p6355_p12 }
 0x11c   :  { %p6358_p1 = pnand %p6357_p0, %p6351_p11 }
 0x11e   :  { %6361 = shalt.err (!%p6358_p1)
}
 0x11f   :  { %215 = dma.hbm_to_vmem [thread:$0]  %s7935_s15, 256, %s6754_s24, [#allocation29], %s6438_s13, %s6438_s13, %s6439_s30  }
 0x120   :  { %6406 = dma.done.wait [#allocation5], 2048  }
 0x121   :  { %6407 = vsyncadd [#allocation5], 4294965248 }
 0x122   :  { %6408 = dma.done.wait [#allocation8], 384  }
 0x123   :  { %6409 = vsyncadd [#allocation8], 4294966912 }
 0x124   :  { %6410 = dma.done.wait [#allocation11], 144  }
 0x125   :  { %6411 = vsyncadd [#allocation11], 4294967152 }
 0x126   :  { %6412 = dma.done.wait [#allocation14], 272  }
 0x127   :  { %6413 = vsyncadd [#allocation14], 4294967024 }
 0x128   :  { %6414 = dma.done.wait [#allocation17], 1040  }
 0x129   :  { %6415 = vsyncadd [#allocation17], 4294966256 }
 0x12a   :  { %6416 = dma.done.wait [#allocation20], 384  }
 0x12b   :  { %6417 = vsyncadd [#allocation20], 4294966912 }
 0x12c   :  { %6418 = dma.done.wait [#allocation23], 272  }
 0x12d   :  { %6419 = vsyncadd [#allocation23], 4294967024 }
 0x12e   :  { %6420 = dma.done.wait [#allocation26], 1040  }
 0x12f   :  { %6421 = vsyncadd [#allocation26], 4294966256 }
 0x130   :  { %6422 = dma.done.wait [#allocation29], 256  }
 0x131   :  { %6423 = vsyncadd [#allocation29], 4294967040  ;;  %v5580_v0 = vld [vmem:[#allocation7] sm:$0xff]   ;;  %v316_v3 = vld [vmem:[#allocation4 + $0x8] sm:$0xff]  ;;  %vm354_vm0 = vcmask 130048   ;;  %v6448_v8 = vmov 0.0  }
 0x132   :  { %v5581_v1 = vld [vmem:[#allocation12] sm:$0xff]   ;;  %5033 = vmatprep.subr.bf16.mxu0 %v5580_v0  ;;  %v317_v4 = vld [vmem:[#allocation4 + $0x10] sm:$0xff]  ;;  %v6792_v9 = vld [vmem:[#allocation9] sm:$0xff]   ;;  %vm6449_vm1 = vmmov 0   ;;  %v6450_v31 = vmov 0   ;;  %s6451_s15 = smov 32  }
 0x133   :  { %v315_v2 = vld [vmem:[#allocation4] sm:$0xff]  ;;  %5051 = vmatprep.subr.bf16.mxu1 %v5581_v1  ;;  %5034 = vmatpush3.bf16.msra.mxu0 %v5580_v0  ;;  %v318_v6 = vld [vmem:[#allocation4 + $0x18] sm:$0xff]  ;;  %v320_v12 = vld [vmem:[#allocation4 + $0x28] sm:$0xff]  ;;  %vm634_vm2 = vcmask 261120   ;;  %vm2282_vm3 = vcmask 523264   ;;  %vm2285_vm4 = vcmask 785408  }
 0x134   :  { %v331_v5 = vpack.c.bf16 %v316_v3, %v315_v2  ;;  %5052 = vmatpush3.bf16.msra.mxu1 %v5581_v1  ;;  %v332_v7 = vpack.c.bf16 %v318_v6, %v317_v4  ;;  %5069 = vmatprep.subr.bf16.mxu0 %v6448_v8  ;;  %v6796_v10 = vld [vmem:[#allocation13] sm:$0xff]   ;;  %v321_v14 = vld [vmem:[#allocation4 + $0x30] sm:$0xff]  ;;  %v322_v15 = vld [vmem:[#allocation4 + $0x38] sm:$0xff]  ;;  %vm2659_vm9 = vcmask 7168  }
 0x135   :  { %v319_v11 = vld [vmem:[#allocation4 + $0x20] sm:$0xff]  ;;  %5077 = vmatprep.subr.bf16.mxu1 %v6448_v8  ;;  %v324_v17 = vld [vmem:[#allocation4 + $0x48] sm:$0xff]  ;;  %v6804_v18 = vld [vmem:[#allocation9 + $0x8] sm:$0xff]   ;;  %v334_v20 = vpack.c.bf16 %v322_v15, %v321_v14 }
 0x136   :  { %5035 = vmatprep.mubr.msk.bf16.mxu0 %vm354_vm0, %v331_v5  ;;  %5053 = vmatprep.mubr.msk.bf16.mxu1 %vm354_vm0, %v331_v5  ;;  %v333_v13 = vpack.c.bf16 %v320_v12, %v319_v11  ;;  %v323_v16 = vld [vmem:[#allocation4 + $0x40] sm:$0xff]  ;;  %v6808_v19 = vld [vmem:[#allocation13 + $0x8] sm:$0xff]   ;;  %v326_v23 = vld [vmem:[#allocation4 + $0x58] sm:$0xff] }
 0x137   :  { %5036 = vmatmul.mubr.msk.bf16.vlgmr.msra.gmra.mrb[0].mxu0 %vm354_vm0, %v332_v7  ;;  %5054 = vmatmul.mubr.msk.bf16.vlgmr.msra.gmra.mrb[0].mxu1 %vm354_vm0, %v332_v7  ;;  %v335_v21 = vpack.c.bf16 %v324_v17, %v323_v16  ;;  %v325_v22 = vld [vmem:[#allocation4 + $0x50] sm:$0xff]  ;;  %v327_v24 = vld [vmem:[#allocation4 + $0x60] sm:$0xff]  ;;  %v328_v25 = vld [vmem:[#allocation4 + $0x68] sm:$0xff] }
 0x138   :  { %5070 = vmatpush3.bf16.msra.mxu0 %v6792_v9  ;;  %5078 = vmatpush3.bf16.msra.mxu1 %v6796_v10  ;;  %v336_v26 = vpack.c.bf16 %v326_v23, %v325_v22  ;;  %v337_v27 = vpack.c.bf16 %v328_v25, %v327_v24  ;;  %v329_v28 = vld [vmem:[#allocation4 + $0x70] sm:$0xff]  ;;  %v330_v29 = vld [vmem:[#allocation4 + $0x78] sm:$0xff] }
 0x139   :  { %5039 = vmatprep.mubr.msk.bf16.mxu0 %vm354_vm0, %v333_v13  ;;  %5057 = vmatprep.mubr.msk.bf16.mxu1 %vm354_vm0, %v333_v13  ;;  %v338_v30 = vpack.c.bf16 %v330_v29, %v329_v28  ;;  %v6841_v32 = vld [vmem:[#allocation10] ss:$0 sm:$0xff]  ;;  %v6843_v33 = vld [vmem:[#allocation15] ss:$0 sm:$0xff] }
 0x13a   :  { %5071 = vmatprep.subr.bf16.mxu0 %v6448_v8  ;;  %5079 = vmatprep.subr.bf16.mxu1 %v6448_v8 }
 0x13c   :  { %5072 = vmatpush3.bf16.msra.mxu0 %v6804_v18  ;;  %5080 = vmatpush3.bf16.msra.mxu1 %v6808_v19 }
 0x13d   :  { %5085 = vmatprep.subr.bf16.mxu0 %v6448_v8  ;;  %5093 = vmatprep.subr.bf16.mxu1 %v6448_v8 }
 0x13f   :  { %5040 = vmatmul.mubr.msk.bf16.gmra.mrb[4].mxu0 %vm354_vm0, %v334_v20  ;;  %5058 = vmatmul.mubr.msk.bf16.gmra.mrb[4].mxu1 %vm354_vm0, %v334_v20 }
 0x140   :  { %5043 = vmatprep.mubr.msk.bf16.mxu0 %vm354_vm0, %v335_v21  ;;  %5061 = vmatprep.mubr.msk.bf16.mxu1 %vm354_vm0, %v335_v21 }
 0x147   :  { %5044 = vmatmul.mubr.msk.bf16.gmra.mrb[8].mxu0 %vm354_vm0, %v336_v26  ;;  %5062 = vmatmul.mubr.msk.bf16.gmra.mrb[8].mxu1 %vm354_vm0, %v336_v26 }
 0x148   :  { %5047 = vmatprep.mubr.msk.bf16.mxu0 %vm354_vm0, %v337_v27  ;;  %5065 = vmatprep.mubr.msk.bf16.mxu1 %vm354_vm0, %v337_v27 }
 0x14f   :  { %5048 = vmatmul.mubr.msk.bf16.gmra.mrb[12].mxu0 %vm354_vm0, %v338_v30  ;;  %5066 = vmatmul.mubr.msk.bf16.gmra.mrb[12].mxu1 %vm354_vm0, %v338_v30 }
 0x150   :  { %5073 = vmatprep.mubr.msk.bf16.mxu0 %vm6449_vm1, %v6448_v8  ;;  %5081 = vmatprep.mubr.msk.bf16.mxu1 %vm6449_vm1, %v6448_v8 }
 0x157   :  { %5074 = vmatmul.mubr.bf16.vlgmr.msra.gmra.mrb[16].mxu0 %v6450_v31  ;;  %5082 = vmatmul.mubr.bf16.vlgmr.msra.gmra.mrb[16].mxu1 %v6450_v31 }
 0x158   :  { %5086 = vmatpush3.bf16.msra.mxu0 %v6792_v9  ;;  %5094 = vmatpush3.bf16.msra.mxu1 %v6796_v10 }
 0x159   :  { %5087 = vmatprep.subr.bf16.mxu0 %v6448_v8  ;;  %5089 = vmatprep.mubr.msk.bf16.mxu0 %vm6449_vm1, %v6448_v8 }
 0x15a   :  { %5095 = vmatprep.subr.bf16.mxu1 %v6448_v8  ;;  %5097 = vmatprep.mubr.msk.bf16.mxu1 %vm6449_vm1, %v6448_v8 }
 0x15c   :  { %5088 = vmatpush3.bf16.msra.mxu0 %v6804_v18  ;;  %5096 = vmatpush3.bf16.msra.mxu1 %v6808_v19 }
 0x15d   :  { %5101 = vmatprep.subr.bf16.mxu0 %v6448_v8  ;;  %5109 = vmatprep.subr.bf16.mxu1 %v6448_v8 }
 0x20a   :  { %v5037_v34 = vpop.f32.mrb[0].mxu0  ;;  %v5055_v37 = vpop.f32.mrb[0].mxu1 }
 0x20b   :  { %v6846_v35 = vadd.f32 %v5037_v34, %v6841_v32  ;;  %v413_v36 = vpop.f32.mrb[1].mxu0  ;;  %v6849_v39 = vadd.f32 %v5055_v37, %v6843_v33  ;;  %v541_v40 = vpop.f32.mrb[1].mxu1 }
 0x20c   :  { %v5038_v38 = vpop.f32.mrb[2].mxu0  ;;  %v6855_v43 = vadd.f32 %v6843_v33, %v541_v40  ;;  %v5056_v44 = vpop.f32.mrb[2].mxu1  ;;  %v414_v40 = vadd.f32 %v6841_v32, %v413_v36 }
 0x20d   :  { %v6852_v41 = vadd.f32 %v5038_v38, %v6841_v32  ;;  %v416_v42 = vpop.f32.mrb[3].mxu0  ;;  %v6858_v45 = vadd.f32 %v5056_v44, %v6843_v33  ;;  %v544_v46 = vpop.f32.mrb[3].mxu1 }
 0x20e   :  { %v6861_v47 = vadd.f32 %v6843_v33, %v544_v46 }
 0x212   :  { %v5041_v48 = vpop.f32.mrb[4].mxu0  ;;  %v5059_v51 = vpop.f32.mrb[4].mxu1 }
 0x213   :  { %v6864_v49 = vadd.f32 %v5041_v48, %v6841_v32  ;;  %v429_v50 = vpop.f32.mrb[5].mxu0  ;;  %v6870_v54 = vadd.f32 %v5059_v51, %v6843_v33  ;;  %v557_v55 = vpop.f32.mrb[5].mxu1  ;;  %v417_v48 = vadd.f32 %v6841_v32, %v416_v42 }
 0x214   :  { %v6867_v52 = vadd.f32 %v6841_v32, %v429_v50  ;;  %v5042_v53 = vpop.f32.mrb[6].mxu0  ;;  %v6876_v58 = vadd.f32 %v6843_v33, %v557_v55  ;;  %v5060_v59 = vpop.f32.mrb[6].mxu1 }
 0x215   :  { %v6873_v56 = vadd.f32 %v5042_v53, %v6841_v32  ;;  %v432_v57 = vpop.f32.mrb[7].mxu0  ;;  %v6882_v61 = vadd.f32 %v5060_v59, %v6843_v33  ;;  %v560_v62 = vpop.f32.mrb[7].mxu1 }
 0x216   :  { %v6879_v60 = vadd.f32 %v6841_v32, %v432_v57  ;;  %v6885_v63 = vadd.f32 %v6843_v33, %v560_v62 }
 0x21a   :  { %v5045_v0 = vpop.f32.mrb[8].mxu0  ;;  %v5063_v3 = vpop.f32.mrb[8].mxu1 }
 0x21b   :  { %v6888_v1 = vadd.f32 %v5045_v0, %v6841_v32  ;;  %v445_v2 = vpop.f32.mrb[9].mxu0  ;;  %v6894_v6 = vadd.f32 %v5063_v3, %v6843_v33  ;;  %v573_v7 = vpop.f32.mrb[9].mxu1 }
 0x21c   :  { %v6891_v4 = vadd.f32 %v6841_v32, %v445_v2  ;;  %v5046_v5 = vpop.f32.mrb[10].mxu0  ;;  %v6900_v13 = vadd.f32 %v6843_v33, %v573_v7  ;;  %v5064_v14 = vpop.f32.mrb[10].mxu1 }
 0x21d   :  { %v6897_v11 = vadd.f32 %v5046_v5, %v6841_v32  ;;  %v448_v12 = vpop.f32.mrb[11].mxu0  ;;  %v6906_v16 = vadd.f32 %v5064_v14, %v6843_v33  ;;  %v576_v17 = vpop.f32.mrb[11].mxu1 }
 0x21e   :  { %v6903_v15 = vadd.f32 %v6841_v32, %v448_v12  ;;  %v6909_v20 = vadd.f32 %v6843_v33, %v576_v17 }
 0x222   :  { %v5049_v21 = vpop.f32.mrb[12].mxu0  ;;  %v5067_v24 = vpop.f32.mrb[12].mxu1 }
 0x223   :  { %v6912_v22 = vadd.f32 %v5049_v21, %v6841_v32  ;;  %v461_v23 = vpop.f32.mrb[13].mxu0  ;;  %v589_v27 = vpop.f32.mrb[13].mxu1  ;;  %v598_v44 = vadd.f32 %v5067_v24, %v6843_v33 }
 0x224   :  { %v6915_v25 = vadd.f32 %v6841_v32, %v461_v23  ;;  %v5050_v26 = vpop.f32.mrb[14].mxu0  ;;  %v6921_v30 = vadd.f32 %v6843_v33, %v589_v27  ;;  %v5068_v31 = vpop.f32.mrb[14].mxu1 }
 0x225   :  { %v6918_v28 = vadd.f32 %v5050_v26, %v6841_v32  ;;  %v464_v29 = vpop.f32.mrb[15].mxu0  ;;  %v592_v37 = vpop.f32.mrb[15].mxu1  ;;  %v601_v55 = vadd.f32 %v5068_v31, %v6843_v33 }
 0x226   :  { %v6924_v34 = vadd.f32 %v6841_v32, %v464_v29  ;;  %v6927_v38 = vadd.f32 %v6843_v33, %v592_v37 }
 0x22a   :  { %v672_v46 = vpop.f32.mrb[16].mxu0  ;;  %v730_v51 = vpop.f32.mrb[16].mxu1 }
 0x22b   :  { %v679_v50 = vadd.f32 %v672_v46, %v414_v40  ;;  %v5075_v53 = vpop.f32.mrb[17].mxu0  ;;  %v737_v57 = vadd.f32 %v730_v51, %v598_v44  ;;  %v5083_v59 = vpop.f32.mrb[17].mxu1 }
 0x22c   :  { %v675_v62 = vpop.f32.mrb[18].mxu0  ;;  %v733_v2 = vpop.f32.mrb[18].mxu1 }
 0x22d   :  { %v680_v0 = vadd.f32 %v675_v62, %v417_v48  ;;  %v5076_v3 = vpop.f32.mrb[19].mxu0  ;;  %5607 = vtanh.f32 %v679_v50  ;;  %v738_v5 = vadd.f32 %v733_v2, %v601_v55  ;;  %v5084_v7 = vpop.f32.mrb[19].mxu1  ;;  %v4695_v42 = vmul.f32 -1.442695, %v679_v50 }
 0x22e   :  { %5609 = vtanh.f32 %v737_v57  ;;  %v4697_v14 = vmul.f32 -1.442695, %v737_v57 }
 0x22f   :  { %5611 = vtanh.f32 %v680_v0  ;;  %v4696_v17 = vmul.f32 -1.442695, %v680_v0  ;;  %v4698_v21 = vmul.f32 -1.442695, %v738_v5 }
 0x230   :  { %5613 = vtanh.f32 %v738_v5 }
 0x231   :  { %5615 = vpow2.f32 %v4695_v42 }
 0x232   :  { %5617 = vpow2.f32 %v4697_v14 }
 0x233   :  { %5619 = vpow2.f32 %v4696_v17 }
 0x234   :  { %5621 = vpow2.f32 %v4698_v21 }
 0x237   :  { %v5608_v36 = vpop.eup %5607 }
 0x238   :  { %v5610_v12 = vpop.eup %5609  ;;  %757 = vrot.lane.b32.xlu0 %v5608_v36, %s6429_s20 }
 0x239   :  { %805 = vrot.lane.b32.xlu1 %v5610_v12, %s6429_s20  ;;  %v5612_v32 = vpop.eup %5611 }
 0x23a   :  { %v5614_v33 = vpop.eup %5613 }
 0x23b   :  { %v5616_v23 = vpop.eup %5615 }
 0x23c   :  { %759 = vrot.lane.b32.xlu0 %v5612_v32, %s6429_s20  ;;  %v745_v24 = vadd.f32 1.0, %v5616_v23  ;;  %v5618_v26 = vpop.eup %5617 }
 0x23d   :  { %807 = vrot.lane.b32.xlu1 %v5614_v33, %s6429_s20  ;;  %v5620_v27 = vpop.eup %5619  ;;  %v793_v29 = vadd.f32 1.0, %v5618_v26 }
 0x23e   :  { %5623 = vrcp.f32 %v745_v24  ;;  %v746_v31 = vadd.f32 1.0, %v5620_v27  ;;  %v5622_v37 = vpop.eup %5621 }
 0x23f   :  { %5625 = vrcp.f32 %v793_v29  ;;  %v794_v40 = vadd.f32 1.0, %v5622_v37 }
 0x240   :  { %5627 = vrcp.f32 %v746_v31 }
 0x241   :  { %5629 = vrcp.f32 %v794_v40 }
 0x248   :  { %v5624_v44 = vpop.eup %5623 }
 0x249   :  { %v5626_v51 = vpop.eup %5625  ;;  %v753_v3 = vmul.f32 0.0, %v5624_v44 }
 0x24a   :  { %v5628_v53 = vpop.eup %5627  ;;  %v801_v36 = vmul.f32 0.0, %v5626_v51 }
 0x24b   :  { %v5630_v0 = vpop.eup %5629  ;;  %v754_v32 = vmul.f32 0.0, %v5628_v53 }
 0x24c   :  { %v802_v17 = vmul.f32 0.0, %v5630_v0 }
 0x2aa   :  { %v758_v46 = vpop.permute.xlu0 %757 }
 0x2ab   :  { %v806_v48 = vpop.permute.xlu1 %805  ;;  %v763_v50 = vmul.f32 %v5624_v44, %v758_v46 }
 0x2ac   :  { %v811_v55 = vmul.f32 %v5626_v51, %v806_v48 }
 0x2ad   :  { %767 = vrot.lane.b32.xlu0 %v763_v50, %s6451_s15 }
 0x2ae   :  { %v760_v57 = vpop.permute.xlu0 %759 }
 0x2af   :  { %v764_v59 = vmul.f32 %v5628_v53, %v760_v57  ;;  %v808_v62 = vpop.permute.xlu1 %807 }
 0x2b0   :  { %v812_v2 = vmul.f32 %v5630_v0, %v808_v62 }
 0x2b1   :  { %815 = vrot.lane.b32.xlu0 %v811_v55, %s6451_s15  ;;  %769 = vrot.lane.b32.xlu1 %v764_v59, %s6451_s15 }
 0x2b5   :  { %817 = vrot.lane.b32.xlu1 %v812_v2, %s6451_s15 }
 0x31f   :  { %v768_v5 = vpop.permute.xlu0 %767 }
 0x320   :  { %v6941_v7 = vadd.f32 %v768_v5, %v753_v3 }
 0x322   :  { %5631 = vtanh.f32 %v6941_v7 }
 0x323   :  { %v816_v12 = vpop.permute.xlu0 %815  ;;  %v770_v42 = vpop.permute.xlu1 %769 }
 0x324   :  { %v6944_v33 = vadd.f32 %v816_v12, %v801_v36  ;;  %v6946_v14 = vadd.f32 %v770_v42, %v754_v32 }
 0x326   :  { %5633 = vtanh.f32 %v6944_v33 }
 0x327   :  { %5635 = vtanh.f32 %v6946_v14  ;;  %v818_v21 = vpop.permute.xlu1 %817 }
 0x328   :  { %v6950_v23 = vadd.f32 %v818_v21, %v802_v17 }
 0x32a   :  { %5637 = vtanh.f32 %v6950_v23 }
 0x32c   :  { %v5632_v24 = vpop.eup %5631 }
 0x32d   :  { %779 = vrot.lane.b32.xlu0 %v5632_v24, %s6429_s20 }
 0x330   :  { %v5634_v26 = vpop.eup %5633 }
 0x331   :  { %v5636_v27 = vpop.eup %5635  ;;  %827 = vrot.lane.b32.xlu0 %v5634_v26, %s6429_s20 }
 0x332   :  { %781 = vrot.lane.b32.xlu1 %v5636_v27, %s6429_s20 }
 0x334   :  { %v5638_v29 = vpop.eup %5637 }
 0x336   :  { %829 = vrot.lane.b32.xlu1 %v5638_v29, %s6429_s20 }
 0x39f   :  { %v780_v31 = vpop.permute.xlu0 %779 }
 0x3a0   :  { %v785_v40 = vmul.f32 %v5624_v44, %v780_v31 }
 0x3a3   :  { %v828_v48 = vpop.permute.xlu0 %827 }
 0x3a4   :  { %v782_v37 = vpop.permute.xlu1 %781  ;;  %v833_v57 = vmul.f32 %v5626_v51, %v828_v48 }
 0x3a5   :  { %v786_v46 = vmul.f32 %v5628_v53, %v782_v37 }
 0x3a7   :  { %v838_v50 = vpack.c.bf16 %v786_v46, %v785_v40 }
 0x3a8   :  { %v830_v55 = vpop.permute.xlu1 %829 }
 0x3a9   :  { %v834_v59 = vmul.f32 %v5630_v0, %v830_v55  ;;  %840 = vrot.lane.b32.xlu0 %v838_v50, %s6451_s15 }
 0x3ab   :  { %v891_v62 = vpack.c.bf16 %v834_v59, %v833_v57 }
 0x3ad   :  { %893 = vrot.lane.b32.xlu1 %v891_v62, %s6451_s15 }
 0x41b   :  { %v841_v2 = vpop.permute.xlu0 %840 }
 0x41c   :  { %5090 = vmatmul.mubr.msk.bf16.vlgmr.msra.gmra.mrb[20].mxu0 %vm634_vm2, %v841_v2 }
 0x41d   :  { %5102 = vmatpush3.bf16.msra.mxu0 %v6792_v9  ;;  %5105 = vmatprep.mubr.msk.bf16.mxu0 %vm6449_vm1, %v6448_v8 }
 0x41e   :  { %5103 = vmatprep.subr.bf16.mxu0 %v6448_v8 }
 0x41f   :  { %v894_v44 = vpop.permute.xlu1 %893 }
 0x420   :  { %5098 = vmatmul.mubr.msk.bf16.vlgmr.msra.gmra.mrb[20].mxu1 %vm634_vm2, %v894_v44 }
 0x421   :  { %5104 = vmatpush3.bf16.msra.mxu0 %v6804_v18  ;;  %5110 = vmatpush3.bf16.msra.mxu1 %v6796_v10 }
 0x422   :  { %5111 = vmatprep.subr.bf16.mxu1 %v6448_v8  ;;  %5113 = vmatprep.mubr.msk.bf16.mxu1 %vm6449_vm1, %v6448_v8 }
 0x423   :  { %5117 = vmatprep.subr.bf16.mxu0 %v6448_v8 }
 0x425   :  { %5112 = vmatpush3.bf16.msra.mxu1 %v6808_v19 }
 0x426   :  { %5125 = vmatprep.subr.bf16.mxu1 %v6448_v8 }
 0x4ef   :  { %v879_v51 = vpop.f32.mrb[20].mxu0 }
 0x4f0   :  { %v886_v53 = vadd.f32 %v879_v51, %v6846_v35  ;;  %v5091_v0 = vpop.f32.mrb[21].mxu0 }
 0x4f1   :  { %v882_v3 = vpop.f32.mrb[22].mxu0 }
 0x4f2   :  { %5639 = vtanh.f32 %v886_v53  ;;  %v887_v5 = vadd.f32 %v882_v3, %v6852_v41  ;;  %v5092_v36 = vpop.f32.mrb[23].mxu0 }
 0x4f3   :  { %v932_v12 = vpop.f32.mrb[20].mxu1 }
 0x4f4   :  { %v939_v32 = vadd.f32 %v932_v12, %v6921_v30  ;;  %v5099_v42 = vpop.f32.mrb[21].mxu1  ;;  %5641 = vtanh.f32 %v887_v5  ;;  %v4701_v30 = vmul.f32 -1.442695, %v886_v53  ;;  %v4702_v29 = vmul.f32 -1.442695, %v887_v5 }
 0x4f5   :  { %v935_v17 = vpop.f32.mrb[22].mxu1 }
 0x4f6   :  { %v940_v21 = vadd.f32 %v935_v17, %v6927_v38  ;;  %v5100_v24 = vpop.f32.mrb[23].mxu1  ;;  %5643 = vtanh.f32 %v939_v32  ;;  %v4703_v31 = vmul.f32 -1.442695, %v939_v32 }
 0x4f8   :  { %5645 = vtanh.f32 %v940_v21  ;;  %v4704_v38 = vmul.f32 -1.442695, %v940_v21 }
 0x4f9   :  { %5647 = vpow2.f32 %v4701_v30 }
 0x4fa   :  { %5649 = vpow2.f32 %v4702_v29 }
 0x4fb   :  { %5651 = vpow2.f32 %v4703_v31 }
 0x4fc   :  { %v5640_v26 = vpop.eup %5639  ;;  %5653 = vpow2.f32 %v4704_v38 }
 0x4fd   :  { %959 = vrot.lane.b32.xlu0 %v5640_v26, %s6429_s20 }
 0x4fe   :  { %v5642_v35 = vpop.eup %5641 }
 0x4ff   :  { %961 = vrot.lane.b32.xlu1 %v5642_v35, %s6429_s20 }
 0x500   :  { %v5644_v27 = vpop.eup %5643 }
 0x501   :  { %1007 = vrot.lane.b32.xlu0 %v5644_v27, %s6429_s20 }
 0x502   :  { %v5646_v41 = vpop.eup %5645 }
 0x503   :  { %1009 = vrot.lane.b32.xlu1 %v5646_v41, %s6429_s20  ;;  %v5648_v37 = vpop.eup %5647 }
 0x504   :  { %v5650_v40 = vpop.eup %5649  ;;  %v947_v46 = vadd.f32 1.0, %v5648_v37 }
 0x505   :  { %v5652_v48 = vpop.eup %5651  ;;  %v948_v50 = vadd.f32 1.0, %v5650_v40 }
 0x506   :  { %v5654_v55 = vpop.eup %5653  ;;  %5655 = vrcp.f32 %v947_v46  ;;  %v995_v57 = vadd.f32 1.0, %v5652_v48 }
 0x507   :  { %5657 = vrcp.f32 %v948_v50  ;;  %v996_v59 = vadd.f32 1.0, %v5654_v55 }
 0x508   :  { %5659 = vrcp.f32 %v995_v57 }
 0x509   :  { %5661 = vrcp.f32 %v996_v59 }
 0x510   :  { %v5656_v62 = vpop.eup %5655 }
 0x511   :  { %v5658_v51 = vpop.eup %5657  ;;  %v955_v17 = vmul.f32 %v5656_v62, %v6941_v7 }
 0x512   :  { %v5660_v3 = vpop.eup %5659  ;;  %v956_v26 = vmul.f32 %v5658_v51, %v6946_v14 }
 0x513   :  { %v5662_v12 = vpop.eup %5661  ;;  %v1003_v41 = vmul.f32 %v5660_v3, %v6944_v33 }
 0x514   :  { %v1004_v31 = vmul.f32 %v5662_v12, %v6950_v23 }
 0x56f   :  { %v960_v2 = vpop.permute.xlu0 %959 }
 0x570   :  { %v965_v44 = vmul.f32 %v5656_v62, %v960_v2 }
 0x571   :  { %v962_v53 = vpop.permute.xlu1 %961 }
 0x572   :  { %969 = vrot.lane.b32.xlu0 %v965_v44, %s6451_s15  ;;  %v966_v0 = vmul.f32 %v5658_v51, %v962_v53 }
 0x573   :  { %v1008_v5 = vpop.permute.xlu0 %1007 }
 0x574   :  { %v1013_v36 = vmul.f32 %v5660_v3, %v1008_v5  ;;  %971 = vrot.lane.b32.xlu1 %v966_v0, %s6451_s15 }
 0x575   :  { %v1010_v32 = vpop.permute.xlu1 %1009 }
 0x576   :  { %v1014_v42 = vmul.f32 %v5662_v12, %v1010_v32  ;;  %1017 = vrot.lane.b32.xlu0 %v1013_v36, %s6451_s15 }
 0x578   :  { %1019 = vrot.lane.b32.xlu1 %v1014_v42, %s6451_s15 }
 0x5e4   :  { %v970_v21 = vpop.permute.xlu0 %969 }
 0x5e5   :  { %v6986_v24 = vadd.f32 %v970_v21, %v955_v17 }
 0x5e6   :  { %v972_v35 = vpop.permute.xlu1 %971 }
 0x5e7   :  { %5663 = vtanh.f32 %v6986_v24  ;;  %v6990_v27 = vadd.f32 %v972_v35, %v956_v26 }
 0x5e8   :  { %v1018_v30 = vpop.permute.xlu0 %1017 }
 0x5e9   :  { %5665 = vtanh.f32 %v6990_v27  ;;  %v6994_v29 = vadd.f32 %v1018_v30, %v1003_v41 }
 0x5ea   :  { %v1020_v7 = vpop.permute.xlu1 %1019 }
 0x5eb   :  { %5667 = vtanh.f32 %v6994_v29  ;;  %v6998_v38 = vadd.f32 %v1020_v7, %v1004_v31 }
 0x5ed   :  { %5669 = vtanh.f32 %v6998_v38 }
 0x5f1   :  { %v5664_v14 = vpop.eup %5663 }
 0x5f2   :  { %981 = vrot.lane.b32.xlu0 %v5664_v14, %s6429_s20 }
 0x5f3   :  { %v5666_v37 = vpop.eup %5665 }
 0x5f4   :  { %983 = vrot.lane.b32.xlu1 %v5666_v37, %s6429_s20 }
 0x5f5   :  { %v5668_v33 = vpop.eup %5667 }
 0x5f6   :  { %1029 = vrot.lane.b32.xlu0 %v5668_v33, %s6429_s20 }
 0x5f7   :  { %v5670_v40 = vpop.eup %5669 }
 0x5f8   :  { %1031 = vrot.lane.b32.xlu1 %v5670_v40, %s6429_s20 }
 0x664   :  { %v982_v23 = vpop.permute.xlu0 %981 }
 0x665   :  { %v987_v48 = vmul.f32 %v5656_v62, %v982_v23 }
 0x666   :  { %v984_v46 = vpop.permute.xlu1 %983 }
 0x667   :  { %v988_v50 = vmul.f32 %v5658_v51, %v984_v46 }
 0x668   :  { %v1030_v55 = vpop.permute.xlu0 %1029 }
 0x669   :  { %v1040_v57 = vpack.c.bf16 %v988_v50, %v987_v48  ;;  %v1035_v2 = vmul.f32 %v5660_v3, %v1030_v55 }
 0x66a   :  { %v1032_v59 = vpop.permute.xlu1 %1031 }
 0x66b   :  { %v1036_v44 = vmul.f32 %v5662_v12, %v1032_v59  ;;  %1042 = vrot.lane.b32.xlu0 %v1040_v57, %s6451_s15 }
 0x66d   :  { %v1093_v53 = vpack.c.bf16 %v1036_v44, %v1035_v2 }
 0x66f   :  { %1095 = vrot.lane.b32.xlu1 %v1093_v53, %s6451_s15 }
 0x6dd   :  { %v1043_v0 = vpop.permute.xlu0 %1042 }
 0x6de   :  { %5106 = vmatmul.mubr.msk.bf16.vlgmr.msra.gmra.mrb[24].mxu0 %vm634_vm2, %v1043_v0 }
 0x6df   :  { %5118 = vmatpush3.bf16.msra.mxu0 %v6792_v9  ;;  %5121 = vmatprep.mubr.msk.bf16.mxu0 %vm6449_vm1, %v6448_v8 }
 0x6e0   :  { %5119 = vmatprep.subr.bf16.mxu0 %v6448_v8 }
 0x6e1   :  { %v1096_v62 = vpop.permute.xlu1 %1095 }
 0x6e2   :  { %5114 = vmatmul.mubr.msk.bf16.vlgmr.msra.gmra.mrb[24].mxu1 %vm634_vm2, %v1096_v62 }
 0x6e3   :  { %5120 = vmatpush3.bf16.msra.mxu0 %v6804_v18  ;;  %5126 = vmatpush3.bf16.msra.mxu1 %v6796_v10 }
 0x6e4   :  { %5127 = vmatprep.subr.bf16.mxu1 %v6448_v8  ;;  %5129 = vmatprep.mubr.msk.bf16.mxu1 %vm6449_vm1, %v6448_v8 }
 0x6e5   :  { %5133 = vmatprep.subr.bf16.mxu0 %v6448_v8 }
 0x6e7   :  { %5128 = vmatpush3.bf16.msra.mxu1 %v6808_v19 }
 0x6e8   :  { %5141 = vmatprep.subr.bf16.mxu1 %v6448_v8 }
 0x7b1   :  { %v1081_v51 = vpop.f32.mrb[24].mxu0 }
 0x7b2   :  { %v1088_v3 = vadd.f32 %v1081_v51, %v6867_v52  ;;  %v5107_v5 = vpop.f32.mrb[25].mxu0 }
 0x7b3   :  { %v1084_v36 = vpop.f32.mrb[26].mxu0 }
 0x7b4   :  { %5671 = vtanh.f32 %v1088_v3  ;;  %v1089_v12 = vadd.f32 %v1084_v36, %v6879_v60  ;;  %v5108_v32 = vpop.f32.mrb[27].mxu0 }
 0x7b5   :  { %v1134_v42 = vpop.f32.mrb[24].mxu1 }
 0x7b6   :  { %v1141_v17 = vadd.f32 %v1134_v42, %v6894_v6  ;;  %v5115_v21 = vpop.f32.mrb[25].mxu1  ;;  %5673 = vtanh.f32 %v1089_v12  ;;  %v4707_v6 = vmul.f32 -1.442695, %v1088_v3  ;;  %v4708_v7 = vmul.f32 -1.442695, %v1089_v12 }
 0x7b7   :  { %v1137_v26 = vpop.f32.mrb[26].mxu1 }
 0x7b8   :  { %v1142_v35 = vadd.f32 %v1137_v26, %v6906_v16  ;;  %v5116_v41 = vpop.f32.mrb[27].mxu1  ;;  %5675 = vtanh.f32 %v1141_v17  ;;  %v4709_v14 = vmul.f32 -1.442695, %v1141_v17 }
 0x7ba   :  { %5677 = vtanh.f32 %v1142_v35  ;;  %v4710_v16 = vmul.f32 -1.442695, %v1142_v35 }
 0x7bb   :  { %5679 = vpow2.f32 %v4707_v6 }
 0x7bc   :  { %5681 = vpow2.f32 %v4708_v7 }
 0x7bd   :  { %5683 = vpow2.f32 %v4709_v14 }
 0x7be   :  { %v5672_v30 = vpop.eup %5671  ;;  %5685 = vpow2.f32 %v4710_v16 }
 0x7bf   :  { %1161 = vrot.lane.b32.xlu0 %v5672_v30, %s6429_s20 }
 0x7c0   :  { %v5674_v52 = vpop.eup %5673 }
 0x7c1   :  { %1163 = vrot.lane.b32.xlu1 %v5674_v52, %s6429_s20 }
 0x7c2   :  { %v5676_v31 = vpop.eup %5675 }
 0x7c3   :  { %1209 = vrot.lane.b32.xlu0 %v5676_v31, %s6429_s20 }
 0x7c4   :  { %v5678_v60 = vpop.eup %5677 }
 0x7c5   :  { %1211 = vrot.lane.b32.xlu1 %v5678_v60, %s6429_s20  ;;  %v5680_v37 = vpop.eup %5679 }
 0x7c6   :  { %v5682_v33 = vpop.eup %5681  ;;  %v1149_v40 = vadd.f32 1.0, %v5680_v37 }
 0x7c7   :  { %v5684_v23 = vpop.eup %5683  ;;  %v1150_v46 = vadd.f32 1.0, %v5682_v33 }
 0x7c8   :  { %v5686_v48 = vpop.eup %5685  ;;  %5687 = vrcp.f32 %v1149_v40  ;;  %v1197_v50 = vadd.f32 1.0, %v5684_v23 }
 0x7c9   :  { %5689 = vrcp.f32 %v1150_v46  ;;  %v1198_v55 = vadd.f32 1.0, %v5686_v48 }
 0x7ca   :  { %5691 = vrcp.f32 %v1197_v50 }
 0x7cb   :  { %5693 = vrcp.f32 %v1198_v55 }
 0x7d2   :  { %v5688_v57 = vpop.eup %5687 }
 0x7d3   :  { %v5690_v44 = vpop.eup %5689  ;;  %v1157_v32 = vmul.f32 %v5688_v57, %v6986_v24 }
 0x7d4   :  { %v5692_v62 = vpop.eup %5691  ;;  %v1158_v21 = vmul.f32 %v5690_v44, %v6990_v27 }
 0x7d5   :  { %v5694_v5 = vpop.eup %5693  ;;  %v1205_v41 = vmul.f32 %v5692_v62, %v6994_v29 }
 0x7d6   :  { %v1206_v31 = vmul.f32 %v5694_v5, %v6998_v38 }
 0x831   :  { %v1162_v59 = vpop.permute.xlu0 %1161 }
 0x832   :  { %v1167_v2 = vmul.f32 %v5688_v57, %v1162_v59 }
 0x833   :  { %v1164_v53 = vpop.permute.xlu1 %1163 }
 0x834   :  { %1171 = vrot.lane.b32.xlu0 %v1167_v2, %s6451_s15  ;;  %v1168_v0 = vmul.f32 %v5690_v44, %v1164_v53 }
 0x835   :  { %v1210_v51 = vpop.permute.xlu0 %1209 }
 0x836   :  { %v1215_v3 = vmul.f32 %v5692_v62, %v1210_v51  ;;  %1173 = vrot.lane.b32.xlu1 %v1168_v0, %s6451_s15 }
 0x837   :  { %v1212_v36 = vpop.permute.xlu1 %1211 }
 0x838   :  { %v1216_v12 = vmul.f32 %v5694_v5, %v1212_v36  ;;  %1219 = vrot.lane.b32.xlu0 %v1215_v3, %s6451_s15 }
 0x83a   :  { %1221 = vrot.lane.b32.xlu1 %v1216_v12, %s6451_s15 }
 0x8a6   :  { %v1172_v42 = vpop.permute.xlu0 %1171 }
 0x8a7   :  { %v7034_v17 = vadd.f32 %v1172_v42, %v1157_v32 }
 0x8a8   :  { %v1174_v26 = vpop.permute.xlu1 %1173 }
 0x8a9   :  { %5695 = vtanh.f32 %v7034_v17  ;;  %v7038_v35 = vadd.f32 %v1174_v26, %v1158_v21 }
 0x8aa   :  { %v1220_v30 = vpop.permute.xlu0 %1219 }
 0x8ab   :  { %5697 = vtanh.f32 %v7038_v35  ;;  %v7042_v52 = vadd.f32 %v1220_v30, %v1205_v41 }
 0x8ac   :  { %v1222_v24 = vpop.permute.xlu1 %1221 }
 0x8ad   :  { %5699 = vtanh.f32 %v7042_v52  ;;  %v7046_v60 = vadd.f32 %v1222_v24, %v1206_v31 }
 0x8af   :  { %5701 = vtanh.f32 %v7046_v60 }
 0x8b3   :  { %v5696_v27 = vpop.eup %5695 }
 0x8b4   :  { %1183 = vrot.lane.b32.xlu0 %v5696_v27, %s6429_s20 }
 0x8b5   :  { %v5698_v6 = vpop.eup %5697 }
 0x8b6   :  { %1185 = vrot.lane.b32.xlu1 %v5698_v6, %s6429_s20 }
 0x8b7   :  { %v5700_v29 = vpop.eup %5699 }
 0x8b8   :  { %1231 = vrot.lane.b32.xlu0 %v5700_v29, %s6429_s20 }
 0x8b9   :  { %v5702_v7 = vpop.eup %5701 }
 0x8ba   :  { %1233 = vrot.lane.b32.xlu1 %v5702_v7, %s6429_s20 }
 0x926   :  { %v1184_v38 = vpop.permute.xlu0 %1183 }
 0x927   :  { %v1189_v16 = vmul.f32 %v5688_v57, %v1184_v38 }
 0x928   :  { %v1186_v14 = vpop.permute.xlu1 %1185 }
 0x929   :  { %v1190_v37 = vmul.f32 %v5690_v44, %v1186_v14 }
 0x92a   :  { %v1232_v33 = vpop.permute.xlu0 %1231 }
 0x92b   :  { %v1242_v40 = vpack.c.bf16 %v1190_v37, %v1189_v16  ;;  %v1237_v46 = vmul.f32 %v5692_v62, %v1232_v33 }
 0x92c   :  { %v1234_v23 = vpop.permute.xlu1 %1233 }
 0x92d   :  { %v1238_v48 = vmul.f32 %v5694_v5, %v1234_v23  ;;  %1244 = vrot.lane.b32.xlu0 %v1242_v40, %s6451_s15 }
 0x92f   :  { %v1295_v50 = vpack.c.bf16 %v1238_v48, %v1237_v46 }
 0x931   :  { %1297 = vrot.lane.b32.xlu1 %v1295_v50, %s6451_s15 }
 0x99f   :  { %v1245_v55 = vpop.permute.xlu0 %1244 }
 0x9a0   :  { %5122 = vmatmul.mubr.msk.bf16.vlgmr.msra.gmra.mrb[28].mxu0 %vm634_vm2, %v1245_v55 }
 0x9a1   :  { %5134 = vmatpush3.bf16.msra.mxu0 %v6792_v9  ;;  %5137 = vmatprep.mubr.msk.bf16.mxu0 %vm6449_vm1, %v6448_v8 }
 0x9a2   :  { %5135 = vmatprep.subr.bf16.mxu0 %v6448_v8 }
 0x9a3   :  { %v1298_v57 = vpop.permute.xlu1 %1297 }
 0x9a4   :  { %5130 = vmatmul.mubr.msk.bf16.vlgmr.msra.gmra.mrb[28].mxu1 %vm634_vm2, %v1298_v57 }
 0x9a5   :  { %5136 = vmatpush3.bf16.msra.mxu0 %v6804_v18  ;;  %5142 = vmatpush3.bf16.msra.mxu1 %v6796_v10 }
 0x9a6   :  { %5143 = vmatprep.subr.bf16.mxu1 %v6448_v8  ;;  %5145 = vmatprep.mubr.msk.bf16.mxu1 %vm6449_vm1, %v6448_v8 }
 0x9a7   :  { %5149 = vmatprep.subr.bf16.mxu0 %v6448_v8 }
 0x9a9   :  { %5144 = vmatpush3.bf16.msra.mxu1 %v6808_v19 }
 0x9aa   :  { %5157 = vmatprep.subr.bf16.mxu1 %v6448_v8 }
 0xa73   :  { %v1283_v9 = vpop.f32.mrb[28].mxu0 }
 0xa74   :  { %v1290_v59 = vadd.f32 %v1283_v9, %v6864_v49  ;;  %v5123_v2 = vpop.f32.mrb[29].mxu0 }
 0xa75   :  { %v1286_v44 = vpop.f32.mrb[30].mxu0 }
 0xa76   :  { %5703 = vtanh.f32 %v1290_v59  ;;  %v1291_v18 = vadd.f32 %v1286_v44, %v6873_v56  ;;  %v5124_v10 = vpop.f32.mrb[31].mxu0 }
 0xa77   :  { %v1336_v53 = vpop.f32.mrb[28].mxu1 }
 0xa78   :  { %v1343_v0 = vadd.f32 %v1336_v53, %v6900_v13  ;;  %v5131_v62 = vpop.f32.mrb[29].mxu1  ;;  %5705 = vtanh.f32 %v1291_v18  ;;  %v4713_v13 = vmul.f32 -1.442695, %v1290_v59  ;;  %v4714_v12 = vmul.f32 -1.442695, %v1291_v18 }
 0xa79   :  { %v1339_v51 = vpop.f32.mrb[30].mxu1 }
 0xa7a   :  { %v1344_v3 = vadd.f32 %v1339_v51, %v6909_v20  ;;  %v5132_v19 = vpop.f32.mrb[31].mxu1  ;;  %5707 = vtanh.f32 %v1343_v0  ;;  %v4715_v32 = vmul.f32 -1.442695, %v1343_v0 }
 0xa7c   :  { %5709 = vtanh.f32 %v1344_v3  ;;  %v4716_v20 = vmul.f32 -1.442695, %v1344_v3 }
 0xa7d   :  { %5711 = vpow2.f32 %v4713_v13 }
 0xa7e   :  { %5713 = vpow2.f32 %v4714_v12 }
 0xa7f   :  { %5715 = vpow2.f32 %v4715_v32 }
 0xa80   :  { %v5704_v5 = vpop.eup %5703  ;;  %5717 = vpow2.f32 %v4716_v20 }
 0xa81   :  { %1363 = vrot.lane.b32.xlu0 %v5704_v5, %s6429_s20 }
 0xa82   :  { %v5706_v49 = vpop.eup %5705 }
 0xa83   :  { %1365 = vrot.lane.b32.xlu1 %v5706_v49, %s6429_s20 }
 0xa84   :  { %v5708_v36 = vpop.eup %5707 }
 0xa85   :  { %1411 = vrot.lane.b32.xlu0 %v5708_v36, %s6429_s20 }
 0xa86   :  { %v5710_v56 = vpop.eup %5709 }
 0xa87   :  { %1413 = vrot.lane.b32.xlu1 %v5710_v56, %s6429_s20  ;;  %v5712_v42 = vpop.eup %5711 }
 0xa88   :  { %v5714_v21 = vpop.eup %5713  ;;  %v1351_v26 = vadd.f32 1.0, %v5712_v42  ;;  %v7104_v42 = vld [vmem:[#allocation9] sm:$0xff]  }
 0xa89   :  { %v5716_v41 = vpop.eup %5715  ;;  %v1352_v30 = vadd.f32 1.0, %v5714_v21 }
 0xa8a   :  { %v5718_v31 = vpop.eup %5717  ;;  %5719 = vrcp.f32 %v1351_v26  ;;  %v1399_v24 = vadd.f32 1.0, %v5716_v41  ;;  %v7111_v26 = vld [vmem:[#allocation9 + $0x8] sm:$0xff]   ;;  %v7114_v41 = vld [vmem:[#allocation13] sm:$0xff]  }
 0xa8b   :  { %5721 = vrcp.f32 %v1352_v30  ;;  %v1400_v27 = vadd.f32 1.0, %v5718_v31  ;;  %v7121_v30 = vld [vmem:[#allocation13 + $0x8] sm:$0xff]  }
 0xa8c   :  { %5723 = vrcp.f32 %v1399_v24 }
 0xa8d   :  { %5725 = vrcp.f32 %v1400_v27 }
 0xa94   :  { %v5720_v6 = vpop.eup %5719 }
 0xa95   :  { %v5722_v38 = vpop.eup %5721  ;;  %v1359_v50 = vmul.f32 %v5720_v6, %v7034_v17 }
 0xa96   :  { %v5724_v37 = vpop.eup %5723  ;;  %v1360_v9 = vmul.f32 %v5722_v38, %v7038_v35 }
 0xa97   :  { %v5726_v23 = vpop.eup %5725  ;;  %v1407_v44 = vmul.f32 %v5724_v37, %v7042_v52 }
 0xa98   :  { %v1408_v53 = vmul.f32 %v5726_v23, %v7046_v60 }
 0xaf3   :  { %v1364_v29 = vpop.permute.xlu0 %1363 }
 0xaf4   :  { %v1369_v7 = vmul.f32 %v5720_v6, %v1364_v29 }
 0xaf5   :  { %v1366_v14 = vpop.permute.xlu1 %1365 }
 0xaf6   :  { %1373 = vrot.lane.b32.xlu0 %v1369_v7, %s6451_s15  ;;  %v1370_v16 = vmul.f32 %v5722_v38, %v1366_v14 }
 0xaf7   :  { %v1412_v33 = vpop.permute.xlu0 %1411 }
 0xaf8   :  { %v1417_v40 = vmul.f32 %v5724_v37, %v1412_v33  ;;  %1375 = vrot.lane.b32.xlu1 %v1370_v16, %s6451_s15 }
 0xaf9   :  { %v1414_v46 = vpop.permute.xlu1 %1413 }
 0xafa   :  { %v1418_v48 = vmul.f32 %v5726_v23, %v1414_v46  ;;  %1421 = vrot.lane.b32.xlu0 %v1417_v40, %s6451_s15 }
 0xafc   :  { %1423 = vrot.lane.b32.xlu1 %v1418_v48, %s6451_s15 }
 0xb68   :  { %v1374_v55 = vpop.permute.xlu0 %1373 }
 0xb69   :  { %v7082_v57 = vadd.f32 %v1374_v55, %v1359_v50 }
 0xb6a   :  { %v1376_v59 = vpop.permute.xlu1 %1375 }
 0xb6b   :  { %5727 = vtanh.f32 %v7082_v57  ;;  %v7086_v2 = vadd.f32 %v1376_v59, %v1360_v9 }
 0xb6c   :  { %v1422_v18 = vpop.permute.xlu0 %1421 }
 0xb6d   :  { %5729 = vtanh.f32 %v7086_v2  ;;  %v7090_v10 = vadd.f32 %v1422_v18, %v1407_v44 }
 0xb6e   :  { %v1424_v17 = vpop.permute.xlu1 %1423 }
 0xb6f   :  { %5731 = vtanh.f32 %v7090_v10  ;;  %v7094_v0 = vadd.f32 %v1424_v17, %v1408_v53 }
 0xb71   :  { %5733 = vtanh.f32 %v7094_v0 }
 0xb75   :  { %v5728_v35 = vpop.eup %5727 }
 0xb76   :  { %1385 = vrot.lane.b32.xlu0 %v5728_v35, %s6429_s20 }
 0xb77   :  { %v5730_v62 = vpop.eup %5729 }
 0xb78   :  { %1387 = vrot.lane.b32.xlu1 %v5730_v62, %s6429_s20 }
 0xb79   :  { %v5732_v52 = vpop.eup %5731 }
 0xb7a   :  { %1433 = vrot.lane.b32.xlu0 %v5732_v52, %s6429_s20 }
 0xb7b   :  { %v5734_v51 = vpop.eup %5733 }
 0xb7c   :  { %1435 = vrot.lane.b32.xlu1 %v5734_v51, %s6429_s20 }
 0xbe8   :  { %v1386_v60 = vpop.permute.xlu0 %1385 }
 0xbe9   :  { %v1391_v19 = vmul.f32 %v5720_v6, %v1386_v60 }
 0xbea   :  { %v1388_v3 = vpop.permute.xlu1 %1387 }
 0xbeb   :  { %v1392_v5 = vmul.f32 %v5722_v38, %v1388_v3 }
 0xbec   :  { %v1434_v49 = vpop.permute.xlu0 %1433 }
 0xbed   :  { %v1444_v36 = vpack.c.bf16 %v1392_v5, %v1391_v19  ;;  %v1439_v13 = vmul.f32 %v5724_v37, %v1434_v49 }
 0xbee   :  { %v1436_v56 = vpop.permute.xlu1 %1435 }
 0xbef   :  { %v1440_v12 = vmul.f32 %v5726_v23, %v1436_v56  ;;  %1446 = vrot.lane.b32.xlu0 %v1444_v36, %s6451_s15 }
 0xbf1   :  { %v1497_v32 = vpack.c.bf16 %v1440_v12, %v1439_v13 }
 0xbf3   :  { %1499 = vrot.lane.b32.xlu1 %v1497_v32, %s6451_s15 }
 0xc61   :  { %v1447_v20 = vpop.permute.xlu0 %1446 }
 0xc62   :  { %5138 = vmatmul.mubr.msk.bf16.vlgmr.msra.gmra.mrb[32].mxu0 %vm634_vm2, %v1447_v20 }
 0xc63   :  { %5150 = vmatpush3.bf16.msra.mxu0 %v7104_v42  ;;  %5153 = vmatprep.mubr.msk.bf16.mxu0 %vm6449_vm1, %v6448_v8 }
 0xc64   :  { %5151 = vmatprep.subr.bf16.mxu0 %v6448_v8 }
 0xc65   :  { %v1500_v21 = vpop.permute.xlu1 %1499 }
 0xc66   :  { %5146 = vmatmul.mubr.msk.bf16.vlgmr.msra.gmra.mrb[32].mxu1 %vm634_vm2, %v1500_v21 }
 0xc67   :  { %5152 = vmatpush3.bf16.msra.mxu0 %v7111_v26  ;;  %5158 = vmatpush3.bf16.msra.mxu1 %v7114_v41 }
 0xc68   :  { %5159 = vmatprep.subr.bf16.mxu1 %v6448_v8  ;;  %5161 = vmatprep.mubr.msk.bf16.mxu1 %vm6449_vm1, %v6448_v8 }
 0xc69   :  { %5165 = vmatprep.subr.bf16.mxu0 %v6448_v8 }
 0xc6b   :  { %5160 = vmatpush3.bf16.msra.mxu1 %v7121_v30 }
 0xc6c   :  { %5173 = vmatprep.subr.bf16.mxu1 %v6448_v8 }
 0xd35   :  { %v1485_v31 = vpop.f32.mrb[32].mxu0 }
 0xd36   :  { %v1492_v24 = vadd.f32 %v1485_v31, %v6891_v4  ;;  %v5139_v27 = vpop.f32.mrb[33].mxu0 }
 0xd37   :  { %v1488_v6 = vpop.f32.mrb[34].mxu0 }
 0xd38   :  { %5735 = vtanh.f32 %v1492_v24  ;;  %v1493_v29 = vadd.f32 %v1488_v6, %v6903_v15  ;;  %v5140_v7 = vpop.f32.mrb[35].mxu0 }
 0xd39   :  { %v1538_v38 = vpop.f32.mrb[32].mxu1 }
 0xd3a   :  { %v1545_v14 = vadd.f32 %v1538_v38, %v6870_v54  ;;  %v5147_v16 = vpop.f32.mrb[33].mxu1  ;;  %5737 = vtanh.f32 %v1493_v29  ;;  %v4719_v54 = vmul.f32 -1.442695, %v1492_v24  ;;  %v4720_v48 = vmul.f32 -1.442695, %v1493_v29 }
 0xd3b   :  { %v1541_v37 = vpop.f32.mrb[34].mxu1 }
 0xd3c   :  { %v1546_v33 = vadd.f32 %v1541_v37, %v6882_v61  ;;  %v5148_v40 = vpop.f32.mrb[35].mxu1  ;;  %5739 = vtanh.f32 %v1545_v14  ;;  %v4721_v50 = vmul.f32 -1.442695, %v1545_v14 }
 0xd3e   :  { %5741 = vtanh.f32 %v1546_v33  ;;  %v4722_v61 = vmul.f32 -1.442695, %v1546_v33 }
 0xd3f   :  { %5743 = vpow2.f32 %v4719_v54 }
 0xd40   :  { %5745 = vpow2.f32 %v4720_v48 }
 0xd41   :  { %5747 = vpow2.f32 %v4721_v50 }
 0xd42   :  { %v5736_v23 = vpop.eup %5735  ;;  %5749 = vpow2.f32 %v4722_v61 }
 0xd43   :  { %1565 = vrot.lane.b32.xlu0 %v5736_v23, %s6429_s20 }
 0xd44   :  { %v5738_v4 = vpop.eup %5737 }
 0xd45   :  { %1567 = vrot.lane.b32.xlu1 %v5738_v4, %s6429_s20 }
 0xd46   :  { %v5740_v46 = vpop.eup %5739 }
 0xd47   :  { %1613 = vrot.lane.b32.xlu0 %v5740_v46, %s6429_s20 }
 0xd48   :  { %v5742_v15 = vpop.eup %5741 }
 0xd49   :  { %1615 = vrot.lane.b32.xlu1 %v5742_v15, %s6429_s20  ;;  %v5744_v55 = vpop.eup %5743 }
 0xd4a   :  { %v5746_v9 = vpop.eup %5745  ;;  %v1553_v59 = vadd.f32 1.0, %v5744_v55 }
 0xd4b   :  { %v5748_v44 = vpop.eup %5747  ;;  %v1554_v18 = vadd.f32 1.0, %v5746_v9 }
 0xd4c   :  { %v5750_v53 = vpop.eup %5749  ;;  %5751 = vrcp.f32 %v1553_v59  ;;  %v1601_v17 = vadd.f32 1.0, %v5748_v44 }
 0xd4d   :  { %5753 = vrcp.f32 %v1554_v18  ;;  %v1602_v35 = vadd.f32 1.0, %v5750_v53 }
 0xd4e   :  { %5755 = vrcp.f32 %v1601_v17 }
 0xd4f   :  { %5757 = vrcp.f32 %v1602_v35 }
 0xd56   :  { %v5752_v62 = vpop.eup %5751 }
 0xd57   :  { %v5754_v60 = vpop.eup %5753  ;;  %v1561_v32 = vmul.f32 %v5752_v62, %v7082_v57 }
 0xd58   :  { %v5756_v5 = vpop.eup %5755  ;;  %v1562_v31 = vmul.f32 %v5754_v60, %v7086_v2 }
 0xd59   :  { %v5758_v56 = vpop.eup %5757  ;;  %v1609_v6 = vmul.f32 %v5756_v5, %v7090_v10 }
 0xd5a   :  { %v1610_v38 = vmul.f32 %v5758_v56, %v7094_v0 }
 0xdb5   :  { %v1566_v52 = vpop.permute.xlu0 %1565 }
 0xdb6   :  { %v1571_v51 = vmul.f32 %v5752_v62, %v1566_v52 }
 0xdb7   :  { %v1568_v3 = vpop.permute.xlu1 %1567 }
 0xdb8   :  { %1575 = vrot.lane.b32.xlu0 %v1571_v51, %s6451_s15  ;;  %v1572_v19 = vmul.f32 %v5754_v60, %v1568_v3 }
 0xdb9   :  { %v1614_v49 = vpop.permute.xlu0 %1613 }
 0xdba   :  { %v1619_v36 = vmul.f32 %v5756_v5, %v1614_v49  ;;  %1577 = vrot.lane.b32.xlu1 %v1572_v19, %s6451_s15 }
 0xdbb   :  { %v1616_v13 = vpop.permute.xlu1 %1615 }
 0xdbc   :  { %v1620_v12 = vmul.f32 %v5758_v56, %v1616_v13  ;;  %1623 = vrot.lane.b32.xlu0 %v1619_v36, %s6451_s15 }
 0xdbe   :  { %1625 = vrot.lane.b32.xlu1 %v1620_v12, %s6451_s15 }
 0xe2a   :  { %v1576_v20 = vpop.permute.xlu0 %1575 }
 0xe2b   :  { %v7138_v21 = vadd.f32 %v1576_v20, %v1561_v32 }
 0xe2c   :  { %v1578_v24 = vpop.permute.xlu1 %1577 }
 0xe2d   :  { %5759 = vtanh.f32 %v7138_v21  ;;  %v7142_v27 = vadd.f32 %v1578_v24, %v1562_v31 }
 0xe2e   :  { %v1624_v29 = vpop.permute.xlu0 %1623 }
 0xe2f   :  { %5761 = vtanh.f32 %v7142_v27  ;;  %v7146_v7 = vadd.f32 %v1624_v29, %v1609_v6 }
 0xe30   :  { %v1626_v57 = vpop.permute.xlu1 %1625 }
 0xe31   :  { %5763 = vtanh.f32 %v7146_v7  ;;  %v7150_v14 = vadd.f32 %v1626_v57, %v1610_v38 }
 0xe33   :  { %5765 = vtanh.f32 %v7150_v14 }
 0xe37   :  { %v5760_v2 = vpop.eup %5759 }
 0xe38   :  { %1587 = vrot.lane.b32.xlu0 %v5760_v2, %s6429_s20 }
 0xe39   :  { %v5762_v16 = vpop.eup %5761 }
 0xe3a   :  { %1589 = vrot.lane.b32.xlu1 %v5762_v16, %s6429_s20 }
 0xe3b   :  { %v5764_v10 = vpop.eup %5763 }
 0xe3c   :  { %1635 = vrot.lane.b32.xlu0 %v5764_v10, %s6429_s20 }
 0xe3d   :  { %v5766_v37 = vpop.eup %5765 }
 0xe3e   :  { %1637 = vrot.lane.b32.xlu1 %v5766_v37, %s6429_s20 }
 0xeaa   :  { %v1588_v0 = vpop.permute.xlu0 %1587 }
 0xeab   :  { %v1593_v40 = vmul.f32 %v5752_v62, %v1588_v0 }
 0xeac   :  { %v1590_v33 = vpop.permute.xlu1 %1589 }
 0xead   :  { %v1594_v23 = vmul.f32 %v5754_v60, %v1590_v33 }
 0xeae   :  { %v1636_v4 = vpop.permute.xlu0 %1635 }
 0xeaf   :  { %v1646_v46 = vpack.c.bf16 %v1594_v23, %v1593_v40  ;;  %v1641_v54 = vmul.f32 %v5756_v5, %v1636_v4 }
 0xeb0   :  { %v1638_v15 = vpop.permute.xlu1 %1637 }
 0xeb1   :  { %v1642_v48 = vmul.f32 %v5758_v56, %v1638_v15  ;;  %1648 = vrot.lane.b32.xlu0 %v1646_v46, %s6451_s15 }
 0xeb3   :  { %v1699_v50 = vpack.c.bf16 %v1642_v48, %v1641_v54 }
 0xeb5   :  { %1701 = vrot.lane.b32.xlu1 %v1699_v50, %s6451_s15 }
 0xf23   :  { %v1649_v61 = vpop.permute.xlu0 %1648 }
 0xf24   :  { %5154 = vmatmul.mubr.msk.bf16.vlgmr.msra.gmra.mrb[36].mxu0 %vm634_vm2, %v1649_v61 }
 0xf25   :  { %5166 = vmatpush3.bf16.msra.mxu0 %v7104_v42  ;;  %5169 = vmatprep.mubr.msk.bf16.mxu0 %vm6449_vm1, %v6448_v8 }
 0xf26   :  { %5167 = vmatprep.subr.bf16.mxu0 %v6448_v8 }
 0xf27   :  { %v1702_v55 = vpop.permute.xlu1 %1701 }
 0xf28   :  { %5162 = vmatmul.mubr.msk.bf16.vlgmr.msra.gmra.mrb[36].mxu1 %vm634_vm2, %v1702_v55 }
 0xf29   :  { %5168 = vmatpush3.bf16.msra.mxu0 %v7111_v26  ;;  %5174 = vmatpush3.bf16.msra.mxu1 %v7114_v41 }
 0xf2a   :  { %5175 = vmatprep.subr.bf16.mxu1 %v6448_v8  ;;  %5177 = vmatprep.mubr.msk.bf16.mxu1 %vm6449_vm1, %v6448_v8 }
 0xf2b   :  { %5181 = vmatprep.subr.bf16.mxu0 %v6448_v8 }
 0xf2d   :  { %5176 = vmatpush3.bf16.msra.mxu1 %v7121_v30 }
 0xf2e   :  { %5189 = vmatprep.subr.bf16.mxu1 %v6448_v8 }
 0xff7   :  { %v1687_v9 = vpop.f32.mrb[36].mxu0 }
 0xff8   :  { %v1694_v59 = vadd.f32 %v1687_v9, %v6888_v1  ;;  %v5155_v44 = vpop.f32.mrb[37].mxu0 }
 0xff9   :  { %v1690_v18 = vpop.f32.mrb[38].mxu0 }
 0xffa   :  { %5767 = vtanh.f32 %v1694_v59  ;;  %v1695_v53 = vadd.f32 %v1690_v18, %v6897_v11  ;;  %v5156_v17 = vpop.f32.mrb[39].mxu0 }
 0xffb   :  { %v1740_v35 = vpop.f32.mrb[36].mxu1 }
 0xffc   :  { %v1747_v62 = vadd.f32 %v1740_v35, %v6876_v58  ;;  %v5163_v52 = vpop.f32.mrb[37].mxu1  ;;  %5769 = vtanh.f32 %v1695_v53  ;;  %v4725_v58 = vmul.f32 -1.442695, %v1694_v59  ;;  %v4726_v49 = vmul.f32 -1.442695, %v1695_v53 }
 0xffd   :  { %v1743_v51 = vpop.f32.mrb[38].mxu1 }
 0xffe   :  { %v1748_v60 = vadd.f32 %v1743_v51, %v6885_v63  ;;  %v5164_v3 = vpop.f32.mrb[39].mxu1  ;;  %5771 = vtanh.f32 %v1747_v62  ;;  %v4727_v36 = vmul.f32 -1.442695, %v1747_v62 }
0x1000   :  { %5773 = vtanh.f32 %v1748_v60  ;;  %v4728_v63 = vmul.f32 -1.442695, %v1748_v60 }
0x1001   :  { %5775 = vpow2.f32 %v4725_v58 }
0x1002   :  { %5777 = vpow2.f32 %v4726_v49 }
0x1003   :  { %5779 = vpow2.f32 %v4727_v36 }
0x1004   :  { %v5768_v19 = vpop.eup %5767  ;;  %5781 = vpow2.f32 %v4728_v63 }
0x1005   :  { %1767 = vrot.lane.b32.xlu0 %v5768_v19, %s6429_s20 }
0x1006   :  { %v5770_v1 = vpop.eup %5769 }
0x1007   :  { %1769 = vrot.lane.b32.xlu1 %v5770_v1, %s6429_s20 }
0x1008   :  { %v5772_v5 = vpop.eup %5771 }
0x1009   :  { %1815 = vrot.lane.b32.xlu0 %v5772_v5, %s6429_s20 }
0x100a   :  { %v5774_v11 = vpop.eup %5773 }
0x100b   :  { %1817 = vrot.lane.b32.xlu1 %v5774_v11, %s6429_s20  ;;  %v5776_v56 = vpop.eup %5775 }
0x100c   :  { %v5778_v13 = vpop.eup %5777  ;;  %v1755_v12 = vadd.f32 1.0, %v5776_v56 }
0x100d   :  { %v5780_v32 = vpop.eup %5779  ;;  %v1756_v20 = vadd.f32 1.0, %v5778_v13 }
0x100e   :  { %v5782_v31 = vpop.eup %5781  ;;  %5783 = vrcp.f32 %v1755_v12  ;;  %v1803_v24 = vadd.f32 1.0, %v5780_v32 }
0x100f   :  { %5785 = vrcp.f32 %v1756_v20  ;;  %v1804_v6 = vadd.f32 1.0, %v5782_v31 }
0x1010   :  { %5787 = vrcp.f32 %v1803_v24 }
0x1011   :  { %5789 = vrcp.f32 %v1804_v6 }
0x1018   :  { %v5784_v29 = vpop.eup %5783 }
0x1019   :  { %v5786_v2 = vpop.eup %5785  ;;  %v1763_v46 = vmul.f32 %v5784_v29, %v7138_v21 }
0x101a   :  { %v5788_v37 = vpop.eup %5787  ;;  %v1764_v48 = vmul.f32 %v5786_v2, %v7142_v27 }
0x101b   :  { %v5790_v40 = vpop.eup %5789  ;;  %v1811_v55 = vmul.f32 %v5788_v37, %v7146_v7 }
0x101c   :  { %v1812_v44 = vmul.f32 %v5790_v40, %v7150_v14 }
0x1077   :  { %v1768_v38 = vpop.permute.xlu0 %1767 }
0x1078   :  { %v1773_v57 = vmul.f32 %v5784_v29, %v1768_v38 }
0x1079   :  { %v1770_v16 = vpop.permute.xlu1 %1769 }
0x107a   :  { %1777 = vrot.lane.b32.xlu0 %v1773_v57, %s6451_s15  ;;  %v1774_v10 = vmul.f32 %v5786_v2, %v1770_v16 }
0x107b   :  { %v1816_v0 = vpop.permute.xlu0 %1815 }
0x107c   :  { %v1821_v33 = vmul.f32 %v5788_v37, %v1816_v0  ;;  %1779 = vrot.lane.b32.xlu1 %v1774_v10, %s6451_s15 }
0x107d   :  { %v1818_v23 = vpop.permute.xlu1 %1817 }
0x107e   :  { %v1822_v4 = vmul.f32 %v5790_v40, %v1818_v23  ;;  %1825 = vrot.lane.b32.xlu0 %v1821_v33, %s6451_s15 }
0x1080   :  { %1827 = vrot.lane.b32.xlu1 %v1822_v4, %s6451_s15 }
0x10ec   :  { %v1778_v15 = vpop.permute.xlu0 %1777 }
0x10ed   :  { %v7186_v54 = vadd.f32 %v1778_v15, %v1763_v46 }
0x10ee   :  { %v1780_v50 = vpop.permute.xlu1 %1779 }
0x10ef   :  { %5791 = vtanh.f32 %v7186_v54  ;;  %v7190_v61 = vadd.f32 %v1780_v50, %v1764_v48 }
0x10f0   :  { %v1826_v9 = vpop.permute.xlu0 %1825 }
0x10f1   :  { %5793 = vtanh.f32 %v7190_v61  ;;  %v7194_v59 = vadd.f32 %v1826_v9, %v1811_v55 }
0x10f2   :  { %v1828_v21 = vpop.permute.xlu1 %1827 }
0x10f3   :  { %5795 = vtanh.f32 %v7194_v59  ;;  %v7198_v18 = vadd.f32 %v1828_v21, %v1812_v44 }
0x10f5   :  { %5797 = vtanh.f32 %v7198_v18 }
0x10f9   :  { %v5792_v27 = vpop.eup %5791 }
0x10fa   :  { %1789 = vrot.lane.b32.xlu0 %v5792_v27, %s6429_s20 }
0x10fb   :  { %v5794_v53 = vpop.eup %5793 }
0x10fc   :  { %1791 = vrot.lane.b32.xlu1 %v5794_v53, %s6429_s20 }
0x10fd   :  { %v5796_v7 = vpop.eup %5795 }
0x10fe   :  { %1837 = vrot.lane.b32.xlu0 %v5796_v7, %s6429_s20 }
0x10ff   :  { %v5798_v17 = vpop.eup %5797 }
0x1100   :  { %1839 = vrot.lane.b32.xlu1 %v5798_v17, %s6429_s20 }
0x116c   :  { %v1790_v14 = vpop.permute.xlu0 %1789 }
0x116d   :  { %v1795_v62 = vmul.f32 %v5784_v29, %v1790_v14 }
0x116e   :  { %v1792_v35 = vpop.permute.xlu1 %1791 }
0x116f   :  { %v1796_v52 = vmul.f32 %v5786_v2, %v1792_v35 }
0x1170   :  { %v1838_v51 = vpop.permute.xlu0 %1837 }
0x1171   :  { %v1848_v60 = vpack.c.bf16 %v1796_v52, %v1795_v62  ;;  %v1843_v19 = vmul.f32 %v5788_v37, %v1838_v51 }
0x1172   :  { %v1840_v3 = vpop.permute.xlu1 %1839 }
0x1173   :  { %v1844_v1 = vmul.f32 %v5790_v40, %v1840_v3  ;;  %1850 = vrot.lane.b32.xlu0 %v1848_v60, %s6451_s15 }
0x1175   :  { %v1901_v5 = vpack.c.bf16 %v1844_v1, %v1843_v19 }
0x1177   :  { %1903 = vrot.lane.b32.xlu1 %v1901_v5, %s6451_s15 }
0x11e5   :  { %v1851_v11 = vpop.permute.xlu0 %1850 }
0x11e6   :  { %5170 = vmatmul.mubr.msk.bf16.vlgmr.msra.gmra.mrb[40].mxu0 %vm634_vm2, %v1851_v11 }
0x11e7   :  { %5182 = vmatpush3.bf16.msra.mxu0 %v7104_v42  ;;  %5185 = vmatprep.mubr.msk.bf16.mxu0 %vm6449_vm1, %v6448_v8 }
0x11e8   :  { %5183 = vmatprep.subr.bf16.mxu0 %v6448_v8 }
0x11e9   :  { %v1904_v58 = vpop.permute.xlu1 %1903 }
0x11ea   :  { %5178 = vmatmul.mubr.msk.bf16.vlgmr.msra.gmra.mrb[40].mxu1 %vm634_vm2, %v1904_v58 }
0x11eb   :  { %5184 = vmatpush3.bf16.msra.mxu0 %v7111_v26  ;;  %5190 = vmatpush3.bf16.msra.mxu1 %v7114_v41 }
0x11ec   :  { %5191 = vmatprep.subr.bf16.mxu1 %v6448_v8  ;;  %5193 = vmatprep.mubr.msk.bf16.mxu1 %vm6449_vm1, %v6448_v8 }
0x11ed   :  { %5197 = vmatprep.subr.bf16.mxu0 %v6448_v8 }
0x11ef   :  { %5192 = vmatpush3.bf16.msra.mxu1 %v7121_v30 }
0x11f0   :  { %5217 = vmatprep.subr.bf16.mxu1 %v6448_v8 }
0x12b9   :  { %v1889_v42 = vpop.f32.mrb[40].mxu0 }
0x12ba   :  { %v1896_v49 = vadd.f32 %v1889_v42, %v6915_v25  ;;  %v5171_v36 = vpop.f32.mrb[41].mxu0 }
0x12bb   :  { %v1892_v63 = vpop.f32.mrb[42].mxu0 }
0x12bc   :  { %5799 = vtanh.f32 %v1896_v49  ;;  %v1897_v26 = vadd.f32 %v1892_v63, %v6924_v34  ;;  %v5172_v41 = vpop.f32.mrb[43].mxu0 }
0x12bd   :  { %v1942_v56 = vpop.f32.mrb[40].mxu1 }
0x12be   :  { %v1949_v13 = vadd.f32 %v1942_v56, %v6849_v39  ;;  %v5179_v12 = vpop.f32.mrb[41].mxu1  ;;  %5801 = vtanh.f32 %v1897_v26  ;;  %v4731_v39 = vmul.f32 -1.442695, %v1896_v49  ;;  %v4732_v6 = vmul.f32 -1.442695, %v1897_v26 }
0x12bf   :  { %v1945_v32 = vpop.f32.mrb[42].mxu1 }
0x12c0   :  { %v1950_v20 = vadd.f32 %v1945_v32, %v6858_v45  ;;  %v5180_v30 = vpop.f32.mrb[43].mxu1  ;;  %5803 = vtanh.f32 %v1949_v13  ;;  %v4733_v29 = vmul.f32 -1.442695, %v1949_v13 }
0x12c2   :  { %5805 = vtanh.f32 %v1950_v20  ;;  %v4734_v45 = vmul.f32 -1.442695, %v1950_v20 }
0x12c3   :  { %5807 = vpow2.f32 %v4731_v39 }
0x12c4   :  { %5809 = vpow2.f32 %v4732_v6 }
0x12c5   :  { %5811 = vpow2.f32 %v4733_v29 }
0x12c6   :  { %v5800_v31 = vpop.eup %5799  ;;  %5813 = vpow2.f32 %v4734_v45 }
0x12c7   :  { %1969 = vrot.lane.b32.xlu0 %v5800_v31, %s6429_s20 }
0x12c8   :  { %v5802_v25 = vpop.eup %5801 }
0x12c9   :  { %1971 = vrot.lane.b32.xlu1 %v5802_v25, %s6429_s20 }
0x12ca   :  { %v5804_v24 = vpop.eup %5803 }
0x12cb   :  { %2017 = vrot.lane.b32.xlu0 %v5804_v24, %s6429_s20 }
0x12cc   :  { %v5806_v34 = vpop.eup %5805 }
0x12cd   :  { %2019 = vrot.lane.b32.xlu1 %v5806_v34, %s6429_s20  ;;  %v5808_v38 = vpop.eup %5807 }
0x12ce   :  { %v5810_v57 = vpop.eup %5809  ;;  %v1957_v2 = vadd.f32 1.0, %v5808_v38 }
0x12cf   :  { %v5812_v16 = vpop.eup %5811  ;;  %v1958_v10 = vadd.f32 1.0, %v5810_v57 }
0x12d0   :  { %v5814_v37 = vpop.eup %5813  ;;  %5815 = vrcp.f32 %v1957_v2  ;;  %v2005_v0 = vadd.f32 1.0, %v5812_v16 }
0x12d1   :  { %5817 = vrcp.f32 %v1958_v10  ;;  %v2006_v33 = vadd.f32 1.0, %v5814_v37 }
0x12d2   :  { %5819 = vrcp.f32 %v2005_v0 }
0x12d3   :  { %5821 = vrcp.f32 %v2006_v33 }
0x12da   :  { %v5816_v40 = vpop.eup %5815 }
0x12db   :  { %v5818_v46 = vpop.eup %5817  ;;  %v1965_v53 = vmul.f32 %v5816_v40, %v7186_v54 }
0x12dc   :  { %v5820_v50 = vpop.eup %5819  ;;  %v1966_v14 = vmul.f32 %v5818_v46, %v7190_v61 }
0x12dd   :  { %v5822_v44 = vpop.eup %5821  ;;  %v2013_v52 = vmul.f32 %v5820_v50, %v7194_v59 }
0x12de   :  { %v2014_v3 = vmul.f32 %v5822_v44, %v7198_v18 }
0x1339   :  { %v1970_v23 = vpop.permute.xlu0 %1969 }
0x133a   :  { %v1975_v4 = vmul.f32 %v5816_v40, %v1970_v23 }
0x133b   :  { %v1972_v15 = vpop.permute.xlu1 %1971 }
0x133c   :  { %1979 = vrot.lane.b32.xlu0 %v1975_v4, %s6451_s15  ;;  %v1976_v48 = vmul.f32 %v5818_v46, %v1972_v15 }
0x133d   :  { %v2018_v55 = vpop.permute.xlu0 %2017 }
0x133e   :  { %v2023_v9 = vmul.f32 %v5820_v50, %v2018_v55  ;;  %1981 = vrot.lane.b32.xlu1 %v1976_v48, %s6451_s15 }
0x133f   :  { %v2020_v21 = vpop.permute.xlu1 %2019 }
0x1340   :  { %v2024_v27 = vmul.f32 %v5822_v44, %v2020_v21  ;;  %2027 = vrot.lane.b32.xlu0 %v2023_v9, %s6451_s15 }
0x1342   :  { %2029 = vrot.lane.b32.xlu1 %v2024_v27, %s6451_s15 }
0x13ae   :  { %v1980_v7 = vpop.permute.xlu0 %1979 }
0x13af   :  { %v7234_v17 = vadd.f32 %v1980_v7, %v1965_v53 }
0x13b0   :  { %v1982_v35 = vpop.permute.xlu1 %1981 }
0x13b1   :  { %5823 = vtanh.f32 %v7234_v17  ;;  %v7238_v62 = vadd.f32 %v1982_v35, %v1966_v14 }
0x13b2   :  { %v2028_v51 = vpop.permute.xlu0 %2027 }
0x13b3   :  { %5825 = vtanh.f32 %v7238_v62  ;;  %v7242_v60 = vadd.f32 %v2028_v51, %v2013_v52 }
0x13b4   :  { %v2030_v54 = vpop.permute.xlu1 %2029 }
0x13b5   :  { %5827 = vtanh.f32 %v7242_v60  ;;  %v7246_v19 = vadd.f32 %v2030_v54, %v2014_v3 }
0x13b7   :  { %5829 = vtanh.f32 %v7246_v19 }
0x13bb   :  { %v5824_v61 = vpop.eup %5823 }
0x13bc   :  { %1991 = vrot.lane.b32.xlu0 %v5824_v61, %s6429_s20 }
0x13bd   :  { %v5826_v1 = vpop.eup %5825 }
0x13be   :  { %1993 = vrot.lane.b32.xlu1 %v5826_v1, %s6429_s20 }
0x13bf   :  { %v5828_v59 = vpop.eup %5827 }
0x13c0   :  { %2039 = vrot.lane.b32.xlu0 %v5828_v59, %s6429_s20 }
0x13c1   :  { %v5830_v5 = vpop.eup %5829 }
0x13c2   :  { %2041 = vrot.lane.b32.xlu1 %v5830_v5, %s6429_s20 }
0x142e   :  { %v1992_v18 = vpop.permute.xlu0 %1991 }
0x142f   :  { %v1997_v58 = vmul.f32 %v5816_v40, %v1992_v18 }
0x1430   :  { %v1994_v11 = vpop.permute.xlu1 %1993 }
0x1431   :  { %v1998_v42 = vmul.f32 %v5818_v46, %v1994_v11 }
0x1432   :  { %v2040_v49 = vpop.permute.xlu0 %2039 }
0x1433   :  { %v2050_v36 = vpack.c.bf16 %v1998_v42, %v1997_v58  ;;  %v2045_v26 = vmul.f32 %v5820_v50, %v2040_v49 }
0x1434   :  { %v2042_v63 = vpop.permute.xlu1 %2041 }
0x1435   :  { %v2046_v41 = vmul.f32 %v5822_v44, %v2042_v63  ;;  %2052 = vrot.lane.b32.xlu0 %v2050_v36, %s6451_s15 }
0x1437   :  { %v2102_v56 = vpack.c.bf16 %v2046_v41, %v2045_v26  ;;  %v5586_v26 = vld [vmem:[#allocation16] sm:$0xff]   ;;  %v5587_v41 = vld [vmem:[#allocation16 + $0x8] sm:$0xff]  }
0x1439   :  { %2104 = vrot.lane.b32.xlu1 %v2102_v56, %s6451_s15  ;;  %v5588_v56 = vld [vmem:[#allocation16 + $0x10] sm:$0xff]  }
0x14a7   :  { %v2053_v13 = vpop.permute.xlu0 %2052 }
0x14a8   :  { %5186 = vmatmul.mubr.msk.bf16.vlgmr.msra.gmra.mrb[44].mxu0 %vm634_vm2, %v2053_v13  ;;  %v5589_v13 = vld [vmem:[#allocation16 + $0x18] sm:$0xff]  }
0x14a9   :  { %5213 = vmatprep.mubr.msk.bf16.mxu0 %vm6449_vm1, %v6448_v8  ;;  %5198 = vmatpush3.bf16.msra.mxu0 %v5586_v26 }
0x14aa   :  { %5199 = vmatprep.subr.bf16.mxu0 %v6448_v8 }
0x14ab   :  { %v2105_v12 = vpop.permute.xlu1 %2104 }
0x14ac   :  { %5194 = vmatmul.mubr.msk.bf16.vlgmr.msra.gmra.mrb[44].mxu1 %vm634_vm2, %v2105_v12  ;;  %v5590_v12 = vld [vmem:[#allocation16 + $0x20] sm:$0xff]  }
0x14ad   :  { %5221 = vmatprep.mubr.msk.bf16.mxu1 %vm6449_vm1, %v6448_v8  ;;  %5200 = vmatpush3.bf16.msra.mxu0 %v5587_v41 }
0x14ae   :  { %5201 = vmatprep.subr.bf16.mxu0 %v6448_v8 }
0x14b1   :  { %5202 = vmatpush3.bf16.msra.mxu0 %v5588_v56 }
0x14b2   :  { %5203 = vmatprep.subr.bf16.mxu0 %v6448_v8 }
0x14b5   :  { %5204 = vmatpush3.bf16.msra.mxu0 %v5589_v13 }
0x14b6   :  { %5205 = vmatprep.subr.bf16.mxu0 %v6448_v8 }
0x14b9   :  { %5206 = vmatpush3.bf16.msra.mxu0 %v5590_v12 }
0x14ba   :  { %5207 = vmatprep.subr.bf16.mxu0 %v6448_v8 }
0x157b   :  { %v2091_v32 = vpop.f32.mrb[44].mxu0 }
0x157c   :  { %v2098_v20 = vadd.f32 %v2091_v32, %v6912_v22  ;;  %v5187_v30 = vpop.f32.mrb[45].mxu0  ;;  %v5591_v32 = vld [vmem:[#allocation16 + $0x28] sm:$0xff]  }
0x157d   :  { %v2094_v31 = vpop.f32.mrb[46].mxu0  ;;  %5208 = vmatpush3.bf16.msra.mxu0 %v5591_v32 }
0x157e   :  { %5831 = vtanh.f32 %v2098_v20  ;;  %v2099_v25 = vadd.f32 %v2094_v31, %v6918_v28  ;;  %v5188_v24 = vpop.f32.mrb[47].mxu0  ;;  %5209 = vmatprep.subr.bf16.mxu0 %v6448_v8 }
0x157f   :  { %v2143_v34 = vpop.f32.mrb[44].mxu1 }
0x1580   :  { %v2150_v39 = vadd.f32 %v2143_v34, %v6855_v43  ;;  %v5195_v6 = vpop.f32.mrb[45].mxu1  ;;  %5833 = vtanh.f32 %v2099_v25  ;;  %v4737_v43 = vmul.f32 -1.442695, %v2098_v20  ;;  %v4738_v16 = vmul.f32 -1.442695, %v2099_v25  ;;  %v5592_v20 = vld [vmem:[#allocation16 + $0x30] sm:$0xff]  }
0x1581   :  { %v2146_v29 = vpop.f32.mrb[46].mxu1  ;;  %5210 = vmatpush3.bf16.msra.mxu0 %v5592_v20  ;;  %v5593_v25 = vld [vmem:[#allocation16 + $0x38] sm:$0xff]  }
0x1582   :  { %v2151_v45 = vadd.f32 %v2146_v29, %v6861_v47  ;;  %v5196_v38 = vpop.f32.mrb[47].mxu1  ;;  %5835 = vtanh.f32 %v2150_v39  ;;  %v4739_v10 = vmul.f32 -1.442695, %v2150_v39  ;;  %5211 = vmatprep.subr.bf16.mxu0 %v6448_v8 }
0x1584   :  { %5837 = vtanh.f32 %v2151_v45  ;;  %v4740_v47 = vmul.f32 -1.442695, %v2151_v45 }
0x1585   :  { %5839 = vpow2.f32 %v4737_v43  ;;  %5212 = vmatpush3.bf16.msra.mxu0 %v5593_v25 }
0x1586   :  { %5841 = vpow2.f32 %v4738_v16  ;;  %5259 = vmatprep.subr.bf16.mxu0 %v6448_v8 }
0x1587   :  { %5843 = vpow2.f32 %v4739_v10 }
0x1588   :  { %v5832_v57 = vpop.eup %5831  ;;  %5845 = vpow2.f32 %v4740_v47 }
0x1589   :  { %2170 = vrot.lane.b32.xlu0 %v5832_v57, %s6429_s20 }
0x158a   :  { %v5834_v22 = vpop.eup %5833 }
0x158b   :  { %2172 = vrot.lane.b32.xlu1 %v5834_v22, %s6429_s20 }
0x158c   :  { %v5836_v2 = vpop.eup %5835 }
0x158d   :  { %2218 = vrot.lane.b32.xlu0 %v5836_v2, %s6429_s20 }
0x158e   :  { %v5838_v28 = vpop.eup %5837 }
0x158f   :  { %2220 = vrot.lane.b32.xlu1 %v5838_v28, %s6429_s20  ;;  %v5840_v37 = vpop.eup %5839 }
0x1590   :  { %v5842_v0 = vpop.eup %5841  ;;  %v2158_v33 = vadd.f32 1.0, %v5840_v37 }
0x1591   :  { %v5844_v40 = vpop.eup %5843  ;;  %v2159_v23 = vadd.f32 1.0, %v5842_v0 }
0x1592   :  { %v5846_v4 = vpop.eup %5845  ;;  %5847 = vrcp.f32 %v2158_v33  ;;  %v2206_v46 = vadd.f32 1.0, %v5844_v40 }
0x1593   :  { %5849 = vrcp.f32 %v2159_v23  ;;  %v2207_v15 = vadd.f32 1.0, %v5846_v4 }
0x1594   :  { %5851 = vrcp.f32 %v2206_v46 }
0x1595   :  { %5853 = vrcp.f32 %v2207_v15 }
0x159c   :  { %v7269_v48 = vpop.eup %5847 }
0x159d   :  { %v7272_v9 = vpop.eup %5849  ;;  %v2166_v51 = vmul.f32 %v7269_v48, %v7234_v17 }
0x159e   :  { %v7276_v27 = vpop.eup %5851  ;;  %v2167_v61 = vmul.f32 %v7272_v9, %v7238_v62 }
0x159f   :  { %v7280_v14 = vpop.eup %5853  ;;  %v2214_v5 = vmul.f32 %v7276_v27, %v7242_v60 }
0x15a0   :  { %v2215_v42 = vmul.f32 %v7280_v14, %v7246_v19 }
0x15fb   :  { %v2171_v50 = vpop.permute.xlu0 %2170 }
0x15fc   :  { %v2176_v55 = vmul.f32 %v7269_v48, %v2171_v50 }
0x15fd   :  { %v2173_v44 = vpop.permute.xlu1 %2172 }
0x15fe   :  { %2180 = vrot.lane.b32.xlu0 %v2176_v55, %s6451_s15  ;;  %v2177_v21 = vmul.f32 %v7272_v9, %v2173_v44  ;;  %v7317_v44 = vld [vmem:[#allocation21] sm:$0xff]  }
0x15ff   :  { %v2219_v53 = vpop.permute.xlu0 %2218  ;;  %5218 = vmatpush3.bf16.msra.mxu1 %v7317_v44 }
0x1600   :  { %v2224_v7 = vmul.f32 %v7276_v27, %v2219_v53  ;;  %2182 = vrot.lane.b32.xlu1 %v2177_v21, %s6451_s15  ;;  %5219 = vmatprep.subr.bf16.mxu1 %v6448_v8  ;;  %v7323_v21 = vld [vmem:[#allocation21 + $0x8] sm:$0xff]  }
0x1601   :  { %v2221_v35 = vpop.permute.xlu1 %2220 }
0x1602   :  { %v2225_v52 = vmul.f32 %v7280_v14, %v2221_v35  ;;  %2228 = vrot.lane.b32.xlu0 %v2224_v7, %s6451_s15 }
0x1603   :  { %5220 = vmatpush3.bf16.msra.mxu1 %v7323_v21 }
0x1604   :  { %2230 = vrot.lane.b32.xlu1 %v2225_v52, %s6451_s15  ;;  %5225 = vmatprep.subr.bf16.mxu1 %v6448_v8 }
0x1670   :  { %v2181_v3 = vpop.permute.xlu0 %2180 }
0x1671   :  { %v2186_v54 = vadd.f32 %v2181_v3, %v2166_v51  ;;  %v7329_v3 = vld [vmem:[#allocation19] sm:$0xff]  }
0x1672   :  { %v2183_v1 = vpop.permute.xlu1 %2182 }
0x1673   :  { %5855 = vtanh.f32 %v2186_v54  ;;  %v2187_v59 = vadd.f32 %v2183_v1, %v2167_v61  ;;  %v2401_v61 = vld [vmem:[#allocation28] sm:$0xff]  ;;  %v2402_v1 = vld [vmem:[#allocation28 + $0x8] sm:$0xff] }
0x1674   :  { %v2229_v18 = vpop.permute.xlu0 %2228 }
0x1675   :  { %v5565_v11 = vpack.i.bf16 %v2187_v59, %v2186_v54  ;;  %5857 = vtanh.f32 %v2187_v59  ;;  %v2234_v58 = vadd.f32 %v2229_v18, %v2214_v5  ;;  %v2403_v59 = vpack.c.bf16 %v2402_v1, %v2401_v61 }
0x1676   :  { %v2231_v49 = vpop.permute.xlu1 %2230 }
0x1677   :  { %5859 = vtanh.f32 %v2234_v58  ;;  %v2235_v17 = vadd.f32 %v2231_v49, %v2215_v42  ;;  %v7339_v42 = vld [vmem:[#allocation22] ss:$0 sm:$0xff] }
0x1679   :  { %v5575_v36 = vpack.i.bf16 %v2235_v17, %v2234_v58  ;;  %5861 = vtanh.f32 %v2235_v17 }
0x167d   :  { %v5856_v63 = vpop.eup %5855 }
0x167e   :  { %2192 = vrot.lane.b32.xlu0 %v5856_v63, %s6429_s20 }
0x167f   :  { %v5858_v62 = vpop.eup %5857 }
0x1680   :  { %2194 = vrot.lane.b32.xlu1 %v5858_v62, %s6429_s20 }
0x1681   :  { %v5860_v60 = vpop.eup %5859 }
0x1682   :  { %2240 = vrot.lane.b32.xlu0 %v5860_v60, %s6429_s20 }
0x1683   :  { %v5862_v19 = vpop.eup %5861 }
0x1684   :  { %2242 = vrot.lane.b32.xlu1 %v5862_v19, %s6429_s20 }
0x16f0   :  { %v2193_v30 = vpop.permute.xlu0 %2192 }
0x16f1   :  { %v2198_v24 = vmul.f32 %v7269_v48, %v2193_v30 }
0x16f2   :  { %v2195_v31 = vpop.permute.xlu1 %2194 }
0x16f3   :  { %v2199_v34 = vmul.f32 %v7272_v9, %v2195_v31 }
0x16f4   :  { %v2241_v39 = vpop.permute.xlu0 %2240 }
0x16f5   :  { %v5560_v6 = vpack.i.bf16 %v2199_v34, %v2198_v24  ;;  %v2246_v45 = vmul.f32 %v7276_v27, %v2241_v39  ;;  %v4741_v27 = vld [vmem:[#allocation18] ss:$0 sm:$0xff] }
0x16f6   :  { %v2243_v29 = vpop.permute.xlu1 %2242 }
0x16f7   :  { %v2247_v38 = vmul.f32 %v7280_v14, %v2243_v29  ;;  %5561 = vrot.lane.b32.xlu0 %v5560_v6, %s6451_s15 }
0x16f9   :  { %v5570_v57 = vpack.i.bf16 %v2247_v38, %v2246_v45 }
0x16fb   :  { %5566 = vrot.lane.b32.xlu0 %v5565_v11, %s6451_s15  ;;  %5571 = vrot.lane.b32.xlu1 %v5570_v57, %s6429_s20 }
0x16ff   :  { %5576 = vrot.lane.b32.xlu1 %v5575_v36, %s6429_s20 }
0x1769   :  { %v5562_v22 = vpop.permute.xlu0 %5561 }
0x176a   :  { %v5564_v43 = vunpack.i.h.bf16 %v5562_v22  ;;  %v5563_v16 = vunpack.i.l.bf16 %v5562_v22 }
0x176d   :  { %v5567_v2 = vpop.permute.xlu0 %5566  ;;  %v5572_v28 = vpop.permute.xlu1 %5571 }
0x176e   :  { %v5574_v10 = vunpack.i.h.bf16 %v5572_v28  ;;  %v5573_v47 = vunpack.i.l.bf16 %v5572_v28  ;;  %v5569_v37 = vunpack.i.h.bf16 %v5567_v2  ;;  %v5568_v0 = vunpack.i.l.bf16 %v5567_v2 }
0x1770   :  { %v2281_v33 = vsel %vm634_vm2, %v5564_v43, %v5574_v10  ;;  %v2280_v40 = vsel %vm634_vm2, %v5563_v16, %v5573_v47  ;;  %v7353_v43 = vld [vmem:[#allocation24] sm:$0xff]   ;;  %v7356_v16 = vld [vmem:[#allocation24 + $0x8] sm:$0xff]  }
0x1771   :  { %v5577_v23 = vpop.permute.xlu1 %5576  ;;  %v2283_v15 = vsel %vm2282_vm3, %v2280_v40, %v5568_v0  ;;  %v2284_v48 = vsel %vm2282_vm3, %v2281_v33, %v5569_v37 }
0x1772   :  { %v5579_v4 = vunpack.i.h.bf16 %v5577_v23  ;;  %v5578_v46 = vunpack.i.l.bf16 %v5577_v23 }
0x1774   :  { %v2286_v50 = vsel %vm2285_vm4, %v2283_v15, %v5578_v46  ;;  %v2287_v55 = vsel %vm2285_vm4, %v2284_v48, %v5579_v4  ;;  %v7372_v46 = vld [vmem:[#allocation25] ss:$0 sm:$0xff] }
0x1775   :  { %v2288_v9 = vpack.c.bf16 %v2287_v55, %v2286_v50 }
0x1777   :  { %5214 = vmatmul.mubr.bf16.vlgmr.msra.gmra.mrb[48].mxu0 %v2288_v9 }
0x1778   :  { %5263 = vmatprep.mubr.msk.bf16.mxu0 %vm6449_vm1, %v6448_v8  ;;  %5260 = vmatpush3.bf16.msra.mxu0 %v7317_v44 }
0x1779   :  { %5261 = vmatprep.subr.bf16.mxu0 %v6448_v8 }
0x177c   :  { %5262 = vmatpush3.bf16.msra.mxu0 %v7323_v21 }
0x177d   :  { %5267 = vmatprep.subr.bf16.mxu0 %v6448_v8 }
0x184a   :  { %v2394_v53 = vpop.f32.mrb[48].mxu0 }
0x184b   :  { %v5215_v7 = vpop.f32.mrb[49].mxu0  ;;  %v2395_v35 = vadd.f32 %v4741_v27, %v2394_v53 }
0x184c   :  { %v2397_v14 = vpop.f32.mrb[50].mxu0 }
0x184d   :  { %v2398_v52 = vadd.f32 %v4741_v27, %v2397_v14  ;;  %v5216_v51 = vpop.f32.mrb[51].mxu0 }
0x184f   :  { %v2404_v54 = vpack.c.bf16 %v2398_v52, %v2395_v35 }
0x1851   :  { %5222 = vmatmul.mubr.msk.bf16.vlgmr.msra.gmra.mrb[48].mxu1 %vm634_vm2, %v2404_v54 }
0x1852   :  { %5226 = vmatpush3.bf16.msra.mxu1 %v7329_v3  ;;  %5227 = vmatprep.mubr.msk.bf16.mxu1 %vm6449_vm1, %v6448_v8 }
0x1853   :  { %5231 = vmatprep.subr.bf16.mxu1 %v6448_v8 }
0x1859   :  { %5228 = vmatmul.mubr.msk.bf16.vlgmr.msra.gmra.mrb[52].mxu1 %vm354_vm0, %v2403_v59 }
0x185a   :  { %5235 = vmatprep.mubr.msk.bf16.mxu1 %vm6449_vm1, %v6448_v8  ;;  %5232 = vmatpush3.bf16.msra.mxu1 %v7353_v43 }
0x185b   :  { %5233 = vmatprep.subr.bf16.mxu1 %v6448_v8 }
0x185e   :  { %5234 = vmatpush3.bf16.msra.mxu1 %v7356_v16 }
0x185f   :  { %5239 = vmatprep.subr.bf16.mxu1 %v6448_v8 }
0x1924   :  { %v2454_v5 = vpop.f32.mrb[48].mxu1 }
0x1925   :  { %v5223_v18 = vpop.f32.mrb[49].mxu1 }
0x1926   :  { %v2457_v11 = vpop.f32.mrb[50].mxu1 }
0x1927   :  { %v5224_v58 = vpop.f32.mrb[51].mxu1 }
0x192c   :  { %v2504_v49 = vpop.f32.mrb[52].mxu1 }
0x192d   :  { %v2505_v17 = vadd.f32 %v2504_v49, %v2454_v5  ;;  %v5229_v36 = vpop.f32.mrb[53].mxu1  ;;  %v7384_v49 = vld [vmem:[#allocation27] sm:$0xff]  }
0x192e   :  { %v2507_v63 = vpop.f32.mrb[54].mxu1  ;;  %v7391_v36 = vld [vmem:[#allocation27 + $0x10] sm:$0xff]  }
0x192f   :  { %v2511_v62 = vadd.f32 %v7339_v42, %v2505_v17  ;;  %v2508_v26 = vadd.f32 %v2507_v63, %v2457_v11  ;;  %v5230_v60 = vpop.f32.mrb[55].mxu1  ;;  %v7387_v17 = vld [vmem:[#allocation27 + $0x8] sm:$0xff]   ;;  %v7395_v63 = vld [vmem:[#allocation27 + $0x18] sm:$0xff]  }
0x1931   :  { %5863 = vtanh.f32 %v2511_v62  ;;  %v2512_v41 = vadd.f32 %v7339_v42, %v2508_v26  ;;  %v4755_v13 = vmul.f32 -1.442695, %v2511_v62  ;;  %v7399_v62 = vld [vmem:[#allocation27 + $0x20] sm:$0xff]   ;;  %v7403_v26 = vld [vmem:[#allocation27 + $0x28] sm:$0xff]  }
0x1933   :  { %5865 = vtanh.f32 %v2512_v41  ;;  %v4756_v12 = vmul.f32 -1.442695, %v2512_v41 }
0x1934   :  { %5867 = vpow2.f32 %v4755_v13 }
0x1935   :  { %5869 = vpow2.f32 %v4756_v12 }
0x193b   :  { %v5864_v19 = vpop.eup %5863 }
0x193c   :  { %2531 = vrot.lane.b32.xlu0 %v5864_v19, %s6429_s20 }
0x193d   :  { %v5866_v56 = vpop.eup %5865 }
0x193e   :  { %2533 = vrot.lane.b32.xlu1 %v5866_v56, %s6429_s20  ;;  %v5868_v32 = vpop.eup %5867 }
0x193f   :  { %v5870_v20 = vpop.eup %5869  ;;  %v2519_v30 = vadd.f32 1.0, %v5868_v32 }
0x1940   :  { %v2520_v31 = vadd.f32 1.0, %v5870_v20 }
0x1941   :  { %5871 = vrcp.f32 %v2519_v30  ;;  %v7408_v30 = vld [vmem:[#allocation27 + $0x30] sm:$0xff]  }
0x1942   :  { %5873 = vrcp.f32 %v2520_v31  ;;  %v7412_v31 = vld [vmem:[#allocation27 + $0x38] sm:$0xff]  }
0x194b   :  { %v5872_v25 = vpop.eup %5871 }
0x194c   :  { %v5874_v39 = vpop.eup %5873  ;;  %v2527_v45 = vmul.f32 %v5872_v25, %v2395_v35 }
0x194d   :  { %v2528_v22 = vmul.f32 %v5874_v39, %v2398_v52  ;;  %v313_v52 = vlaneseq }
0x194f   :  { %v7380_v51 = vand.u32 127, %v313_v52 }
0x19ae   :  { %v2532_v24 = vpop.permute.xlu0 %2531 }
0x19af   :  { %v2537_v34 = vmul.f32 %v5872_v25, %v2532_v24 }
0x19b0   :  { %v2534_v6 = vpop.permute.xlu1 %2533 }
0x19b1   :  { %2541 = vrot.lane.b32.xlu0 %v2537_v34, %s6451_s15  ;;  %v2538_v29 = vmul.f32 %v5874_v39, %v2534_v6 }
0x19b3   :  { %2543 = vrot.lane.b32.xlu1 %v2538_v29, %s6451_s15 }
0x1a23   :  { %v2542_v38 = vpop.permute.xlu0 %2541 }
0x1a24   :  { %v7347_v57 = vadd.f32 %v2542_v38, %v2527_v45 }
0x1a25   :  { %v2544_v2 = vpop.permute.xlu1 %2543 }
0x1a26   :  { %5875 = vtanh.f32 %v7347_v57  ;;  %v7350_v28 = vadd.f32 %v2544_v2, %v2528_v22 }
0x1a28   :  { %5877 = vtanh.f32 %v7350_v28 }
0x1a30   :  { %v5876_v10 = vpop.eup %5875 }
0x1a31   :  { %2553 = vrot.lane.b32.xlu0 %v5876_v10, %s6429_s20  ;;  %v6452_v10 = vmov 1.0|1.0  }
0x1a32   :  { %v5878_v47 = vpop.eup %5877 }
0x1a33   :  { %2555 = vrot.lane.b32.xlu1 %v5878_v47, %s6429_s20 }
0x1aa3   :  { %v2554_v37 = vpop.permute.xlu0 %2553 }
0x1aa4   :  { %v2559_v33 = vmul.f32 %v5872_v25, %v2554_v37 }
0x1aa5   :  { %v2556_v0 = vpop.permute.xlu1 %2555 }
0x1aa6   :  { %v2560_v40 = vmul.f32 %v5874_v39, %v2556_v0 }
0x1aa8   :  { %v2561_v23 = vpack.c.bf16 %v2560_v40, %v2559_v33 }
0x1aaa   :  { %2563 = vrot.lane.b32.xlu0 %v2561_v23, %s6451_s15 }
0x1b1c   :  { %v2564_v4 = vpop.permute.xlu0 %2563 }
0x1b1d   :  { %5236 = vmatmul.mubr.msk.bf16.vlgmr.msra.gmra.mrb[56].mxu1 %vm634_vm2, %v2564_v4  ;;  %5264 = vmatmul.mubr.msk.bf16.vlgmr.msra.gmra.mrb[52].mxu0 %vm634_vm2, %v2564_v4 }
0x1b1e   :  { %5255 = vmatprep.mubr.msk.bf16.mxu1 %vm6449_vm1, %v6448_v8  ;;  %5268 = vmatpush3.bf16.msra.mxu0 %v7329_v3 }
0x1b1f   :  { %5269 = vmatprep.mubr.msk.bf16.mxu0 %vm6449_vm1, %v6448_v8  ;;  %5273 = vmatprep.subr.bf16.mxu0 %v6448_v8 }
0x1b20   :  { %5240 = vmatpush3.bf16.msra.mxu1 %v7384_v49 }
0x1b21   :  { %5241 = vmatprep.subr.bf16.mxu1 %v6448_v8 }
0x1b24   :  { %5242 = vmatpush3.bf16.msra.mxu1 %v7387_v17 }
0x1b25   :  { %5243 = vmatprep.subr.bf16.mxu1 %v6448_v8 }
0x1b28   :  { %5244 = vmatpush3.bf16.msra.mxu1 %v7391_v36 }
0x1b29   :  { %5245 = vmatprep.subr.bf16.mxu1 %v6448_v8 }
0x1b2c   :  { %5246 = vmatpush3.bf16.msra.mxu1 %v7395_v63 }
0x1b2d   :  { %5247 = vmatprep.subr.bf16.mxu1 %v6448_v8 }
0x1b30   :  { %5248 = vmatpush3.bf16.msra.mxu1 %v7399_v62 }
0x1b31   :  { %5249 = vmatprep.subr.bf16.mxu1 %v6448_v8 }
0x1b34   :  { %5250 = vmatpush3.bf16.msra.mxu1 %v7403_v26 }
0x1b35   :  { %5251 = vmatprep.subr.bf16.mxu1 %v6448_v8 }
0x1b38   :  { %5252 = vmatpush3.bf16.msra.mxu1 %v7408_v30 }
0x1b39   :  { %5253 = vmatprep.subr.bf16.mxu1 %v6448_v8 }
0x1b3c   :  { %5254 = vmatpush3.bf16.msra.mxu1 %v7412_v31 }
0x1b3d   :  { %5301 = vmatprep.subr.bf16.mxu1 %v6448_v8 }
0x1bf0   :  { %v2614_v15 = vpop.f32.mrb[56].mxu1  ;;  %v7374_v48 = vpop.f32.mrb[52].mxu0 }
0x1bf1   :  { %v2615_v50 = vadd.f32 %v7372_v46, %v2614_v15  ;;  %v5237_v55 = vpop.f32.mrb[57].mxu1  ;;  %v5265_v9 = vpop.f32.mrb[53].mxu0 }
0x1bf2   :  { %v2617_v27 = vpop.f32.mrb[58].mxu1  ;;  %v7377_v53 = vpop.f32.mrb[54].mxu0 }
0x1bf3   :  { %2621 = vst [vmem:[#allocation30] sm:$0xff] %v2615_v50  ;;  %v2618_v7 = vadd.f32 %v7372_v46, %v2617_v27  ;;  %2623 = vmax.xlane.f32.xlu1 %v2615_v50  ;;  %v5238_v14 = vpop.f32.mrb[59].mxu1  ;;  %v5266_v35 = vpop.f32.mrb[55].mxu0 }
0x1bf5   :  { %2622 = vst [vmem:[#allocation30 + $0x8] sm:$0xff] %v2618_v7  ;;  %2625 = vmax.xlane.f32.xlu0 %v2618_v7 }
0x1c80   :  { %v2624_v54 = vpop.xlane.xlu1 %2623 }
0x1c81   :  { %vm2627_vm5 = vcmp.eq.f32.partialorder %v2615_v50, %v2624_v54 }
0x1c82   :  { %v2629_v61 = vsel %vm2627_vm5, %v7380_v51, 128  ;;  %v2626_v1 = vpop.xlane.xlu0 %2625 }
0x1c83   :  { %v2632_v59 = vshra.s32 %v2629_v61, 16  ;;  %vm2628_vm6 = vcmp.eq.f32.partialorder %v2618_v7, %v2626_v1  ;;  %v2631_v60 = vand.u32 65535, %v2629_v61 }
0x1c84   :  { %v2630_v5 = vsel %vm2628_vm6, %v7380_v51, 128 }
0x1c85   :  { %v2634_v18 = vcvt.s32.f32 %v2632_v59  ;;  %v2646_v11 = vshra.s32 %v2630_v5, 16  ;;  %v2645_v41 = vand.u32 65535, %v2630_v5  ;;  %v2633_v19 = vcvt.s32.f32 %v2631_v60 }
0x1c87   :  { %v2648_v58 = vcvt.s32.f32 %v2646_v11  ;;  %2635 = vmin.xlane.f32.xlu0 %v2634_v18  ;;  %v2647_v13 = vcvt.s32.f32 %v2645_v41 }
0x1c89   :  { %2649 = vmin.xlane.f32.xlu1 %v2648_v58 }
0x1d14   :  { %v2636_v56 = vpop.xlane.xlu0 %2635 }
0x1d15   :  { %vm2637_vm7 = vcmp.eq.f32.partialorder %v2634_v18, %v2636_v56  ;;  %v2642_v25 = vcvt.f32.s32 %v2636_v56 }
0x1d16   :  { %v2650_v12 = vpop.xlane.xlu1 %2649  ;;  %v2638_v32 = vsel %vm2637_vm7, %v2633_v19, inf }
0x1d17   :  { %vm2651_vm8 = vcmp.eq.f32.partialorder %v2648_v58, %v2650_v12  ;;  %2639 = vmin.xlane.f32.xlu0 %v2638_v32  ;;  %v2656_v24 = vcvt.f32.s32 %v2650_v12  ;;  %v2643_v39 = vshll.u32 %v2642_v25, 16 }
0x1d18   :  { %v2652_v20 = vsel %vm2651_vm8, %v2647_v13, inf }
0x1d19   :  { %2653 = vmin.xlane.f32.xlu1 %v2652_v20  ;;  %v2657_v45 = vshll.u32 %v2656_v24, 16 }
0x1da4   :  { %v2640_v34 = vpop.xlane.xlu0 %2639 }
0x1da5   :  { %v2641_v6 = vcvt.f32.s32 %v2640_v34 }
0x1da6   :  { %v2654_v29 = vpop.xlane.xlu1 %2653 }
0x1da7   :  { %v2644_v38 = vadd.s32 %v2643_v39, %v2641_v6  ;;  %v2655_v22 = vcvt.f32.s32 %v2654_v29 }
0x1da9   :  { %2660 = vst.msk [vmem:[#allocation31] sm:$0xff] %vm2659_vm9, %v2644_v38  ;;  %v2658_v2 = vadd.s32 %v2657_v45, %v2655_v22  ;;  %vm2662_vm10 = vcmp.eq.s32.totalorder %v7380_v51, %v2644_v38 }
0x1dab   :  { %2661 = vst.msk [vmem:[#allocation31 + $0x8] sm:$0xff] %vm2659_vm9, %v2658_v2  ;;  %vm2663_vm11 = vcmp.eq.s32.totalorder %v7380_v51, %v2658_v2 }
0x1dac   :  { %vm4770_vm12 = vmpackc.low %vm2663_vm11, %vm2662_vm10 }
0x1dad   :  { %5256 = vmatmul.mubr.msk.bf16.vlgmr.msra.gmra.mrb[60].mxu1 %vm4770_vm12, %v6452_v10 }
0x1dae   :  { %5302 = vmatpush3.bf16.msra.mxu1 %v7317_v44  ;;  %5305 = vmatprep.mubr.msk.bf16.mxu1 %vm6449_vm1, %v6448_v8 }
0x1daf   :  { %5303 = vmatprep.subr.bf16.mxu1 %v6448_v8 }
0x1db2   :  { %5304 = vmatpush3.bf16.msra.mxu1 %v7323_v21 }
0x1db3   :  { %5309 = vmatprep.subr.bf16.mxu1 %v6448_v8 }
0x1e80   :  { %v2751_v47 = vpop.f32.mrb[60].mxu1 }
0x1e81   :  { %v5257_v37 = vpop.f32.mrb[61].mxu1 }
0x1e82   :  { %v2754_v0 = vpop.f32.mrb[62].mxu1 }
0x1e83   :  { %v2758_v33 = vpack.c.bf16 %v2754_v0, %v2751_v47  ;;  %v5258_v40 = vpop.f32.mrb[63].mxu1 }
0x1e85   :  { %5270 = vmatmul.mubr.msk.bf16.vlgmr.msra.gmra.mrb[56].mxu0 %vm354_vm0, %v2758_v33 }
0x1e86   :  { %5274 = vmatpush3.bf16.msra.mxu0 %v7353_v43  ;;  %5277 = vmatprep.mubr.msk.bf16.mxu0 %vm6449_vm1, %v6448_v8 }
0x1e87   :  { %5275 = vmatprep.subr.bf16.mxu0 %v6448_v8 }
0x1e8a   :  { %5276 = vmatpush3.bf16.msra.mxu0 %v7356_v16 }
0x1e8b   :  { %5281 = vmatprep.subr.bf16.mxu0 %v6448_v8 }
0x1f58   :  { %v2837_v23 = vpop.f32.mrb[56].mxu0 }
0x1f59   :  { %v2838_v4 = vadd.f32 %v2837_v23, %v7374_v48  ;;  %v5271_v15 = vpop.f32.mrb[57].mxu0 }
0x1f5a   :  { %v2840_v50 = vpop.f32.mrb[58].mxu0 }
0x1f5b   :  { %v2844_v55 = vadd.f32 %v7339_v42, %v2838_v4  ;;  %v2841_v9 = vadd.f32 %v2840_v50, %v7377_v53  ;;  %v5272_v27 = vpop.f32.mrb[59].mxu0 }
0x1f5d   :  { %5879 = vtanh.f32 %v2844_v55  ;;  %v2845_v7 = vadd.f32 %v7339_v42, %v2841_v9  ;;  %v4774_v52 = vmul.f32 -1.442695, %v2844_v55 }
0x1f5f   :  { %5881 = vtanh.f32 %v2845_v7  ;;  %v4775_v54 = vmul.f32 -1.442695, %v2845_v7 }
0x1f60   :  { %5883 = vpow2.f32 %v4774_v52 }
0x1f61   :  { %5885 = vpow2.f32 %v4775_v54 }
0x1f67   :  { %v5880_v14 = vpop.eup %5879 }
0x1f68   :  { %2864 = vrot.lane.b32.xlu0 %v5880_v14, %s6429_s20 }
0x1f69   :  { %v5882_v35 = vpop.eup %5881 }
0x1f6a   :  { %2866 = vrot.lane.b32.xlu1 %v5882_v35, %s6429_s20  ;;  %v5884_v48 = vpop.eup %5883 }
0x1f6b   :  { %v5886_v61 = vpop.eup %5885  ;;  %v2852_v1 = vadd.f32 1.0, %v5884_v48 }
0x1f6c   :  { %v2853_v59 = vadd.f32 1.0, %v5886_v61 }
0x1f6d   :  { %5887 = vrcp.f32 %v2852_v1 }
0x1f6e   :  { %5889 = vrcp.f32 %v2853_v59 }
0x1f77   :  { %v5888_v53 = vpop.eup %5887 }
0x1f78   :  { %v5890_v11 = vpop.eup %5889  ;;  %v2860_v41 = vmul.f32 %v5888_v53, %v7347_v57 }
0x1f79   :  { %v2861_v13 = vmul.f32 %v5890_v11, %v7350_v28 }
0x1fda   :  { %v2865_v5 = vpop.permute.xlu0 %2864 }
0x1fdb   :  { %v2870_v18 = vmul.f32 %v5888_v53, %v2865_v5 }
0x1fdc   :  { %v2867_v58 = vpop.permute.xlu1 %2866 }
0x1fdd   :  { %2874 = vrot.lane.b32.xlu1 %v2870_v18, %s6451_s15  ;;  %v2871_v60 = vmul.f32 %v5890_v11, %v2867_v58 }
0x1fdf   :  { %2876 = vrot.lane.b32.xlu0 %v2871_v60, %s6451_s15 }
0x204f   :  { %v2875_v19 = vpop.permute.xlu1 %2874 }
0x2050   :  { %v7443_v56 = vadd.f32 %v2875_v19, %v2860_v41 }
0x2051   :  { %v2877_v12 = vpop.permute.xlu0 %2876 }
0x2052   :  { %5891 = vtanh.f32 %v7443_v56  ;;  %v7447_v32 = vadd.f32 %v2877_v12, %v2861_v13 }
0x2054   :  { %5893 = vtanh.f32 %v7447_v32 }
0x205c   :  { %v5892_v20 = vpop.eup %5891 }
0x205d   :  { %2886 = vrot.lane.b32.xlu1 %v5892_v20, %s6429_s20 }
0x205e   :  { %v5894_v25 = vpop.eup %5893 }
0x205f   :  { %2888 = vrot.lane.b32.xlu0 %v5894_v25, %s6429_s20 }
0x20cf   :  { %v2887_v24 = vpop.permute.xlu1 %2886 }
0x20d0   :  { %v2892_v34 = vmul.f32 %v5888_v53, %v2887_v24 }
0x20d1   :  { %v2889_v57 = vpop.permute.xlu0 %2888 }
0x20d2   :  { %v2893_v39 = vmul.f32 %v5890_v11, %v2889_v57 }
0x20d4   :  { %v2894_v6 = vpack.c.bf16 %v2893_v39, %v2892_v34 }
0x20d6   :  { %2896 = vrot.lane.b32.xlu1 %v2894_v6, %s6451_s15 }
0x2148   :  { %v2897_v28 = vpop.permute.xlu1 %2896 }
0x2149   :  { %5278 = vmatmul.mubr.msk.bf16.vlgmr.msra.gmra.mrb[60].mxu0 %vm634_vm2, %v2897_v28  ;;  %5306 = vmatmul.mubr.msk.bf16.vlgmr.msra.gmra.mrb[64].mxu1 %vm634_vm2, %v2897_v28 }
0x214a   :  { %5282 = vmatpush3.bf16.msra.mxu0 %v7384_v49  ;;  %5297 = vmatprep.mubr.msk.bf16.mxu0 %vm6449_vm1, %v6448_v8 }
0x214b   :  { %5283 = vmatprep.subr.bf16.mxu0 %v6448_v8  ;;  %5310 = vmatpush3.bf16.msra.mxu1 %v7329_v3 }
0x214c   :  { %5311 = vmatprep.mubr.msk.bf16.mxu1 %vm6449_vm1, %v6448_v8  ;;  %5315 = vmatprep.subr.bf16.mxu1 %v6448_v8 }
0x214e   :  { %5284 = vmatpush3.bf16.msra.mxu0 %v7387_v17 }
0x214f   :  { %5285 = vmatprep.subr.bf16.mxu0 %v6448_v8 }
0x2152   :  { %5286 = vmatpush3.bf16.msra.mxu0 %v7391_v36 }
0x2153   :  { %5287 = vmatprep.subr.bf16.mxu0 %v6448_v8 }
0x2156   :  { %5288 = vmatpush3.bf16.msra.mxu0 %v7395_v63 }
0x2157   :  { %5289 = vmatprep.subr.bf16.mxu0 %v6448_v8 }
0x215a   :  { %5290 = vmatpush3.bf16.msra.mxu0 %v7399_v62 }
0x215b   :  { %5291 = vmatprep.subr.bf16.mxu0 %v6448_v8 }
0x215e   :  { %5292 = vmatpush3.bf16.msra.mxu0 %v7403_v26 }
0x215f   :  { %5293 = vmatprep.subr.bf16.mxu0 %v6448_v8 }
0x2162   :  { %5294 = vmatpush3.bf16.msra.mxu0 %v7408_v30 }
0x2163   :  { %5295 = vmatprep.subr.bf16.mxu0 %v6448_v8 }
0x2166   :  { %5296 = vmatpush3.bf16.msra.mxu0 %v7412_v31 }
0x2167   :  { %5343 = vmatprep.subr.bf16.mxu0 %v6448_v8 }
0x221c   :  { %v2935_v29 = vpop.f32.mrb[60].mxu0  ;;  %v7477_v45 = vpop.f32.mrb[64].mxu1 }
0x221d   :  { %v2936_v38 = vadd.f32 %v7372_v46, %v2935_v29  ;;  %v5279_v22 = vpop.f32.mrb[61].mxu0  ;;  %v5307_v2 = vpop.f32.mrb[65].mxu1 }
0x221e   :  { %v2938_v47 = vpop.f32.mrb[62].mxu0  ;;  %v7480_v37 = vpop.f32.mrb[66].mxu1 }
0x221f   :  { %2943 = vst [vmem:[#allocation30 + $0x10] sm:$0xff] %v2936_v38  ;;  %v2939_v0 = vadd.f32 %v7372_v46, %v2938_v47  ;;  %v5308_v33 = vpop.f32.mrb[67].mxu1  ;;  %2945 = vmax.xlane.f32.xlu0 %v2936_v38  ;;  %v5280_v40 = vpop.f32.mrb[63].mxu0 }
0x2221   :  { %2944 = vst [vmem:[#allocation30 + $0x18] sm:$0xff] %v2939_v0  ;;  %2947 = vmax.xlane.f32.xlu1 %v2939_v0 }
0x22ac   :  { %v2946_v23 = vpop.xlane.xlu0 %2945 }
0x22ad   :  { %vm2949_vm13 = vcmp.eq.f32.partialorder %v2936_v38, %v2946_v23 }
0x22ae   :  { %v2951_v4 = vsel %vm2949_vm13, %v7380_v51, 128  ;;  %v2948_v15 = vpop.xlane.xlu1 %2947 }
0x22af   :  { %v2954_v50 = vshra.s32 %v2951_v4, 16  ;;  %vm2950_vm14 = vcmp.eq.f32.partialorder %v2939_v0, %v2948_v15  ;;  %v2953_v14 = vand.u32 65535, %v2951_v4 }
0x22b0   :  { %v2952_v55 = vsel %vm2950_vm14, %v7380_v51, 128 }
0x22b1   :  { %v2956_v9 = vcvt.s32.f32 %v2954_v50  ;;  %v2968_v27 = vshra.s32 %v2952_v55, 16  ;;  %v2955_v35 = vcvt.s32.f32 %v2953_v14  ;;  %v2967_v52 = vand.u32 65535, %v2952_v55 }
0x22b3   :  { %2957 = vmin.xlane.f32.xlu0 %v2956_v9  ;;  %v2970_v7 = vcvt.s32.f32 %v2968_v27  ;;  %v2969_v61 = vcvt.s32.f32 %v2967_v52 }
0x22b7   :  { %2971 = vmin.xlane.f32.xlu0 %v2970_v7 }
0x2340   :  { %v2958_v54 = vpop.xlane.xlu0 %2957 }
0x2341   :  { %vm2959_vm15 = vcmp.eq.f32.partialorder %v2956_v9, %v2958_v54  ;;  %v2964_v53 = vcvt.f32.s32 %v2958_v54 }
0x2342   :  { %v2960_v48 = vsel %vm2959_vm15, %v2955_v35, inf }
0x2343   :  { %2961 = vmin.xlane.f32.xlu1 %v2960_v48  ;;  %v2965_v18 = vshll.u32 %v2964_v53, 16 }
0x2344   :  { %v2972_v1 = vpop.xlane.xlu0 %2971 }
0x2345   :  { %vm2973_vm3 = vcmp.eq.f32.partialorder %v2970_v7, %v2972_v1  ;;  %v2978_v11 = vcvt.f32.s32 %v2972_v1 }
0x2346   :  { %v2974_v59 = vsel %vm2973_vm3, %v2969_v61, inf }
0x2347   :  { %2975 = vmin.xlane.f32.xlu0 %v2974_v59  ;;  %v2979_v19 = vshll.u32 %v2978_v11, 16 }
0x23d0   :  { %v2962_v5 = vpop.xlane.xlu1 %2961 }
0x23d1   :  { %v2963_v58 = vcvt.f32.s32 %v2962_v5 }
0x23d3   :  { %v2966_v60 = vadd.s32 %v2965_v18, %v2963_v58 }
0x23d4   :  { %v2976_v41 = vpop.xlane.xlu0 %2975 }
0x23d5   :  { %2982 = vst.msk [vmem:[#allocation31 + $0x10] sm:$0xff] %vm2659_vm9, %v2966_v60  ;;  %v2977_v13 = vcvt.f32.s32 %v2976_v41  ;;  %vm2984_vm4 = vcmp.eq.s32.totalorder %v7380_v51, %v2966_v60 }
0x23d7   :  { %v2980_v12 = vadd.s32 %v2979_v19, %v2977_v13 }
0x23d9   :  { %2983 = vst.msk [vmem:[#allocation31 + $0x18] sm:$0xff] %vm2659_vm9, %v2980_v12  ;;  %vm2985_vm5 = vcmp.eq.s32.totalorder %v7380_v51, %v2980_v12 }
0x23da   :  { %vm4779_vm6 = vmpackc.low %vm2985_vm5, %vm2984_vm4 }
0x23db   :  { %5298 = vmatmul.mubr.msk.bf16.vlgmr.msra.gmra.mrb[64].mxu0 %vm4779_vm6, %v6452_v10 }
0x23dc   :  { %5344 = vmatpush3.bf16.msra.mxu0 %v7317_v44  ;;  %5347 = vmatprep.mubr.msk.bf16.mxu0 %vm6449_vm1, %v6448_v8 }
0x23dd   :  { %5345 = vmatprep.subr.bf16.mxu0 %v6448_v8 }
0x23e0   :  { %5346 = vmatpush3.bf16.msra.mxu0 %v7323_v21 }
0x23e1   :  { %5351 = vmatprep.subr.bf16.mxu0 %v6448_v8 }
0x24ae   :  { %v3025_v20 = vpop.f32.mrb[64].mxu0 }
0x24af   :  { %v5299_v25 = vpop.f32.mrb[65].mxu0 }
0x24b0   :  { %v3028_v24 = vpop.f32.mrb[66].mxu0 }
0x24b1   :  { %v3032_v57 = vpack.c.bf16 %v3028_v24, %v3025_v20  ;;  %v5300_v34 = vpop.f32.mrb[67].mxu0 }
0x24b3   :  { %5312 = vmatmul.mubr.msk.bf16.vlgmr.msra.gmra.mrb[68].mxu1 %vm354_vm0, %v3032_v57 }
0x24b4   :  { %5316 = vmatpush3.bf16.msra.mxu1 %v7353_v43  ;;  %5319 = vmatprep.mubr.msk.bf16.mxu1 %vm6449_vm1, %v6448_v8 }
0x24b5   :  { %5317 = vmatprep.subr.bf16.mxu1 %v6448_v8 }
0x24b8   :  { %5318 = vmatpush3.bf16.msra.mxu1 %v7356_v16 }
0x24b9   :  { %5323 = vmatprep.subr.bf16.mxu1 %v6448_v8 }
0x2586   :  { %v3111_v39 = vpop.f32.mrb[68].mxu1 }
0x2587   :  { %v3112_v6 = vadd.f32 %v3111_v39, %v7477_v45  ;;  %v5313_v28 = vpop.f32.mrb[69].mxu1 }
0x2588   :  { %v3114_v29 = vpop.f32.mrb[70].mxu1 }
0x2589   :  { %v3118_v38 = vadd.f32 %v7339_v42, %v3112_v6  ;;  %v3115_v22 = vadd.f32 %v3114_v29, %v7480_v37  ;;  %v5314_v2 = vpop.f32.mrb[71].mxu1 }
0x258b   :  { %5895 = vtanh.f32 %v3118_v38  ;;  %v3119_v47 = vadd.f32 %v7339_v42, %v3115_v22  ;;  %v4783_v40 = vmul.f32 -1.442695, %v3118_v38 }
0x258d   :  { %5897 = vtanh.f32 %v3119_v47  ;;  %v4784_v45 = vmul.f32 -1.442695, %v3119_v47 }
0x258e   :  { %5899 = vpow2.f32 %v4783_v40 }
0x258f   :  { %5901 = vpow2.f32 %v4784_v45 }
0x2595   :  { %v5896_v0 = vpop.eup %5895 }
0x2596   :  { %3138 = vrot.lane.b32.xlu1 %v5896_v0, %s6429_s20 }
0x2597   :  { %v5898_v33 = vpop.eup %5897 }
0x2598   :  { %3140 = vrot.lane.b32.xlu0 %v5898_v33, %s6429_s20  ;;  %v5900_v23 = vpop.eup %5899 }
0x2599   :  { %v3126_v4 = vadd.f32 1.0, %v5900_v23  ;;  %v5902_v15 = vpop.eup %5901 }
0x259a   :  { %v3127_v37 = vadd.f32 1.0, %v5902_v15 }
0x259b   :  { %5903 = vrcp.f32 %v3126_v4 }
0x259c   :  { %5905 = vrcp.f32 %v3127_v37 }
0x25a5   :  { %v5904_v50 = vpop.eup %5903 }
0x25a6   :  { %v5906_v7 = vpop.eup %5905  ;;  %v3134_v35 = vmul.f32 %v5904_v50, %v7443_v56 }
0x25a7   :  { %v3135_v48 = vmul.f32 %v5906_v7, %v7447_v32 }
0x2608   :  { %v3139_v55 = vpop.permute.xlu1 %3138 }
0x2609   :  { %v3144_v9 = vmul.f32 %v5904_v50, %v3139_v55 }
0x260a   :  { %v3141_v27 = vpop.permute.xlu0 %3140 }
0x260b   :  { %3148 = vrot.lane.b32.xlu1 %v3144_v9, %s6451_s15  ;;  %v3145_v14 = vmul.f32 %v5906_v7, %v3141_v27 }
0x260f   :  { %3150 = vrot.lane.b32.xlu1 %v3145_v14, %s6451_s15 }
0x267d   :  { %v3149_v52 = vpop.permute.xlu1 %3148 }
0x267e   :  { %v7512_v54 = vadd.f32 %v3149_v52, %v3134_v35 }
0x2680   :  { %5907 = vtanh.f32 %v7512_v54 }
0x2681   :  { %v3151_v61 = vpop.permute.xlu1 %3150 }
0x2682   :  { %v7516_v1 = vadd.f32 %v3151_v61, %v3135_v48 }
0x2684   :  { %5909 = vtanh.f32 %v7516_v1 }
0x268a   :  { %v5908_v59 = vpop.eup %5907 }
0x268b   :  { %3160 = vrot.lane.b32.xlu0 %v5908_v59, %s6429_s20 }
0x268e   :  { %v5910_v53 = vpop.eup %5909 }
0x268f   :  { %3162 = vrot.lane.b32.xlu1 %v5910_v53, %s6429_s20 }
0x26fd   :  { %v3161_v5 = vpop.permute.xlu0 %3160 }
0x26fe   :  { %v3166_v18 = vmul.f32 %v5904_v50, %v3161_v5 }
0x2701   :  { %v3163_v56 = vpop.permute.xlu1 %3162 }
0x2702   :  { %v3167_v11 = vmul.f32 %v5906_v7, %v3163_v56 }
0x2704   :  { %v3168_v58 = vpack.c.bf16 %v3167_v11, %v3166_v18 }
0x2706   :  { %3170 = vrot.lane.b32.xlu0 %v3168_v58, %s6451_s15 }
0x2778   :  { %v3171_v60 = vpop.permute.xlu0 %3170 }
0x2779   :  { %5320 = vmatmul.mubr.msk.bf16.vlgmr.msra.gmra.mrb[72].mxu1 %vm634_vm2, %v3171_v60  ;;  %5348 = vmatmul.mubr.msk.bf16.vlgmr.msra.gmra.mrb[68].mxu0 %vm634_vm2, %v3171_v60 }
0x277a   :  { %5324 = vmatpush3.bf16.msra.mxu1 %v7384_v49  ;;  %5339 = vmatprep.mubr.msk.bf16.mxu1 %vm6449_vm1, %v6448_v8 }
0x277b   :  { %5325 = vmatprep.subr.bf16.mxu1 %v6448_v8  ;;  %5352 = vmatpush3.bf16.msra.mxu0 %v7329_v3 }
0x277c   :  { %5353 = vmatprep.mubr.msk.bf16.mxu0 %vm6449_vm1, %v6448_v8  ;;  %5357 = vmatprep.subr.bf16.mxu0 %v6448_v8 }
0x277e   :  { %5326 = vmatpush3.bf16.msra.mxu1 %v7387_v17 }
0x277f   :  { %5327 = vmatprep.subr.bf16.mxu1 %v6448_v8 }
0x2782   :  { %5328 = vmatpush3.bf16.msra.mxu1 %v7391_v36 }
0x2783   :  { %5329 = vmatprep.subr.bf16.mxu1 %v6448_v8 }
0x2786   :  { %5330 = vmatpush3.bf16.msra.mxu1 %v7395_v63 }
0x2787   :  { %5331 = vmatprep.subr.bf16.mxu1 %v6448_v8 }
0x278a   :  { %5332 = vmatpush3.bf16.msra.mxu1 %v7399_v62 }
0x278b   :  { %5333 = vmatprep.subr.bf16.mxu1 %v6448_v8 }
0x278e   :  { %5334 = vmatpush3.bf16.msra.mxu1 %v7403_v26 }
0x278f   :  { %5335 = vmatprep.subr.bf16.mxu1 %v6448_v8 }
0x2792   :  { %5336 = vmatpush3.bf16.msra.mxu1 %v7408_v30 }
0x2793   :  { %5337 = vmatprep.subr.bf16.mxu1 %v6448_v8 }
0x2796   :  { %5338 = vmatpush3.bf16.msra.mxu1 %v7412_v31 }
0x2797   :  { %5385 = vmatprep.subr.bf16.mxu1 %v6448_v8 }
0x284c   :  { %v3209_v3 = vpop.f32.mrb[72].mxu1  ;;  %v7546_v32 = vpop.f32.mrb[68].mxu0 }
0x284d   :  { %v3210_v41 = vadd.f32 %v7372_v46, %v3209_v3  ;;  %v5321_v19 = vpop.f32.mrb[73].mxu1  ;;  %v5349_v13 = vpop.f32.mrb[69].mxu0 }
0x284e   :  { %v3212_v12 = vpop.f32.mrb[74].mxu1  ;;  %v7549_v20 = vpop.f32.mrb[70].mxu0 }
0x284f   :  { %3217 = vst [vmem:[#allocation30 + $0x20] sm:$0xff] %v3210_v41  ;;  %v3213_v25 = vadd.f32 %v7372_v46, %v3212_v12  ;;  %3219 = vmax.xlane.f32.xlu1 %v3210_v41  ;;  %v5322_v24 = vpop.f32.mrb[75].mxu1  ;;  %v5350_v57 = vpop.f32.mrb[71].mxu0 }
0x2851   :  { %3218 = vst [vmem:[#allocation30 + $0x28] sm:$0xff] %v3213_v25  ;;  %3221 = vmax.xlane.f32.xlu0 %v3213_v25 }
0x28dc   :  { %v3220_v34 = vpop.xlane.xlu1 %3219 }
0x28dd   :  { %vm3223_vm7 = vcmp.eq.f32.partialorder %v3210_v41, %v3220_v34 }
0x28de   :  { %v3225_v39 = vsel %vm3223_vm7, %v7380_v51, 128  ;;  %v3222_v6 = vpop.xlane.xlu0 %3221 }
0x28df   :  { %v3228_v28 = vshra.s32 %v3225_v39, 16  ;;  %vm3224_vm8 = vcmp.eq.f32.partialorder %v3213_v25, %v3222_v6  ;;  %v3227_v47 = vand.u32 65535, %v3225_v39 }
0x28e0   :  { %v3226_v29 = vsel %vm3224_vm8, %v7380_v51, 128 }
0x28e1   :  { %v3230_v38 = vcvt.s32.f32 %v3228_v28  ;;  %v3242_v22 = vshra.s32 %v3226_v29, 16  ;;  %v3241_v0 = vand.u32 65535, %v3226_v29  ;;  %v3229_v33 = vcvt.s32.f32 %v3227_v47 }
0x28e3   :  { %v3244_v2 = vcvt.s32.f32 %v3242_v22  ;;  %3231 = vmin.xlane.f32.xlu0 %v3230_v38  ;;  %v3243_v45 = vcvt.s32.f32 %v3241_v0 }
0x28e5   :  { %3245 = vmin.xlane.f32.xlu1 %v3244_v2 }
0x2970   :  { %v3232_v40 = vpop.xlane.xlu0 %3231 }
0x2971   :  { %vm3233_vm10 = vcmp.eq.f32.partialorder %v3230_v38, %v3232_v40  ;;  %v3238_v37 = vcvt.f32.s32 %v3232_v40 }
0x2972   :  { %v3246_v23 = vpop.xlane.xlu1 %3245  ;;  %v3234_v4 = vsel %vm3233_vm10, %v3229_v33, inf }
0x2973   :  { %vm3247_vm11 = vcmp.eq.f32.partialorder %v3244_v2, %v3246_v23  ;;  %3235 = vmin.xlane.f32.xlu0 %v3234_v4  ;;  %v3252_v50 = vcvt.f32.s32 %v3246_v23  ;;  %v3239_v9 = vshll.u32 %v3238_v37, 16 }
0x2974   :  { %v3248_v15 = vsel %vm3247_vm11, %v3243_v45, inf }
0x2975   :  { %3249 = vmin.xlane.f32.xlu1 %v3248_v15  ;;  %v3253_v14 = vshll.u32 %v3252_v50, 16  ;;  %v7597_v15 = vld [vmem:[#allocation19] sm:$0xff]  }
0x2a00   :  { %v3236_v55 = vpop.xlane.xlu0 %3235 }
0x2a01   :  { %v3237_v27 = vcvt.f32.s32 %v3236_v55 }
0x2a02   :  { %v3250_v7 = vpop.xlane.xlu1 %3249 }
0x2a03   :  { %v3240_v35 = vadd.s32 %v3239_v9, %v3237_v27  ;;  %v3251_v52 = vcvt.f32.s32 %v3250_v7 }
0x2a05   :  { %3256 = vst.msk [vmem:[#allocation31 + $0x20] sm:$0xff] %vm2659_vm9, %v3240_v35  ;;  %v3254_v48 = vadd.s32 %v3253_v14, %v3251_v52  ;;  %vm3258_vm12 = vcmp.eq.s32.totalorder %v7380_v51, %v3240_v35 }
0x2a07   :  { %3257 = vst.msk [vmem:[#allocation31 + $0x28] sm:$0xff] %vm2659_vm9, %v3254_v48  ;;  %vm3259_vm13 = vcmp.eq.s32.totalorder %v7380_v51, %v3254_v48 }
0x2a08   :  { %vm4788_vm14 = vmpackc.low %vm3259_vm13, %vm3258_vm12 }
0x2a09   :  { %5340 = vmatmul.mubr.msk.bf16.vlgmr.msra.gmra.mrb[76].mxu1 %vm4788_vm14, %v6452_v10 }
0x2a0a   :  { %5386 = vmatpush3.bf16.msra.mxu1 %v7317_v44  ;;  %5389 = vmatprep.mubr.msk.bf16.mxu1 %vm6449_vm1, %v6448_v8 }
0x2a0b   :  { %5387 = vmatprep.subr.bf16.mxu1 %v6448_v8 }
0x2a0e   :  { %5388 = vmatpush3.bf16.msra.mxu1 %v7323_v21 }
0x2a0f   :  { %5393 = vmatprep.subr.bf16.mxu1 %v6448_v8 }
0x2adc   :  { %v3299_v61 = vpop.f32.mrb[76].mxu1 }
0x2add   :  { %v5341_v59 = vpop.f32.mrb[77].mxu1 }
0x2ade   :  { %v3302_v53 = vpop.f32.mrb[78].mxu1 }
0x2adf   :  { %v3306_v5 = vpack.c.bf16 %v3302_v53, %v3299_v61  ;;  %v5342_v56 = vpop.f32.mrb[79].mxu1 }
0x2ae1   :  { %5354 = vmatmul.mubr.msk.bf16.vlgmr.msra.gmra.mrb[72].mxu0 %vm354_vm0, %v3306_v5 }
0x2ae2   :  { %5358 = vmatpush3.bf16.msra.mxu0 %v7353_v43  ;;  %5361 = vmatprep.mubr.msk.bf16.mxu0 %vm6449_vm1, %v6448_v8 }
0x2ae3   :  { %5359 = vmatprep.subr.bf16.mxu0 %v6448_v8 }
0x2ae6   :  { %5360 = vmatpush3.bf16.msra.mxu0 %v7356_v16 }
0x2ae7   :  { %5365 = vmatprep.subr.bf16.mxu0 %v6448_v8 }
0x2bb4   :  { %v3385_v44 = vpop.f32.mrb[72].mxu0 }
0x2bb5   :  { %v3386_v21 = vadd.f32 %v3385_v44, %v7546_v32  ;;  %v5355_v18 = vpop.f32.mrb[73].mxu0 }
0x2bb6   :  { %v3388_v11 = vpop.f32.mrb[74].mxu0 }
0x2bb7   :  { %v3392_v58 = vadd.f32 %v7339_v42, %v3386_v21  ;;  %v3389_v60 = vadd.f32 %v3388_v11, %v7549_v20  ;;  %v5356_v3 = vpop.f32.mrb[75].mxu0 }
0x2bb9   :  { %5911 = vtanh.f32 %v3392_v58  ;;  %v3393_v43 = vadd.f32 %v7339_v42, %v3389_v60  ;;  %v4792_v19 = vmul.f32 -1.442695, %v3392_v58 }
0x2bbb   :  { %5913 = vtanh.f32 %v3393_v43  ;;  %v4793_v13 = vmul.f32 -1.442695, %v3393_v43 }
0x2bbc   :  { %5915 = vpow2.f32 %v4792_v19 }
0x2bbd   :  { %5917 = vpow2.f32 %v4793_v13 }
0x2bc3   :  { %v5912_v41 = vpop.eup %5911 }
0x2bc4   :  { %3412 = vrot.lane.b32.xlu0 %v5912_v41, %s6429_s20 }
0x2bc5   :  { %v5914_v16 = vpop.eup %5913 }
0x2bc6   :  { %3414 = vrot.lane.b32.xlu1 %v5914_v16, %s6429_s20  ;;  %v5916_v32 = vpop.eup %5915 }
0x2bc7   :  { %v5918_v12 = vpop.eup %5917  ;;  %v3400_v25 = vadd.f32 1.0, %v5916_v32  ;;  %v7630_v32 = vld [vmem:[#allocation21] sm:$0xff]  }
0x2bc8   :  { %v3401_v24 = vadd.f32 1.0, %v5918_v12  ;;  %v7636_v12 = vld [vmem:[#allocation21 + $0x8] sm:$0xff]  }
0x2bc9   :  { %5919 = vrcp.f32 %v3400_v25 }
0x2bca   :  { %5921 = vrcp.f32 %v3401_v24 }
0x2bd3   :  { %v5920_v20 = vpop.eup %5919 }
0x2bd4   :  { %v5922_v34 = vpop.eup %5921  ;;  %v3408_v28 = vmul.f32 %v5920_v20, %v7512_v54 }
0x2bd5   :  { %v3409_v22 = vmul.f32 %v5922_v34, %v7516_v1 }
0x2c36   :  { %v3413_v57 = vpop.permute.xlu0 %3412 }
0x2c37   :  { %v3418_v42 = vmul.f32 %v5920_v20, %v3413_v57 }
0x2c38   :  { %v3415_v39 = vpop.permute.xlu1 %3414 }
0x2c39   :  { %3422 = vrot.lane.b32.xlu1 %v3418_v42, %s6451_s15  ;;  %v3419_v6 = vmul.f32 %v5922_v34, %v3415_v39  ;;  %v7647_v39 = vld [vmem:[#allocation24 + $0x8] sm:$0xff]  }
0x2c3b   :  { %3424 = vrot.lane.b32.xlu0 %v3419_v6, %s6451_s15 }
0x2cab   :  { %v3423_v29 = vpop.permute.xlu1 %3422 }
0x2cac   :  { %v7581_v38 = vadd.f32 %v3423_v29, %v3408_v28 }
0x2cad   :  { %v3425_v2 = vpop.permute.xlu0 %3424 }
0x2cae   :  { %5923 = vtanh.f32 %v7581_v38  ;;  %v7585_v47 = vadd.f32 %v3425_v2, %v3409_v22  ;;  %v7652_v2 = vld [vmem:[#allocation22] ss:$0 sm:$0xff] }
0x2cb0   :  { %5925 = vtanh.f32 %v7585_v47 }
0x2cb8   :  { %v5924_v0 = vpop.eup %5923 }
0x2cb9   :  { %3434 = vrot.lane.b32.xlu1 %v5924_v0, %s6429_s20 }
0x2cba   :  { %v5926_v33 = vpop.eup %5925 }
0x2cbb   :  { %3436 = vrot.lane.b32.xlu0 %v5926_v33, %s6429_s20 }
0x2d2b   :  { %v3435_v40 = vpop.permute.xlu1 %3434 }
0x2d2c   :  { %v3440_v45 = vmul.f32 %v5920_v20, %v3435_v40 }
0x2d2d   :  { %v3437_v54 = vpop.permute.xlu0 %3436 }
0x2d2e   :  { %v3441_v23 = vmul.f32 %v5922_v34, %v3437_v54  ;;  %v7641_v34 = vld [vmem:[#allocation24] sm:$0xff]  }
0x2d30   :  { %v3442_v4 = vpack.c.bf16 %v3441_v23, %v3440_v45 }
0x2d32   :  { %3444 = vrot.lane.b32.xlu1 %v3442_v4, %s6451_s15 }
0x2da4   :  { %v3445_v1 = vpop.permute.xlu1 %3444 }
0x2da5   :  { %5362 = vmatmul.mubr.msk.bf16.vlgmr.msra.gmra.mrb[76].mxu0 %vm634_vm2, %v3445_v1  ;;  %5390 = vmatmul.mubr.msk.bf16.vlgmr.msra.gmra.mrb[80].mxu1 %vm634_vm2, %v3445_v1 }
0x2da6   :  { %5366 = vmatpush3.bf16.msra.mxu0 %v7384_v49  ;;  %5381 = vmatprep.mubr.msk.bf16.mxu0 %vm6449_vm1, %v6448_v8 }
0x2da7   :  { %5367 = vmatprep.subr.bf16.mxu0 %v6448_v8  ;;  %5394 = vmatpush3.bf16.msra.mxu1 %v7597_v15 }
0x2da8   :  { %5395 = vmatprep.mubr.msk.bf16.mxu1 %vm6449_vm1, %v6448_v8  ;;  %5399 = vmatprep.subr.bf16.mxu1 %v6448_v8 }
0x2daa   :  { %5368 = vmatpush3.bf16.msra.mxu0 %v7387_v17 }
0x2dab   :  { %5369 = vmatprep.subr.bf16.mxu0 %v6448_v8 }
0x2dae   :  { %5370 = vmatpush3.bf16.msra.mxu0 %v7391_v36 }
0x2daf   :  { %5371 = vmatprep.subr.bf16.mxu0 %v6448_v8 }
0x2db2   :  { %5372 = vmatpush3.bf16.msra.mxu0 %v7395_v63 }
0x2db3   :  { %5373 = vmatprep.subr.bf16.mxu0 %v6448_v8 }
0x2db6   :  { %5374 = vmatpush3.bf16.msra.mxu0 %v7399_v62 }
0x2db7   :  { %5375 = vmatprep.subr.bf16.mxu0 %v6448_v8 }
0x2dba   :  { %5376 = vmatpush3.bf16.msra.mxu0 %v7403_v26 }
0x2dbb   :  { %5377 = vmatprep.subr.bf16.mxu0 %v6448_v8 }
0x2dbe   :  { %5378 = vmatpush3.bf16.msra.mxu0 %v7408_v30 }
0x2dbf   :  { %5379 = vmatprep.subr.bf16.mxu0 %v6448_v8 }
0x2dc2   :  { %5380 = vmatpush3.bf16.msra.mxu0 %v7412_v31 }
0x2dc3   :  { %5427 = vmatprep.subr.bf16.mxu0 %v6448_v8 }
0x2e78   :  { %v3483_v49 = vpop.f32.mrb[76].mxu0  ;;  %v7617_v17 = vpop.f32.mrb[80].mxu1 }
0x2e79   :  { %v3484_v36 = vadd.f32 %v7372_v46, %v3483_v49  ;;  %v5363_v63 = vpop.f32.mrb[77].mxu0  ;;  %v5391_v62 = vpop.f32.mrb[81].mxu1 }
0x2e7a   :  { %v3486_v37 = vpop.f32.mrb[78].mxu0  ;;  %v7620_v50 = vpop.f32.mrb[82].mxu1 }
0x2e7b   :  { %3491 = vst [vmem:[#allocation30 + $0x30] sm:$0xff] %v3484_v36  ;;  %v3487_v26 = vadd.f32 %v7372_v46, %v3486_v37  ;;  %v5392_v30 = vpop.f32.mrb[83].mxu1  ;;  %3493 = vmax.xlane.f32.xlu0 %v3484_v36  ;;  %v5364_v55 = vpop.f32.mrb[79].mxu0 }
0x2e7d   :  { %3492 = vst [vmem:[#allocation30 + $0x38] sm:$0xff] %v3487_v26  ;;  %3495 = vmax.xlane.f32.xlu1 %v3487_v26 }
0x2f08   :  { %v3494_v31 = vpop.xlane.xlu0 %3493 }
0x2f09   :  { %vm3497_vm15 = vcmp.eq.f32.partialorder %v3484_v36, %v3494_v31 }
0x2f0a   :  { %v3499_v9 = vsel %vm3497_vm15, %v7380_v51, 128  ;;  %v3496_v27 = vpop.xlane.xlu1 %3495 }
0x2f0b   :  { %v3502_v7 = vshra.s32 %v3499_v9, 16  ;;  %vm3498_vm3 = vcmp.eq.f32.partialorder %v3487_v26, %v3496_v27  ;;  %v3501_v46 = vand.u32 65535, %v3499_v9 }
0x2f0c   :  { %v3500_v14 = vsel %vm3498_vm3, %v7380_v51, 128 }
0x2f0d   :  { %v3504_v35 = vcvt.s32.f32 %v3502_v7  ;;  %v3516_v52 = vshra.s32 %v3500_v14, 16  ;;  %v3503_v61 = vcvt.s32.f32 %v3501_v46  ;;  %v3515_v59 = vand.u32 65535, %v3500_v14 }
0x2f0f   :  { %3505 = vmin.xlane.f32.xlu0 %v3504_v35  ;;  %v3518_v48 = vcvt.s32.f32 %v3516_v52  ;;  %v3517_v56 = vcvt.s32.f32 %v3515_v59 }
0x2f13   :  { %3519 = vmin.xlane.f32.xlu0 %v3518_v48 }
0x2f9c   :  { %v3506_v53 = vpop.xlane.xlu0 %3505 }
0x2f9d   :  { %vm3507_vm4 = vcmp.eq.f32.partialorder %v3504_v35, %v3506_v53  ;;  %v3512_v18 = vcvt.f32.s32 %v3506_v53 }
0x2f9e   :  { %v3508_v5 = vsel %vm3507_vm4, %v3503_v61, inf }
0x2f9f   :  { %3509 = vmin.xlane.f32.xlu1 %v3508_v5  ;;  %v3513_v58 = vshll.u32 %v3512_v18, 16  ;;  %v7696_v18 = vld [vmem:[#allocation27 + $0x20] sm:$0xff]  }
0x2fa0   :  { %v3520_v44 = vpop.xlane.xlu0 %3519 }
0x2fa1   :  { %vm3521_vm5 = vcmp.eq.f32.partialorder %v3518_v48, %v3520_v44  ;;  %v3526_v60 = vcvt.f32.s32 %v3520_v44  ;;  %v7688_v44 = vld [vmem:[#allocation27 + $0x10] sm:$0xff]  }
0x2fa2   :  { %v3522_v21 = vsel %vm3521_vm5, %v3517_v56, inf  ;;  %v7684_v56 = vld [vmem:[#allocation27 + $0x8] sm:$0xff]  }
0x2fa3   :  { %3523 = vmin.xlane.f32.xlu0 %v3522_v21  ;;  %v3527_v16 = vshll.u32 %v3526_v60, 16  ;;  %v7692_v21 = vld [vmem:[#allocation27 + $0x18] sm:$0xff]  }
0x2fa4   :  { %v7708_v60 = vld [vmem:[#allocation27 + $0x38] sm:$0xff]  }
0x302c   :  { %v3510_v11 = vpop.xlane.xlu1 %3509 }
0x302d   :  { %v3511_v3 = vcvt.f32.s32 %v3510_v11  ;;  %v7700_v11 = vld [vmem:[#allocation27 + $0x28] sm:$0xff]  }
0x302f   :  { %v3514_v43 = vadd.s32 %v3513_v58, %v3511_v3  ;;  %v7704_v58 = vld [vmem:[#allocation27 + $0x30] sm:$0xff]  }
0x3030   :  { %v3524_v41 = vpop.xlane.xlu0 %3523 }
0x3031   :  { %3530 = vst.msk [vmem:[#allocation31 + $0x30] sm:$0xff] %vm2659_vm9, %v3514_v43  ;;  %v3525_v19 = vcvt.f32.s32 %v3524_v41  ;;  %vm3532_vm6 = vcmp.eq.s32.totalorder %v7380_v51, %v3514_v43  ;;  %v7714_v41 = vld [vmem:[#allocation25] ss:$0 sm:$0xff] }
0x3033   :  { %v3528_v13 = vadd.s32 %v3527_v16, %v3525_v19 }
0x3035   :  { %3531 = vst.msk [vmem:[#allocation31 + $0x38] sm:$0xff] %vm2659_vm9, %v3528_v13  ;;  %vm3533_vm7 = vcmp.eq.s32.totalorder %v7380_v51, %v3528_v13 }
0x3036   :  { %vm4797_vm8 = vmpackc.low %vm3533_vm7, %vm3532_vm6 }
0x3037   :  { %5382 = vmatmul.mubr.msk.bf16.vlgmr.msra.gmra.mrb[80].mxu0 %vm4797_vm8, %v6452_v10 }
0x3038   :  { %5428 = vmatpush3.bf16.msra.mxu0 %v7630_v32  ;;  %5431 = vmatprep.mubr.msk.bf16.mxu0 %vm6449_vm1, %v6448_v8 }
0x3039   :  { %5429 = vmatprep.subr.bf16.mxu0 %v6448_v8 }
0x303c   :  { %5430 = vmatpush3.bf16.msra.mxu0 %v7636_v12 }
0x303d   :  { %5435 = vmatprep.subr.bf16.mxu0 %v6448_v8 }
0x310a   :  { %v3573_v25 = vpop.f32.mrb[80].mxu0 }
0x310b   :  { %v5383_v24 = vpop.f32.mrb[81].mxu0 }
0x310c   :  { %v3576_v20 = vpop.f32.mrb[82].mxu0 }
0x310d   :  { %v3580_v57 = vpack.c.bf16 %v3576_v20, %v3573_v25  ;;  %v5384_v42 = vpop.f32.mrb[83].mxu0 }
0x310f   :  { %5396 = vmatmul.mubr.msk.bf16.vlgmr.msra.gmra.mrb[84].mxu1 %vm354_vm0, %v3580_v57 }
0x3110   :  { %5400 = vmatpush3.bf16.msra.mxu1 %v7641_v34  ;;  %5403 = vmatprep.mubr.msk.bf16.mxu1 %vm6449_vm1, %v6448_v8 }
0x3111   :  { %5401 = vmatprep.subr.bf16.mxu1 %v6448_v8 }
0x3114   :  { %5402 = vmatpush3.bf16.msra.mxu1 %v7647_v39 }
0x3115   :  { %5407 = vmatprep.subr.bf16.mxu1 %v6448_v8 }
0x31e2   :  { %v3659_v6 = vpop.f32.mrb[84].mxu1 }
0x31e3   :  { %v3660_v28 = vadd.f32 %v3659_v6, %v7617_v17  ;;  %v5397_v29 = vpop.f32.mrb[85].mxu1 }
0x31e4   :  { %v3662_v22 = vpop.f32.mrb[86].mxu1 }
0x31e5   :  { %v3666_v0 = vadd.f32 %v7652_v2, %v3660_v28  ;;  %v3663_v33 = vadd.f32 %v3662_v22, %v7620_v50  ;;  %v5398_v40 = vpop.f32.mrb[87].mxu1 }
0x31e7   :  { %5927 = vtanh.f32 %v3666_v0  ;;  %v3667_v54 = vadd.f32 %v7652_v2, %v3663_v33  ;;  %v4801_v4 = vmul.f32 -1.442695, %v3666_v0 }
0x31e9   :  { %5929 = vtanh.f32 %v3667_v54  ;;  %v4802_v1 = vmul.f32 -1.442695, %v3667_v54 }
0x31ea   :  { %5931 = vpow2.f32 %v4801_v4 }
0x31eb   :  { %5933 = vpow2.f32 %v4802_v1 }
0x31f1   :  { %v5928_v45 = vpop.eup %5927 }
0x31f2   :  { %3686 = vrot.lane.b32.xlu1 %v5928_v45, %s6429_s20 }
0x31f3   :  { %v5930_v23 = vpop.eup %5929 }
0x31f4   :  { %3688 = vrot.lane.b32.xlu0 %v5930_v23, %s6429_s20  ;;  %v5932_v49 = vpop.eup %5931 }
0x31f5   :  { %v3674_v17 = vadd.f32 1.0, %v5932_v49  ;;  %v5934_v36 = vpop.eup %5933 }
0x31f6   :  { %v3675_v63 = vadd.f32 1.0, %v5934_v36 }
0x31f7   :  { %5935 = vrcp.f32 %v3674_v17 }
0x31f8   :  { %5937 = vrcp.f32 %v3675_v63 }
0x3201   :  { %v5936_v62 = vpop.eup %5935 }
0x3202   :  { %v5938_v30 = vpop.eup %5937  ;;  %v3682_v31 = vmul.f32 %v5936_v62, %v7581_v38 }
0x3203   :  { %v3683_v7 = vmul.f32 %v5938_v30, %v7585_v47  ;;  %v7674_v47 = vld [vmem:[#allocation27] sm:$0xff]  }
0x3264   :  { %v3687_v37 = vpop.permute.xlu1 %3686 }
0x3265   :  { %v3692_v50 = vmul.f32 %v5936_v62, %v3687_v37 }
0x3266   :  { %v3689_v26 = vpop.permute.xlu0 %3688 }
0x3267   :  { %3696 = vrot.lane.b32.xlu1 %v3692_v50, %s6451_s15  ;;  %v3693_v55 = vmul.f32 %v5938_v30, %v3689_v26 }
0x326b   :  { %3698 = vrot.lane.b32.xlu1 %v3693_v55, %s6451_s15 }
0x32d9   :  { %v3697_v9 = vpop.permute.xlu1 %3696 }
0x32da   :  { %v7662_v27 = vadd.f32 %v3697_v9, %v3682_v31 }
0x32dc   :  { %5939 = vtanh.f32 %v7662_v27 }
0x32dd   :  { %v3699_v14 = vpop.permute.xlu1 %3698 }
0x32de   :  { %v7666_v35 = vadd.f32 %v3699_v14, %v3683_v7 }
0x32e0   :  { %5941 = vtanh.f32 %v7666_v35 }
0x32e6   :  { %v5940_v52 = vpop.eup %5939 }
0x32e7   :  { %3708 = vrot.lane.b32.xlu0 %v5940_v52, %s6429_s20 }
0x32ea   :  { %v5942_v48 = vpop.eup %5941 }
0x32eb   :  { %3710 = vrot.lane.b32.xlu1 %v5942_v48, %s6429_s20 }
0x3359   :  { %v3709_v46 = vpop.permute.xlu0 %3708 }
0x335a   :  { %v3714_v61 = vmul.f32 %v5936_v62, %v3709_v46 }
0x335d   :  { %v3711_v38 = vpop.permute.xlu1 %3710 }
0x335e   :  { %v3715_v59 = vmul.f32 %v5938_v30, %v3711_v38 }
0x3360   :  { %v3716_v53 = vpack.c.bf16 %v3715_v59, %v3714_v61 }
0x3362   :  { %3718 = vrot.lane.b32.xlu0 %v3716_v53, %s6451_s15 }
0x33d4   :  { %v3719_v5 = vpop.permute.xlu0 %3718 }
0x33d5   :  { %5404 = vmatmul.mubr.msk.bf16.vlgmr.msra.gmra.mrb[88].mxu1 %vm634_vm2, %v3719_v5  ;;  %5432 = vmatmul.mubr.msk.bf16.vlgmr.msra.gmra.mrb[84].mxu0 %vm634_vm2, %v3719_v5 }
0x33d6   :  { %5408 = vmatpush3.bf16.msra.mxu1 %v7674_v47  ;;  %5423 = vmatprep.mubr.msk.bf16.mxu1 %vm6449_vm1, %v6448_v8 }
0x33d7   :  { %5409 = vmatprep.subr.bf16.mxu1 %v6448_v8  ;;  %5436 = vmatpush3.bf16.msra.mxu0 %v7597_v15 }
0x33d8   :  { %5437 = vmatprep.mubr.msk.bf16.mxu0 %vm6449_vm1, %v6448_v8  ;;  %5441 = vmatprep.subr.bf16.mxu0 %v6448_v8 }
0x33da   :  { %5410 = vmatpush3.bf16.msra.mxu1 %v7684_v56 }
0x33db   :  { %5411 = vmatprep.subr.bf16.mxu1 %v6448_v8 }
0x33de   :  { %5412 = vmatpush3.bf16.msra.mxu1 %v7688_v44 }
0x33df   :  { %5413 = vmatprep.subr.bf16.mxu1 %v6448_v8 }
0x33e2   :  { %5414 = vmatpush3.bf16.msra.mxu1 %v7692_v21 }
0x33e3   :  { %5415 = vmatprep.subr.bf16.mxu1 %v6448_v8 }
0x33e6   :  { %5416 = vmatpush3.bf16.msra.mxu1 %v7696_v18 }
0x33e7   :  { %5417 = vmatprep.subr.bf16.mxu1 %v6448_v8 }
0x33ea   :  { %5418 = vmatpush3.bf16.msra.mxu1 %v7700_v11 }
0x33eb   :  { %5419 = vmatprep.subr.bf16.mxu1 %v6448_v8 }
0x33ee   :  { %5420 = vmatpush3.bf16.msra.mxu1 %v7704_v58 }
0x33ef   :  { %5421 = vmatprep.subr.bf16.mxu1 %v6448_v8 }
0x33f2   :  { %5422 = vmatpush3.bf16.msra.mxu1 %v7708_v60 }
0x33f3   :  { %5469 = vmatprep.subr.bf16.mxu1 %v6448_v8 }
0x34a8   :  { %v3757_v3 = vpop.f32.mrb[88].mxu1  ;;  %v7712_v43 = vpop.f32.mrb[84].mxu0 }
0x34a9   :  { %v3758_v16 = vadd.f32 %v7714_v41, %v3757_v3  ;;  %v5405_v19 = vpop.f32.mrb[89].mxu1  ;;  %v5433_v13 = vpop.f32.mrb[85].mxu0 }
0x34aa   :  { %v3760_v25 = vpop.f32.mrb[90].mxu1  ;;  %v7717_v24 = vpop.f32.mrb[86].mxu0 }
0x34ab   :  { %3765 = vst [vmem:[#allocation30 + $0x40] sm:$0xff] %v3758_v16  ;;  %v3761_v20 = vadd.f32 %v7714_v41, %v3760_v25  ;;  %3767 = vmax.xlane.f32.xlu1 %v3758_v16  ;;  %v5406_v57 = vpop.f32.mrb[91].mxu1  ;;  %v5434_v42 = vpop.f32.mrb[87].mxu0 }
0x34ad   :  { %3766 = vst [vmem:[#allocation30 + $0x48] sm:$0xff] %v3761_v20  ;;  %3769 = vmax.xlane.f32.xlu0 %v3761_v20 }
0x3538   :  { %v3768_v6 = vpop.xlane.xlu1 %3767 }
0x3539   :  { %vm3771_vm10 = vcmp.eq.f32.partialorder %v3758_v16, %v3768_v6 }
0x353a   :  { %v3773_v28 = vsel %vm3771_vm10, %v7380_v51, 128  ;;  %v3770_v29 = vpop.xlane.xlu0 %3769 }
0x353b   :  { %v3776_v22 = vshra.s32 %v3773_v28, 16  ;;  %vm3772_vm11 = vcmp.eq.f32.partialorder %v3761_v20, %v3770_v29  ;;  %v3775_v45 = vand.u32 65535, %v3773_v28 }
0x353c   :  { %v3774_v0 = vsel %vm3772_vm11, %v7380_v51, 128 }
0x353d   :  { %v3778_v33 = vcvt.s32.f32 %v3776_v22  ;;  %v3790_v40 = vshra.s32 %v3774_v0, 16  ;;  %v3789_v23 = vand.u32 65535, %v3774_v0  ;;  %v3777_v4 = vcvt.s32.f32 %v3775_v45 }
0x353f   :  { %v3792_v54 = vcvt.s32.f32 %v3790_v40  ;;  %3779 = vmin.xlane.f32.xlu0 %v3778_v33  ;;  %v3791_v49 = vcvt.s32.f32 %v3789_v23 }
0x3541   :  { %3793 = vmin.xlane.f32.xlu1 %v3792_v54 }
0x35cc   :  { %v3780_v1 = vpop.xlane.xlu0 %3779 }
0x35cd   :  { %vm3781_vm12 = vcmp.eq.f32.partialorder %v3778_v33, %v3780_v1  ;;  %v3786_v62 = vcvt.f32.s32 %v3780_v1 }
0x35ce   :  { %v3794_v17 = vpop.xlane.xlu1 %3793  ;;  %v3782_v36 = vsel %vm3781_vm12, %v3777_v4, inf }
0x35cf   :  { %vm3795_vm13 = vcmp.eq.f32.partialorder %v3792_v54, %v3794_v17  ;;  %3783 = vmin.xlane.f32.xlu0 %v3782_v36  ;;  %v3800_v37 = vcvt.f32.s32 %v3794_v17  ;;  %v3787_v26 = vshll.u32 %v3786_v62, 16 }
0x35d0   :  { %v3796_v63 = vsel %vm3795_vm13, %v3791_v49, inf }
0x35d1   :  { %3797 = vmin.xlane.f32.xlu1 %v3796_v63  ;;  %v3801_v31 = vshll.u32 %v3800_v37, 16 }
0x365c   :  { %v3784_v50 = vpop.xlane.xlu0 %3783 }
0x365d   :  { %v3785_v30 = vcvt.f32.s32 %v3784_v50 }
0x365e   :  { %v3798_v55 = vpop.xlane.xlu1 %3797 }
0x365f   :  { %v3788_v9 = vadd.s32 %v3787_v26, %v3785_v30  ;;  %v3799_v7 = vcvt.f32.s32 %v3798_v55 }
0x3661   :  { %3804 = vst.msk [vmem:[#allocation31 + $0x40] sm:$0xff] %vm2659_vm9, %v3788_v9  ;;  %v3802_v14 = vadd.s32 %v3801_v31, %v3799_v7  ;;  %vm3806_vm14 = vcmp.eq.s32.totalorder %v7380_v51, %v3788_v9 }
0x3663   :  { %3805 = vst.msk [vmem:[#allocation31 + $0x48] sm:$0xff] %vm2659_vm9, %v3802_v14  ;;  %vm3807_vm15 = vcmp.eq.s32.totalorder %v7380_v51, %v3802_v14 }
0x3664   :  { %vm4806_vm3 = vmpackc.low %vm3807_vm15, %vm3806_vm14 }
0x3665   :  { %5424 = vmatmul.mubr.msk.bf16.vlgmr.msra.gmra.mrb[92].mxu1 %vm4806_vm3, %v6452_v10 }
0x3666   :  { %5470 = vmatpush3.bf16.msra.mxu1 %v7630_v32  ;;  %5473 = vmatprep.mubr.msk.bf16.mxu1 %vm6449_vm1, %v6448_v8 }
0x3667   :  { %5471 = vmatprep.subr.bf16.mxu1 %v6448_v8 }
0x366a   :  { %5472 = vmatpush3.bf16.msra.mxu1 %v7636_v12 }
0x366b   :  { %5477 = vmatprep.subr.bf16.mxu1 %v6448_v8 }
0x3738   :  { %v3847_v52 = vpop.f32.mrb[92].mxu1 }
0x3739   :  { %v5425_v48 = vpop.f32.mrb[93].mxu1 }
0x373a   :  { %v3850_v46 = vpop.f32.mrb[94].mxu1 }
0x373b   :  { %v3854_v38 = vpack.c.bf16 %v3850_v46, %v3847_v52  ;;  %v5426_v61 = vpop.f32.mrb[95].mxu1 }
0x373d   :  { %5438 = vmatmul.mubr.msk.bf16.vlgmr.msra.gmra.mrb[88].mxu0 %vm354_vm0, %v3854_v38 }
0x373e   :  { %5442 = vmatpush3.bf16.msra.mxu0 %v7641_v34  ;;  %5445 = vmatprep.mubr.msk.bf16.mxu0 %vm6449_vm1, %v6448_v8 }
0x373f   :  { %5443 = vmatprep.subr.bf16.mxu0 %v6448_v8 }
0x3742   :  { %5444 = vmatpush3.bf16.msra.mxu0 %v7647_v39 }
0x3743   :  { %5449 = vmatprep.subr.bf16.mxu0 %v6448_v8 }
0x3810   :  { %v3933_v59 = vpop.f32.mrb[88].mxu0 }
0x3811   :  { %v3934_v53 = vadd.f32 %v3933_v59, %v7712_v43  ;;  %v5439_v5 = vpop.f32.mrb[89].mxu0 }
0x3812   :  { %v3936_v3 = vpop.f32.mrb[90].mxu0 }
0x3813   :  { %v3940_v16 = vadd.f32 %v7652_v2, %v3934_v53  ;;  %v3937_v19 = vadd.f32 %v3936_v3, %v7717_v24  ;;  %v5440_v13 = vpop.f32.mrb[91].mxu0 }
0x3815   :  { %5943 = vtanh.f32 %v3940_v16  ;;  %v3941_v25 = vadd.f32 %v7652_v2, %v3937_v19  ;;  %v4810_v42 = vmul.f32 -1.442695, %v3940_v16 }
0x3817   :  { %5945 = vtanh.f32 %v3941_v25  ;;  %v4811_v6 = vmul.f32 -1.442695, %v3941_v25 }
0x3818   :  { %5947 = vpow2.f32 %v4810_v42 }
0x3819   :  { %5949 = vpow2.f32 %v4811_v6 }
0x381f   :  { %v5944_v20 = vpop.eup %5943 }
0x3820   :  { %3960 = vrot.lane.b32.xlu0 %v5944_v20, %s6429_s20 }
0x3821   :  { %v5946_v57 = vpop.eup %5945 }
0x3822   :  { %3962 = vrot.lane.b32.xlu1 %v5946_v57, %s6429_s20  ;;  %v5948_v43 = vpop.eup %5947 }
0x3823   :  { %v5950_v28 = vpop.eup %5949  ;;  %v3948_v29 = vadd.f32 1.0, %v5948_v43 }
0x3824   :  { %v3949_v22 = vadd.f32 1.0, %v5950_v28 }
0x3825   :  { %5951 = vrcp.f32 %v3948_v29 }
0x3826   :  { %5953 = vrcp.f32 %v3949_v22 }
0x382f   :  { %v5952_v24 = vpop.eup %5951 }
0x3830   :  { %v5954_v40 = vpop.eup %5953  ;;  %v3956_v23 = vmul.f32 %v5952_v24, %v7662_v27 }
0x3831   :  { %v3957_v49 = vmul.f32 %v5954_v40, %v7666_v35 }
0x3892   :  { %v3961_v0 = vpop.permute.xlu0 %3960 }
0x3893   :  { %v3966_v33 = vmul.f32 %v5952_v24, %v3961_v0 }
0x3894   :  { %v3963_v54 = vpop.permute.xlu1 %3962 }
0x3895   :  { %3970 = vrot.lane.b32.xlu1 %v3966_v33, %s6451_s15  ;;  %v3967_v45 = vmul.f32 %v5954_v40, %v3963_v54 }
0x3897   :  { %3972 = vrot.lane.b32.xlu0 %v3967_v45, %s6451_s15 }
0x3907   :  { %v3971_v4 = vpop.permute.xlu1 %3970 }
0x3908   :  { %v7749_v1 = vadd.f32 %v3971_v4, %v3956_v23 }
0x3909   :  { %v3973_v17 = vpop.permute.xlu0 %3972 }
0x390a   :  { %5955 = vtanh.f32 %v7749_v1  ;;  %v7753_v36 = vadd.f32 %v3973_v17, %v3957_v49 }
0x390c   :  { %5957 = vtanh.f32 %v7753_v36 }
0x3914   :  { %v5956_v63 = vpop.eup %5955 }
0x3915   :  { %3982 = vrot.lane.b32.xlu1 %v5956_v63, %s6429_s20 }
0x3916   :  { %v5958_v62 = vpop.eup %5957 }
0x3917   :  { %3984 = vrot.lane.b32.xlu0 %v5958_v62, %s6429_s20 }
0x3987   :  { %v3983_v37 = vpop.permute.xlu1 %3982 }
0x3988   :  { %v3988_v50 = vmul.f32 %v5952_v24, %v3983_v37 }
0x3989   :  { %v3985_v27 = vpop.permute.xlu0 %3984 }
0x398a   :  { %v3989_v26 = vmul.f32 %v5954_v40, %v3985_v27 }
0x398c   :  { %v3990_v30 = vpack.c.bf16 %v3989_v26, %v3988_v50 }
0x398e   :  { %3992 = vrot.lane.b32.xlu1 %v3990_v30, %s6451_s15 }
0x3a00   :  { %v3993_v35 = vpop.permute.xlu1 %3992 }
0x3a01   :  { %5446 = vmatmul.mubr.msk.bf16.vlgmr.msra.gmra.mrb[92].mxu0 %vm634_vm2, %v3993_v35  ;;  %5474 = vmatmul.mubr.msk.bf16.vlgmr.msra.gmra.mrb[96].mxu1 %vm634_vm2, %v3993_v35 }
0x3a02   :  { %5450 = vmatpush3.bf16.msra.mxu0 %v7674_v47  ;;  %5465 = vmatprep.mubr.msk.bf16.mxu0 %vm6449_vm1, %v6448_v8 }
0x3a03   :  { %5451 = vmatprep.subr.bf16.mxu0 %v6448_v8  ;;  %5478 = vmatpush3.bf16.msra.mxu1 %v7597_v15 }
0x3a04   :  { %5479 = vmatprep.mubr.msk.bf16.mxu1 %vm6449_vm1, %v6448_v8  ;;  %5483 = vmatprep.subr.bf16.mxu1 %v6448_v8 }
0x3a06   :  { %5452 = vmatpush3.bf16.msra.mxu0 %v7684_v56 }
0x3a07   :  { %5453 = vmatprep.subr.bf16.mxu0 %v6448_v8 }
0x3a0a   :  { %5454 = vmatpush3.bf16.msra.mxu0 %v7688_v44 }
0x3a0b   :  { %5455 = vmatprep.subr.bf16.mxu0 %v6448_v8 }
0x3a0e   :  { %5456 = vmatpush3.bf16.msra.mxu0 %v7692_v21 }
0x3a0f   :  { %5457 = vmatprep.subr.bf16.mxu0 %v6448_v8 }
0x3a12   :  { %5458 = vmatpush3.bf16.msra.mxu0 %v7696_v18 }
0x3a13   :  { %5459 = vmatprep.subr.bf16.mxu0 %v6448_v8 }
0x3a16   :  { %5460 = vmatpush3.bf16.msra.mxu0 %v7700_v11 }
0x3a17   :  { %5461 = vmatprep.subr.bf16.mxu0 %v6448_v8 }
0x3a1a   :  { %5462 = vmatpush3.bf16.msra.mxu0 %v7704_v58 }
0x3a1b   :  { %5463 = vmatprep.subr.bf16.mxu0 %v6448_v8 }
0x3a1e   :  { %5464 = vmatpush3.bf16.msra.mxu0 %v7708_v60 }
0x3a1f   :  { %5511 = vmatprep.subr.bf16.mxu0 %v6448_v8 }
0x3ad4   :  { %v4031_v55 = vpop.f32.mrb[92].mxu0  ;;  %v7783_v31 = vpop.f32.mrb[96].mxu1 }
0x3ad5   :  { %v4032_v9 = vadd.f32 %v7714_v41, %v4031_v55  ;;  %v5447_v7 = vpop.f32.mrb[93].mxu0  ;;  %v5475_v14 = vpop.f32.mrb[97].mxu1 }
0x3ad6   :  { %v4034_v52 = vpop.f32.mrb[94].mxu0  ;;  %v7786_v48 = vpop.f32.mrb[98].mxu1 }
0x3ad7   :  { %4039 = vst [vmem:[#allocation30 + $0x50] sm:$0xff] %v4032_v9  ;;  %v4035_v46 = vadd.f32 %v7714_v41, %v4034_v52  ;;  %v5476_v38 = vpop.f32.mrb[99].mxu1  ;;  %4041 = vmax.xlane.f32.xlu0 %v4032_v9  ;;  %v5448_v61 = vpop.f32.mrb[95].mxu0 }
0x3ad9   :  { %4040 = vst [vmem:[#allocation30 + $0x58] sm:$0xff] %v4035_v46  ;;  %4043 = vmax.xlane.f32.xlu1 %v4035_v46 }
0x3b64   :  { %v4042_v59 = vpop.xlane.xlu0 %4041 }
0x3b65   :  { %vm4045_vm4 = vcmp.eq.f32.partialorder %v4032_v9, %v4042_v59 }
0x3b66   :  { %v4047_v53 = vsel %vm4045_vm4, %v7380_v51, 128  ;;  %v4044_v5 = vpop.xlane.xlu1 %4043 }
0x3b67   :  { %v4050_v3 = vshra.s32 %v4047_v53, 16  ;;  %vm4046_vm5 = vcmp.eq.f32.partialorder %v4035_v46, %v4044_v5  ;;  %v4049_v20 = vand.u32 65535, %v4047_v53 }
0x3b68   :  { %v4048_v16 = vsel %vm4046_vm5, %v7380_v51, 128 }
0x3b69   :  { %v4052_v19 = vcvt.s32.f32 %v4050_v3  ;;  %v4064_v13 = vshra.s32 %v4048_v16, 16  ;;  %v4051_v57 = vcvt.s32.f32 %v4049_v20  ;;  %v4063_v42 = vand.u32 65535, %v4048_v16 }
0x3b6b   :  { %4053 = vmin.xlane.f32.xlu0 %v4052_v19  ;;  %v4066_v25 = vcvt.s32.f32 %v4064_v13  ;;  %v4065_v28 = vcvt.s32.f32 %v4063_v42 }
0x3b6f   :  { %4067 = vmin.xlane.f32.xlu0 %v4066_v25 }
0x3bf8   :  { %v4054_v6 = vpop.xlane.xlu0 %4053 }
0x3bf9   :  { %vm4055_vm6 = vcmp.eq.f32.partialorder %v4052_v19, %v4054_v6  ;;  %v4060_v24 = vcvt.f32.s32 %v4054_v6 }
0x3bfa   :  { %v4056_v43 = vsel %vm4055_vm6, %v4051_v57, inf }
0x3bfb   :  { %4057 = vmin.xlane.f32.xlu1 %v4056_v43  ;;  %v4061_v33 = vshll.u32 %v4060_v24, 16 }
0x3bfc   :  { %v4068_v29 = vpop.xlane.xlu0 %4067 }
0x3bfd   :  { %vm4069_vm7 = vcmp.eq.f32.partialorder %v4066_v25, %v4068_v29  ;;  %v4074_v40 = vcvt.f32.s32 %v4068_v29 }
0x3bfe   :  { %v4070_v22 = vsel %vm4069_vm7, %v4065_v28, inf }
0x3bff   :  { %4071 = vmin.xlane.f32.xlu0 %v4070_v22  ;;  %v4075_v4 = vshll.u32 %v4074_v40, 16 }
0x3c88   :  { %v4058_v0 = vpop.xlane.xlu1 %4057 }
0x3c89   :  { %v4059_v54 = vcvt.f32.s32 %v4058_v0 }
0x3c8b   :  { %v4062_v45 = vadd.s32 %v4061_v33, %v4059_v54 }
0x3c8c   :  { %v4072_v23 = vpop.xlane.xlu0 %4071 }
0x3c8d   :  { %4078 = vst.msk [vmem:[#allocation31 + $0x50] sm:$0xff] %vm2659_vm9, %v4062_v45  ;;  %v4073_v49 = vcvt.f32.s32 %v4072_v23  ;;  %vm4080_vm8 = vcmp.eq.s32.totalorder %v7380_v51, %v4062_v45 }
0x3c8f   :  { %v4076_v17 = vadd.s32 %v4075_v4, %v4073_v49 }
0x3c91   :  { %4079 = vst.msk [vmem:[#allocation31 + $0x58] sm:$0xff] %vm2659_vm9, %v4076_v17  ;;  %vm4081_vm10 = vcmp.eq.s32.totalorder %v7380_v51, %v4076_v17 }
0x3c92   :  { %vm4815_vm11 = vmpackc.low %vm4081_vm10, %vm4080_vm8 }
0x3c93   :  { %5466 = vmatmul.mubr.msk.bf16.vlgmr.msra.gmra.mrb[96].mxu0 %vm4815_vm11, %v6452_v10 }
0x3c94   :  { %5512 = vmatpush3.bf16.msra.mxu0 %v7630_v32  ;;  %5515 = vmatprep.mubr.msk.bf16.mxu0 %vm6449_vm1, %v6448_v8 }
0x3c95   :  { %5513 = vmatprep.subr.bf16.mxu0 %v6448_v8 }
0x3c98   :  { %5514 = vmatpush3.bf16.msra.mxu0 %v7636_v12 }
0x3c99   :  { %5519 = vmatprep.subr.bf16.mxu0 %v6448_v8 }
0x3d66   :  { %v4121_v63 = vpop.f32.mrb[96].mxu0 }
0x3d67   :  { %v5467_v62 = vpop.f32.mrb[97].mxu0 }
0x3d68   :  { %v4124_v37 = vpop.f32.mrb[98].mxu0 }
0x3d69   :  { %v4128_v27 = vpack.c.bf16 %v4124_v37, %v4121_v63  ;;  %v5468_v50 = vpop.f32.mrb[99].mxu0 }
0x3d6b   :  { %5480 = vmatmul.mubr.msk.bf16.vlgmr.msra.gmra.mrb[100].mxu1 %vm354_vm0, %v4128_v27 }
0x3d6c   :  { %5484 = vmatpush3.bf16.msra.mxu1 %v7641_v34  ;;  %5487 = vmatprep.mubr.msk.bf16.mxu1 %vm6449_vm1, %v6448_v8 }
0x3d6d   :  { %5485 = vmatprep.subr.bf16.mxu1 %v6448_v8 }
0x3d70   :  { %5486 = vmatpush3.bf16.msra.mxu1 %v7647_v39 }
0x3d71   :  { %5491 = vmatprep.subr.bf16.mxu1 %v6448_v8 }
0x3e3e   :  { %v4207_v32 = vpop.f32.mrb[100].mxu1 }
0x3e3f   :  { %v4208_v12 = vadd.f32 %v4207_v32, %v7783_v31  ;;  %v5481_v26 = vpop.f32.mrb[101].mxu1 }
0x3e40   :  { %v4210_v30 = vpop.f32.mrb[102].mxu1 }
0x3e41   :  { %v4214_v35 = vadd.f32 %v7652_v2, %v4208_v12  ;;  %v4211_v55 = vadd.f32 %v4210_v30, %v7786_v48  ;;  %v5482_v9 = vpop.f32.mrb[103].mxu1 }
0x3e43   :  { %5959 = vtanh.f32 %v4214_v35  ;;  %v4215_v7 = vadd.f32 %v7652_v2, %v4211_v55  ;;  %v4819_v46 = vmul.f32 -1.442695, %v4214_v35 }
0x3e45   :  { %5961 = vtanh.f32 %v4215_v7  ;;  %v4820_v31 = vmul.f32 -1.442695, %v4215_v7 }
0x3e46   :  { %5963 = vpow2.f32 %v4819_v46 }
0x3e47   :  { %5965 = vpow2.f32 %v4820_v31 }
0x3e4d   :  { %v5960_v14 = vpop.eup %5959 }
0x3e4e   :  { %4234 = vrot.lane.b32.xlu1 %v5960_v14, %s6429_s20 }
0x3e4f   :  { %v5962_v52 = vpop.eup %5961 }
0x3e50   :  { %4236 = vrot.lane.b32.xlu0 %v5962_v52, %s6429_s20  ;;  %v5964_v38 = vpop.eup %5963 }
0x3e51   :  { %v4222_v61 = vadd.f32 1.0, %v5964_v38  ;;  %v5966_v59 = vpop.eup %5965 }
0x3e52   :  { %v4223_v48 = vadd.f32 1.0, %v5966_v59 }
0x3e53   :  { %5967 = vrcp.f32 %v4222_v61 }
0x3e54   :  { %5969 = vrcp.f32 %v4223_v48 }
0x3e5d   :  { %v5968_v53 = vpop.eup %5967 }
0x3e5e   :  { %v5970_v19 = vpop.eup %5969  ;;  %v4230_v25 = vmul.f32 %v5968_v53, %v7749_v1 }
0x3e5f   :  { %v4231_v42 = vmul.f32 %v5970_v19, %v7753_v36 }
0x3ec0   :  { %v4235_v5 = vpop.permute.xlu1 %4234 }
0x3ec1   :  { %v4240_v3 = vmul.f32 %v5968_v53, %v4235_v5 }
0x3ec2   :  { %v4237_v16 = vpop.permute.xlu0 %4236 }
0x3ec3   :  { %4244 = vrot.lane.b32.xlu1 %v4240_v3, %s6451_s15  ;;  %v4241_v13 = vmul.f32 %v5970_v19, %v4237_v16 }
0x3ec7   :  { %4246 = vrot.lane.b32.xlu1 %v4241_v13, %s6451_s15 }
0x3f35   :  { %v4245_v20 = vpop.permute.xlu1 %4244 }
0x3f36   :  { %v7818_v57 = vadd.f32 %v4245_v20, %v4230_v25 }
0x3f38   :  { %5971 = vtanh.f32 %v7818_v57 }
0x3f39   :  { %v4247_v6 = vpop.permute.xlu1 %4246 }
0x3f3a   :  { %v7822_v43 = vadd.f32 %v4247_v6, %v4231_v42 }
0x3f3c   :  { %5973 = vtanh.f32 %v7822_v43 }
0x3f42   :  { %v5972_v28 = vpop.eup %5971 }
0x3f43   :  { %4256 = vrot.lane.b32.xlu0 %v5972_v28, %s6429_s20 }
0x3f46   :  { %v5974_v29 = vpop.eup %5973 }
0x3f47   :  { %4258 = vrot.lane.b32.xlu1 %v5974_v29, %s6429_s20 }
0x3fb5   :  { %v4257_v22 = vpop.permute.xlu0 %4256 }
0x3fb6   :  { %v4262_v24 = vmul.f32 %v5968_v53, %v4257_v22 }
0x3fb9   :  { %v4259_v1 = vpop.permute.xlu1 %4258 }
0x3fba   :  { %v4263_v0 = vmul.f32 %v5970_v19, %v4259_v1 }
0x3fbc   :  { %v4264_v33 = vpack.c.bf16 %v4263_v0, %v4262_v24 }
0x3fbe   :  { %4266 = vrot.lane.b32.xlu0 %v4264_v33, %s6451_s15 }
0x4030   :  { %v4267_v40 = vpop.permute.xlu0 %4266 }
0x4031   :  { %5488 = vmatmul.mubr.msk.bf16.vlgmr.msra.gmra.mrb[104].mxu1 %vm634_vm2, %v4267_v40  ;;  %5516 = vmatmul.mubr.msk.bf16.vlgmr.msra.gmra.mrb[100].mxu0 %vm634_vm2, %v4267_v40 }
0x4032   :  { %5492 = vmatpush3.bf16.msra.mxu1 %v7674_v47  ;;  %5507 = vmatprep.mubr.msk.bf16.mxu1 %vm6449_vm1, %v6448_v8 }
0x4033   :  { %5493 = vmatprep.subr.bf16.mxu1 %v6448_v8  ;;  %5520 = vmatpush3.bf16.msra.mxu0 %v7597_v15 }
0x4034   :  { %5521 = vmatprep.mubr.msk.bf16.mxu0 %vm6449_vm1, %v6448_v8  ;;  %5525 = vmatprep.subr.bf16.mxu0 %v6448_v8 }
0x4036   :  { %5494 = vmatpush3.bf16.msra.mxu1 %v7684_v56 }
0x4037   :  { %5495 = vmatprep.subr.bf16.mxu1 %v6448_v8 }
0x403a   :  { %5496 = vmatpush3.bf16.msra.mxu1 %v7688_v44 }
0x403b   :  { %5497 = vmatprep.subr.bf16.mxu1 %v6448_v8 }
0x403e   :  { %5498 = vmatpush3.bf16.msra.mxu1 %v7692_v21 }
0x403f   :  { %5499 = vmatprep.subr.bf16.mxu1 %v6448_v8 }
0x4042   :  { %5500 = vmatpush3.bf16.msra.mxu1 %v7696_v18 }
0x4043   :  { %5501 = vmatprep.subr.bf16.mxu1 %v6448_v8 }
0x4046   :  { %5502 = vmatpush3.bf16.msra.mxu1 %v7700_v11 }
0x4047   :  { %5503 = vmatprep.subr.bf16.mxu1 %v6448_v8 }
0x404a   :  { %5504 = vmatpush3.bf16.msra.mxu1 %v7704_v58 }
0x404b   :  { %5505 = vmatprep.subr.bf16.mxu1 %v6448_v8 }
0x404e   :  { %5506 = vmatpush3.bf16.msra.mxu1 %v7708_v60 }
0x4104   :  { %v4305_v15 = vpop.f32.mrb[104].mxu1  ;;  %v7851_v47 = vpop.f32.mrb[100].mxu0 }
0x4105   :  { %v4306_v56 = vadd.f32 %v7714_v41, %v4305_v15  ;;  %v5489_v44 = vpop.f32.mrb[105].mxu1  ;;  %v5517_v21 = vpop.f32.mrb[101].mxu0 }
0x4106   :  { %v4308_v18 = vpop.f32.mrb[106].mxu1  ;;  %v7854_v36 = vpop.f32.mrb[102].mxu0 }
0x4107   :  { %4313 = vst [vmem:[#allocation30 + $0x60] sm:$0xff] %v4306_v56  ;;  %v4309_v11 = vadd.f32 %v7714_v41, %v4308_v18  ;;  %4315 = vmax.xlane.f32.xlu1 %v4306_v56  ;;  %v5490_v54 = vpop.f32.mrb[107].mxu1  ;;  %v5518_v58 = vpop.f32.mrb[103].mxu0 }
0x4109   :  { %4314 = vst [vmem:[#allocation30 + $0x68] sm:$0xff] %v4309_v11  ;;  %4317 = vmax.xlane.f32.xlu0 %v4309_v11 }
0x4194   :  { %v4316_v45 = vpop.xlane.xlu1 %4315 }
0x4195   :  { %vm4319_vm12 = vcmp.eq.f32.partialorder %v4306_v56, %v4316_v45 }
0x4196   :  { %v4321_v60 = vsel %vm4319_vm12, %v7380_v51, 128  ;;  %v4318_v23 = vpop.xlane.xlu0 %4317 }
0x4197   :  { %v4324_v4 = vshra.s32 %v4321_v60, 16  ;;  %vm4320_vm13 = vcmp.eq.f32.partialorder %v4309_v11, %v4318_v23  ;;  %v4323_v37 = vand.u32 65535, %v4321_v60 }
0x4198   :  { %v4322_v49 = vsel %vm4320_vm13, %v7380_v51, 128 }
0x4199   :  { %v4326_v17 = vcvt.s32.f32 %v4324_v4  ;;  %v4338_v63 = vshra.s32 %v4322_v49, 16  ;;  %v4337_v27 = vand.u32 65535, %v4322_v49  ;;  %v4325_v50 = vcvt.s32.f32 %v4323_v37 }
0x419b   :  { %v4340_v62 = vcvt.s32.f32 %v4338_v63  ;;  %4327 = vmin.xlane.f32.xlu0 %v4326_v17  ;;  %v4339_v12 = vcvt.s32.f32 %v4337_v27 }
0x419d   :  { %4341 = vmin.xlane.f32.xlu1 %v4340_v62 }
0x4228   :  { %v4328_v32 = vpop.xlane.xlu0 %4327 }
0x4229   :  { %vm4329_vm14 = vcmp.eq.f32.partialorder %v4326_v17, %v4328_v32  ;;  %v4334_v55 = vcvt.f32.s32 %v4328_v32 }
0x422a   :  { %v4342_v26 = vpop.xlane.xlu1 %4341  ;;  %v4330_v30 = vsel %vm4329_vm14, %v4325_v50, inf }
0x422b   :  { %vm4343_vm15 = vcmp.eq.f32.partialorder %v4340_v62, %v4342_v26  ;;  %4331 = vmin.xlane.f32.xlu0 %v4330_v30  ;;  %v4348_v9 = vcvt.f32.s32 %v4342_v26  ;;  %v4335_v14 = vshll.u32 %v4334_v55, 16 }
0x422c   :  { %v4344_v35 = vsel %vm4343_vm15, %v4339_v12, inf }
0x422d   :  { %4345 = vmin.xlane.f32.xlu1 %v4344_v35  ;;  %v4349_v31 = vshll.u32 %v4348_v9, 16 }
0x42b8   :  { %v4332_v7 = vpop.xlane.xlu0 %4331 }
0x42b9   :  { %v4333_v52 = vcvt.f32.s32 %v4332_v7 }
0x42ba   :  { %v4346_v46 = vpop.xlane.xlu1 %4345 }
0x42bb   :  { %v4336_v38 = vadd.s32 %v4335_v14, %v4333_v52  ;;  %v4347_v61 = vcvt.f32.s32 %v4346_v46 }
0x42bd   :  { %4352 = vst.msk [vmem:[#allocation31 + $0x60] sm:$0xff] %vm2659_vm9, %v4336_v38  ;;  %v4350_v59 = vadd.s32 %v4349_v31, %v4347_v61  ;;  %vm4354_vm3 = vcmp.eq.s32.totalorder %v7380_v51, %v4336_v38 }
0x42bf   :  { %4353 = vst.msk [vmem:[#allocation31 + $0x68] sm:$0xff] %vm2659_vm9, %v4350_v59  ;;  %vm4355_vm4 = vcmp.eq.s32.totalorder %v7380_v51, %v4350_v59 }
0x42c0   :  { %vm4824_vm5 = vmpackc.low %vm4355_vm4, %vm4354_vm3 }
0x42c1   :  { %5508 = vmatmul.mubr.msk.bf16.vlgmr.msra.gmra.mrb[108].mxu1 %vm4824_vm5, %v6452_v10 }
0x4394   :  { %v4395_v48 = vpop.f32.mrb[108].mxu1 }
0x4395   :  { %v5509_v53 = vpop.f32.mrb[109].mxu1 }
0x4396   :  { %v4398_v5 = vpop.f32.mrb[110].mxu1 }
0x4397   :  { %v4402_v3 = vpack.c.bf16 %v4398_v5, %v4395_v48  ;;  %v5510_v16 = vpop.f32.mrb[111].mxu1 }
0x4399   :  { %5522 = vmatmul.mubr.msk.bf16.vlgmr.msra.gmra.mrb[104].mxu0 %vm354_vm0, %v4402_v3 }
0x439a   :  { %5526 = vmatpush3.bf16.msra.mxu0 %v7641_v34  ;;  %5529 = vmatprep.mubr.msk.bf16.mxu0 %vm6449_vm1, %v6448_v8 }
0x439b   :  { %5527 = vmatprep.subr.bf16.mxu0 %v6448_v8 }
0x439e   :  { %5528 = vmatpush3.bf16.msra.mxu0 %v7647_v39 }
0x446c   :  { %v4481_v19 = vpop.f32.mrb[104].mxu0 }
0x446d   :  { %v4482_v13 = vadd.f32 %v4481_v19, %v7851_v47  ;;  %v5523_v10 = vpop.f32.mrb[105].mxu0 }
0x446e   :  { %v4484_v25 = vpop.f32.mrb[106].mxu0 }
0x446f   :  { %v4488_v20 = vadd.f32 %v7652_v2, %v4482_v13  ;;  %v4485_v42 = vadd.f32 %v4484_v25, %v7854_v36  ;;  %v5524_v6 = vpop.f32.mrb[107].mxu0 }
0x4471   :  { %5975 = vtanh.f32 %v4488_v20  ;;  %v4489_v34 = vadd.f32 %v7652_v2, %v4485_v42  ;;  %v4828_v39 = vmul.f32 -1.442695, %v4488_v20 }
0x4473   :  { %5977 = vtanh.f32 %v4489_v34  ;;  %v4829_v29 = vmul.f32 -1.442695, %v4489_v34 }
0x4474   :  { %5979 = vpow2.f32 %v4828_v39 }
0x4475   :  { %5981 = vpow2.f32 %v4829_v29 }
0x447b   :  { %v5976_v28 = vpop.eup %5975 }
0x447c   :  { %4508 = vrot.lane.b32.xlu0 %v5976_v28, %s6429_s20 }
0x447d   :  { %v5978_v8 = vpop.eup %5977 }
0x447e   :  { %4510 = vrot.lane.b32.xlu1 %v5978_v8, %s6429_s20  ;;  %v5980_v22 = vpop.eup %5979 }
0x447f   :  { %v5982_v1 = vpop.eup %5981  ;;  %v4496_v24 = vadd.f32 1.0, %v5980_v22 }
0x4480   :  { %v4497_v0 = vadd.f32 1.0, %v5982_v1 }
0x4481   :  { %5983 = vrcp.f32 %v4496_v24 }
0x4482   :  { %5985 = vrcp.f32 %v4497_v0 }
0x448b   :  { %v5984_v33 = vpop.eup %5983 }
0x448c   :  { %v5986_v15 = vpop.eup %5985  ;;  %v4504_v44 = vmul.f32 %v5984_v33, %v7818_v57 }
0x448d   :  { %v4505_v36 = vmul.f32 %v5986_v15, %v7822_v43 }
0x44ee   :  { %v4509_v40 = vpop.permute.xlu0 %4508 }
0x44ef   :  { %v4514_v2 = vmul.f32 %v5984_v33, %v4509_v40 }
0x44f0   :  { %v4511_v47 = vpop.permute.xlu1 %4510 }
0x44f1   :  { %4518 = vrot.lane.b32.xlu1 %v4514_v2, %s6451_s15  ;;  %v4515_v56 = vmul.f32 %v5986_v15, %v4511_v47 }
0x44f3   :  { %4520 = vrot.lane.b32.xlu0 %v4515_v56, %s6451_s15 }
0x4563   :  { %v4519_v21 = vpop.permute.xlu1 %4518 }
0x4564   :  { %v4524_v18 = vadd.f32 %v4519_v21, %v4504_v44 }
0x4565   :  { %v4521_v11 = vpop.permute.xlu0 %4520 }
0x4566   :  { %5987 = vtanh.f32 %v4524_v18  ;;  %v4525_v54 = vadd.f32 %v4521_v11, %v4505_v36 }
0x4568   :  { %5989 = vtanh.f32 %v4525_v54 }
0x4570   :  { %v5988_v58 = vpop.eup %5987 }
0x4571   :  { %4530 = vrot.lane.b32.xlu1 %v5988_v58, %s6429_s20 }
0x4572   :  { %v5990_v45 = vpop.eup %5989 }
0x4573   :  { %4532 = vrot.lane.b32.xlu0 %v5990_v45, %s6429_s20  ;;  %s6453_s20 = smov [#allocation30]  }
0x4574   :  { %s4633_s6 = sshll.u32 %s6453_s20, 4  ;;  %s4634_s6 = int_to_ptr.vmem [resolvable:$true] %s4633_s6 }
0x4575   :  { %s6362_s10 = scalar_lea.vmem %s4634_s6, 2048  ;;  %p6367_p3 = scmp.lt.s32.totalorder %s4634_s6, %s4634_s6 }
0x4576   :  { %p6363_p2 = scmp.ne.s32.totalorder %s4634_s6, %s6362_s10  ;;  %p6368_p4 = scmp.lt.s32.totalorder %s6362_s10, %s6362_s10 }
0x4578   :  { %p6369_p5 = por %p6368_p4, %p6367_p3 }
0x457a   :  { %p6370_p6 = pnand %p6369_p5, %p6363_p2 }
0x45e3   :  { %v4531_v60 = vpop.permute.xlu1 %4530 }
0x45e4   :  { %v4536_v4 = vmul.f32 %v5984_v33, %v4531_v60 }
0x45e5   :  { %v4533_v23 = vpop.permute.xlu0 %4532 }
0x45e6   :  { %v4537_v49 = vmul.f32 %v5986_v15, %v4533_v23 }
0x45e8   :  { %v4538_v17 = vpack.c.bf16 %v4537_v49, %v4536_v4 }
0x45ea   :  { %4540 = vrot.lane.b32.xlu1 %v4538_v17, %s6451_s15 }
0x465c   :  { %v4541_v57 = vpop.permute.xlu1 %4540 }
0x465d   :  { %5530 = vmatmul.mubr.msk.bf16.vlgmr.msra.gmra.mrb[108].mxu0 %vm634_vm2, %v4541_v57 }
0x4730   :  { %v4579_v43 = vpop.f32.mrb[108].mxu0 }
0x4731   :  { %v4580_v63 = vadd.f32 %v7714_v41, %v4579_v43  ;;  %v5531_v62 = vpop.f32.mrb[109].mxu0 }
0x4732   :  { %v4582_v37 = vpop.f32.mrb[110].mxu0 }
0x4733   :  { %4587 = vst [vmem:[#allocation30 + $0x70] sm:$0xff] %v4580_v63  ;;  %v4583_v27 = vadd.f32 %v7714_v41, %v4582_v37  ;;  %4589 = vmax.xlane.f32.xlu0 %v4580_v63  ;;  %v5532_v50 = vpop.f32.mrb[111].mxu0 }
0x4735   :  { %4588 = vst [vmem:[#allocation30 + $0x78] sm:$0xff] %v4583_v27  ;;  %4591 = vmax.xlane.f32.xlu1 %v4583_v27 }
0x47c0   :  { %v4590_v32 = vpop.xlane.xlu0 %4589 }
0x47c1   :  { %vm4593_vm0 = vcmp.eq.f32.partialorder %v4580_v63, %v4590_v32 }
0x47c2   :  { %v4595_v12 = vsel %vm4593_vm0, %v7380_v51, 128  ;;  %v4592_v26 = vpop.xlane.xlu1 %4591 }
0x47c3   :  { %v4598_v30 = vshra.s32 %v4595_v12, 16  ;;  %vm4594_vm1 = vcmp.eq.f32.partialorder %v4583_v27, %v4592_v26  ;;  %v4597_v14 = vand.u32 65535, %v4595_v12 }
0x47c4   :  { %v4596_v35 = vsel %vm4594_vm1, %v7380_v51, 128 }
0x47c5   :  { %v4600_v55 = vcvt.s32.f32 %v4598_v30  ;;  %v4612_v9 = vshra.s32 %v4596_v35, 16  ;;  %v4599_v41 = vcvt.s32.f32 %v4597_v14  ;;  %v4611_v52 = vand.u32 65535, %v4596_v35 }
0x47c7   :  { %4601 = vmin.xlane.f32.xlu0 %v4600_v55  ;;  %v4614_v7 = vcvt.s32.f32 %v4612_v9  ;;  %v4613_v38 = vcvt.s32.f32 %v4611_v52 }
0x47cb   :  { %4615 = vmin.xlane.f32.xlu0 %v4614_v7 }
0x4854   :  { %v4602_v46 = vpop.xlane.xlu0 %4601 }
0x4855   :  { %vm4603_vm2 = vcmp.eq.f32.partialorder %v4600_v55, %v4602_v46 }
0x4856   :  { %v4604_v31 = vsel %vm4603_vm2, %v4599_v41, inf }
0x4857   :  { %4605 = vmin.xlane.f32.xlu1 %v4604_v31 }
0x4858   :  { %v4616_v61 = vpop.xlane.xlu0 %4615 }
0x4859   :  { %vm4617_vm6 = vcmp.eq.f32.partialorder %v4614_v7, %v4616_v61 }
0x485a   :  { %v4618_v59 = vsel %vm4617_vm6, %v4613_v38, inf }
0x485b   :  { %4619 = vmin.xlane.f32.xlu0 %v4618_v59 }
0x485c   :  { %6373 = shalt.err (!%p6370_p6)
}
0x485d   :  { %s7948_s3 = sld [smem:[#allocation46_spill]] }
0x4863   :  { %s6374_s9 = scalar_lea.hbm %s7948_s3, 2048 }
0x4864   :  { %p6375_p7 = scmp.ne.s32.totalorder %s7948_s3, %s6374_s9  ;;  %p6378_p8 = scmp.lt.u32.totalorder %s6374_s9, %s7948_s3 }
0x4866   :  { %p6380_p9 = pnand %p6378_p8, %p6375_p7 }
0x4868   :  { %6383 = shalt.err (!%p6380_p9)
}
0x4869   :  { %4639 = dma.vmem_to_hbm [thread:$0]  %s4634_s6, 2048, %s7948_s3, [#allocation6], %s6438_s13, %s6438_s13, %s6439_s30   ;;  %v4608_v51 = vcvt.f32.s32 %v4602_v46  ;;  %v4622_v5 = vcvt.f32.s32 %v4616_v61 }
0x486a   :  { %s6454_s16 = smov [#allocation31]  }
0x486b   :  { %v4609_v53 = vshll.u32 %v4608_v51, 16  ;;  %s4645_s8 = sshll.u32 %s6454_s16, 4  ;;  %v4623_v13 = vshll.u32 %v4622_v5, 16  ;;  %s4646_s8 = int_to_ptr.vmem [resolvable:$true] %s4645_s8 }
0x486c   :  { %s6384_s12 = scalar_lea.vmem %s4646_s8, 2048  ;;  %p6389_p11 = scmp.lt.s32.totalorder %s4646_s8, %s4646_s8 }
0x486d   :  { %p6385_p10 = scmp.ne.s32.totalorder %s4646_s8, %s6384_s12  ;;  %p6390_p12 = scmp.lt.s32.totalorder %s6384_s12, %s6384_s12 }
0x486f   :  { %p6391_p13 = por %p6390_p12, %p6389_p11 }
0x4871   :  { %p6392_p0 = pnand %p6391_p13, %p6385_p10 }
0x48e4   :  { %v4606_v48 = vpop.xlane.xlu1 %4605 }
0x48e5   :  { %v4607_v3 = vcvt.f32.s32 %v4606_v48 }
0x48e7   :  { %v4610_v16 = vadd.s32 %v4609_v53, %v4607_v3 }
0x48e8   :  { %v4620_v19 = vpop.xlane.xlu0 %4619 }
0x48e9   :  { %4626 = vst.msk [vmem:[#allocation31 + $0x70] sm:$0xff] %vm2659_vm9, %v4610_v16  ;;  %v4621_v10 = vcvt.f32.s32 %v4620_v19 }
0x48eb   :  { %v4624_v25 = vadd.s32 %v4623_v13, %v4621_v10 }
0x48ed   :  { %4627 = vst.msk [vmem:[#allocation31 + $0x78] sm:$0xff] %vm2659_vm9, %v4624_v25 }
0x48ee   :  { %6395 = shalt.err (!%p6392_p0)
}
0x48ef   :  { %s7949_s0 = sld [smem:[#allocation47_spill]] }
0x48f5   :  { %s6396_s29 = scalar_lea.hbm %s7949_s0, 2048 }
0x48f6   :  { %p6397_p1 = scmp.ne.s32.totalorder %s7949_s0, %s6396_s29  ;;  %p6400_p2 = scmp.lt.u32.totalorder %s6396_s29, %s7949_s0 }
0x48f8   :  { %p6402_p3 = pnand %p6400_p2, %p6397_p1 }
0x48fa   :  { %6405 = shalt.err (!%p6402_p3)
}
0x48fb   :  { %4651 = dma.vmem_to_hbm [thread:$0]  %s4646_s8, 2048, %s7949_s0, [#allocation32], %s6438_s13, %s6438_s13, %s6439_s30  }
0x48fc   :  { %6424 = dma.done.wait [#allocation6], 2048  }
0x48fd   :  { %6425 = vsyncadd [#allocation6], 4294965248 }
0x48fe   :  { %6426 = dma.done.wait [#allocation32], 2048  }
0x48ff   :  { %6427 = vsyncadd [#allocation32], 4294965248 }
0x4900   :  { %4658 = vsyncpa [#allocation5], 1 }
0x4901   :  { %4659 = vsyncpa [#allocation8], 1 }
0x4902   :  { %4660 = vsyncpa [#allocation11], 1 }
0x4903   :  { %4661 = vsyncpa [#allocation14], 1 }
0x4904   :  { %4662 = vsyncpa [#allocation17], 1 }
0x4905   :  { %4663 = vsyncpa [#allocation20], 1 }
0x4906   :  { %4664 = vsyncpa [#allocation23], 1 }
0x4907   :  { %4665 = vsyncpa [#allocation26], 1 }
0x4908   :  { %4666 = vsyncpa [#allocation29], 1 }
0x4909   :  { %4667 = vsyncpa [#allocation6], 1 }
0x490a   :  { %4668 = vsyncpa [#allocation32], 1 }

</bundles_post_ra>
